<compile_context>
chip_gen: v5e
topology: v5e:2x2
jax: 0.10.0
libtpu: 0.0.40
codegen_flags: <defaults>
</compile_context>

<pallas_src>
import math

import numpy as np
import jax
import jax.numpy as jnp
from jax import lax
from jax.experimental import pallas as pl
from jax.experimental.pallas import tpu as pltpu

# ----------------------------- configuration -----------------------------
B = 2
SEQ_LEN = 16
LABEL_LEN = 8
PRED_LEN = 8
ENC_IN = 4
DEC_IN = 4
C_OUT = 4
D_MODEL = 32
D_FF = 32
N_HEADS = 4
HEAD_DIM = D_MODEL // N_HEADS
MOVING_AVG = 5
MARK_DIM = 4              # freq='h' time features
INIT_SCALE = 0.1

assert LABEL_LEN + PRED_LEN == SEQ_LEN
assert ENC_IN == MARK_DIM  # lets x_enc / x_mark_enc / x_mark_dec pack into one data slab
L = SEQ_LEN               # encoder and decoder sequence length (both 16)
ROWS = B * L              # batch-folded row count for channels-last slabs

SLAB_W = 64               # slab lane width (widest block: kron(I_B, W2) is (16, 64))


# ----------------------------- static slab layout -----------------------------
def _slab_layout():
    """Static (row0, rows, cols) layout for every sub-block of the packed slab."""
    specs = []

    def add(name, r, c):
        specs.append((name, r, c))

    # constant time-axis operators / masks
    add("ima", ROWS, ROWS)                 # kron(I_B, I - A): seasonal_only
    add("imtm", ROWS, ROWS)                # kron(I_B, I - 1/L): my_Layernorm mean-sub
    add("osel_ln", B * PRED_LEN, ROWS)     # pred-window select @ (I - 1/L), fused
    add("mask_plain", ROWS, ROWS)          # additive batch-block mask
    add("mask_causal", ROWS, ROWS)         # additive causal + batch-block mask
    add("enc_stack", 3 * ROWS, ROWS)       # [Sm1;I;Sp1] @ (I-A), applied to x_enc
    add("dec_stack", 3 * ROWS, ROWS)       # [Sm1;I;Sp1] @ Sel @ (I-A)
    # embeddings
    for pre in ("enc", "dec"):
        for k in range(3):
            add(f"{pre}_tok{k}", ENC_IN, D_MODEL)
        add(f"{pre}_temp", MARK_DIM, D_MODEL)
    # attention blocks (per-head pre-split weights, lane-0 aligned)
    for pre in ("enc", "ds", "dc"):
        for h in range(N_HEADS):
            add(f"{pre}_wq{h}", D_MODEL, HEAD_DIM)
            add(f"{pre}_wk{h}", D_MODEL, HEAD_DIM)
            add(f"{pre}_wv{h}", D_MODEL, HEAD_DIM)
            add(f"{pre}_wo{h}", HEAD_DIM, D_MODEL)
        add(f"{pre}_bq", N_HEADS, HEAD_DIM)   # per-head query bias rows (scale folded)
        add(f"{pre}_bo", 1, D_MODEL)          # effective output bias (v-bias folded in)
    # FFN + my_Layernorm gamma
    for pre in ("enc", "dec"):
        add(f"{pre}_c1", D_MODEL, D_FF)
        add(f"{pre}_c2", D_FF, D_MODEL)
        add(f"{pre}_g", 1, D_MODEL)
    # decoder projection
    add("dproj_w", D_MODEL, C_OUT)
    add("dproj_b", 1, C_OUT)
    # trend ResidualMLP, batch block-diagonal, decomposition folded in
    add("tr_w1a", B * D_MODEL, ROWS)       # kron(I_B, W1 @ A)
    add("tr_b1", B * D_MODEL, 1)
    add("tr_w2", B * PRED_LEN, B * D_MODEL)  # kron(I_B, W2)
    add("tr_wsa", B * PRED_LEN, ROWS)      # kron(I_B, Ws @ A)
    add("tr_b2s", B * PRED_LEN, 1)         # b2 + bs (tiled over batch)

    layout, row = {}, 0
    for name, r, c in specs:
        assert c <= SLAB_W
        layout[name] = (row, r, c)
        row += ((r + 7) // 8) * 8          # every block starts sublane-aligned
    return layout, row


LAYOUT, SLAB_ROWS = _slab_layout()


# ----------------------------- fused kernel -----------------------------
def _adformer_kernel(slab_ref, data_ref, o_ref):
    f32 = jnp.float32

    def blk(name):
        r0, r, c = LAYOUT[name]
        return slab_ref[r0:r0 + r, 0:c]    # static slice: free ref view + one load

    def mm(a, b):
        return jnp.dot(a, b, preferred_element_type=f32)

    def mm_t(a, b):  # a @ b.T without materializing a transpose
        return lax.dot_general(a, b, (((1,), (1,)), ((), ())),
                               preferred_element_type=f32)

    def erf(x):
        # Abramowitz & Stegun 7.1.26 (|err| < 1.5e-7): exact-GELU fidelity
        # without relying on a native erf lowering in Mosaic.
        ax = jnp.abs(x)
        t = 1.0 / (1.0 + 0.3275911 * ax)
        poly = ((((1.061405429 * t - 1.453152027) * t + 1.421413741) * t
                 - 0.284496736) * t + 0.254829592) * t
        y = 1.0 - poly * jnp.exp(-ax * ax)
        return jnp.where(x >= 0.0, y, -y)

    def gelu(x):
        return 0.5 * x * (1.0 + erf(x * (1.0 / math.sqrt(2.0))))

    # ---- data (vertically packed: rows 0..31 x_enc, 32..63 mark_enc, 64..95 mark_dec)
    x_enc = data_ref[0:ROWS, :]
    xm_enc = data_ref[ROWS:2 * ROWS, :]
    xm_dec = data_ref[2 * ROWS:3 * ROWS, :]

    IMA = blk("ima")

    def seasonal(x):                       # series_decomp, seasonal part only
        return mm(IMA, x)

    def my_layernorm(x, gamma, op_name):
        # nn.LayerNorm (eps=1e-5, biased var) * gamma, then (I - time-mean)
        # [beta cancels exactly under the time-mean subtraction].
        mu = jnp.mean(x, axis=-1, keepdims=True)
        xc = x - mu
        var = jnp.mean(xc * xc, axis=-1, keepdims=True)
        z = xc * lax.rsqrt(var + 1e-5) * gamma
        return mm(blk(op_name), z)

    def attention(xq, xkv, pre, mask):
        # Both batch elements processed together; `mask` is the additive
        # block-diagonal batch mask (+ causal for decoder self-attention).
        bq = blk(pre + "_bq")              # (H, E): per-head query bias (1/sqrt(E) folded)
        acc = None
        for h in range(N_HEADS):
            q = mm(xq, blk(f"{pre}_wq{h}")) + bq[h]      # (ROWS, E), lanes 0..E-1
            k = mm(xkv, blk(f"{pre}_wk{h}"))             # key bias dropped (softmax-invariant)
            v = mm(xkv, blk(f"{pre}_wv{h}"))             # value bias folded into bo
            s = mm_t(q, k) + mask                        # (ROWS, ROWS)
            p = jnp.exp(s - jnp.max(s, axis=-1, keepdims=True))
            p = p * pl.reciprocal(jnp.sum(p, axis=-1, keepdims=True), approx=True)
            contrib = mm(mm(p, v), blk(f"{pre}_wo{h}"))  # (ROWS, D_MODEL)
            acc = contrib if acc is None else acc + contrib
        return acc + blk(pre + "_bo")

    def embed(stack_name, pre, marks):
        # circular Conv1d(k=3) token embedding + timeF linear, on the seasonal input
        x3 = mm(blk(stack_name), x_enc)    # (3*ROWS, Cin): stacked shifted seasonal input
        return (mm(x3[0:ROWS], blk(f"{pre}_tok0"))
                + mm(x3[ROWS:2 * ROWS], blk(f"{pre}_tok1"))
                + mm(x3[2 * ROWS:3 * ROWS], blk(f"{pre}_tok2"))
                + mm(marks, blk(f"{pre}_temp")))

    # ---- trend branch (trend_way == 0): ResidualMLP over the time axis ----
    # TODO(synk): ResidualMLP source not shown; pinned (as before) as
    #   Linear(seq_len->d_model) -> ReLU -> Linear(d_model->pred_len)
    #   + linear skip Linear(seq_len->pred_len).
    # Decomposition (moving average A) and batch folding are baked into tr_*.
    h1 = jnp.maximum(mm(blk("tr_w1a"), x_enc) + blk("tr_b1"), 0.0)       # (B*D_MODEL, C)
    trend_out = (mm(blk("tr_w2"), h1) + mm(blk("tr_wsa"), x_enc)
                 + blk("tr_b2s"))                                        # (B*PRED_LEN, C)

    # ---- encoder: DataEmbedding_wo_pos + EncoderLayer + my_Layernorm ----
    mask_plain = blk("mask_plain")
    enc_x = embed("enc_stack", "enc", xm_enc)
    x = seasonal(enc_x + attention(enc_x, enc_x, "enc", mask_plain))
    y = mm(gelu(mm(x, blk("enc_c1"))), blk("enc_c2"))
    enc_out = my_layernorm(seasonal(x + y), blk("enc_g"), "imtm")

    # ---- decoder (residual-trend outputs are discarded by Model.forward -> dropped) ----
    d = embed("dec_stack", "dec", xm_dec)
    d = seasonal(d + attention(d, d, "ds", blk("mask_causal")))
    d = seasonal(d + attention(d, enc_out, "dc", mask_plain))
    y = mm(gelu(mm(d, blk("dec_c1"))), blk("dec_c2"))
    d = seasonal(d + y)
    # final my_Layernorm fused with the pred-window row selection (osel_ln)
    sel = my_layernorm(d, blk("dec_g"), "osel_ln")                       # (B*PRED_LEN, D)
    o_ref[...] = mm(sel, blk("dproj_w")) + blk("dproj_b") + trend_out    # (B*PRED_LEN, C)


# ----------------------------- wrapper -----------------------------
def adformer_forward(slab, x_enc, x_mark_enc, x_dec, x_mark_dec):
    # x_dec values are never used by the reference forward (only its shape,
    # which is fixed by the pinned config); accepted for interface parity.
    del x_dec
    data = jnp.concatenate(
        [x_enc.reshape(ROWS, ENC_IN),
         x_mark_enc.reshape(ROWS, MARK_DIM),
         x_mark_dec.reshape(ROWS, MARK_DIM)], axis=0)                    # (3*ROWS, 4)

    out = pl.pallas_call(
        _adformer_kernel,
        out_shape=jax.ShapeDtypeStruct((B * PRED_LEN, C_OUT), jnp.float32),
        in_specs=[pl.BlockSpec(memory_space=pltpu.MemorySpace.VMEM),
                  pl.BlockSpec(memory_space=pltpu.MemorySpace.VMEM)],
        out_specs=pl.BlockSpec(memory_space=pltpu.MemorySpace.VMEM),
    )(slab, data)
    return out.reshape(B, PRED_LEN, C_OUT)


# ----------------------------- host-side packing (runs once) -----------------------------
def _kron_eye(M):
    return np.kron(np.eye(B, dtype=np.float32), np.asarray(M, np.float32))


def prepare_packed(params):
    """Fold / compose all weights & constant operators into one (SLAB_ROWS, 64) slab."""
    p = {k: np.asarray(v, np.float32) for k, v in params.items()}

    ka, pad = MOVING_AVG, (MOVING_AVG - 1) // 2
    A = np.zeros((L, L), np.float32)               # replicate-padded moving average
    for t in range(L):
        for w in range(ka):
            A[t, min(max(t + w - pad, 0), L - 1)] += 1.0 / ka
    I_L = np.eye(L, dtype=np.float32)
    Sm1 = np.zeros((L, L), np.float32)
    Sp1 = np.zeros((L, L), np.float32)
    for t in range(L):
        Sm1[t, (t - 1) % L] = 1.0                  # circular shifts (circular Conv1d pad)
        Sp1[t, (t + 1) % L] = 1.0
    Sel = np.zeros((L, L), np.float32)             # decoder seasonal init selector
    for t in range(LABEL_LEN):
        Sel[t, SEQ_LEN - LABEL_LEN + t] = 1.0
    Tm = np.full((L, L), 1.0 / L, np.float32)      # per-sample time mean

    ImA = _kron_eye(I_L - A)
    ImTm = _kron_eye(I_L - Tm)
    OutSel = np.zeros((B * PRED_LEN, ROWS), np.float32)
    for b in range(B):
        for t in range(PRED_LEN):
            OutSel[b * PRED_LEN + t, b * L + (L - PRED_LEN) + t] = 1.0
    osel_ln = OutSel @ ImTm                        # fuse pred-window select with mean-sub

    NEG = np.float32(-1e30)
    mask_plain = np.full((ROWS, ROWS), NEG, np.float32)
    mask_causal = np.full((ROWS, ROWS), NEG, np.float32)
    tril = np.where(np.tril(np.ones((L, L), np.float32)) > 0, 0.0, NEG).astype(np.float32)
    for b in range(B):
        sl = slice(b * L, (b + 1) * L)
        mask_plain[sl, sl] = 0.0
        mask_causal[sl, sl] = tril

    SelImA = _kron_eye(Sel) @ ImA
    enc_stack = np.concatenate([_kron_eye(Sm1) @ ImA, ImA, _kron_eye(Sp1) @ ImA], 0)
    dec_stack = np.concatenate([_kron_eye(Sm1) @ SelImA, SelImA, _kron_eye(Sp1) @ SelImA], 0)

    vals = {"ima": ImA, "imtm": ImTm, "osel_ln": osel_ln,
            "mask_plain": mask_plain, "mask_causal": mask_causal,
            "enc_stack": enc_stack, "dec_stack": dec_stack}

    # embeddings
    for pre in ("enc", "dec"):
        for k in range(3):
            vals[f"{pre}_tok{k}"] = p[f"{pre}_tok_w{k}"]
        vals[f"{pre}_temp"] = p[f"{pre}_temp_w"]

    # attention: split per head, fold 1/sqrt(E) into Wq & bq, drop key bias
    # (exact: softmax shift-invariant), fold value bias into output bias
    # (exact: attention rows sum to 1).
    scale = 1.0 / math.sqrt(HEAD_DIM)
    for pre in ("enc", "ds", "dc"):
        wq, wk, wv, wo = p[f"{pre}_wq"], p[f"{pre}_wk"], p[f"{pre}_wv"], p[f"{pre}_wo"]
        bq, bv, bo = p[f"{pre}_bq"], p[f"{pre}_bv"], p[f"{pre}_bo"]
        bo_eff = bo.copy()
        bq_rows = np.zeros((N_HEADS, HEAD_DIM), np.float32)
        for h in range(N_HEADS):
            c = slice(h * HEAD_DIM, (h + 1) * HEAD_DIM)
            vals[f"{pre}_wq{h}"] = wq[:, c] * scale
            vals[f"{pre}_wk{h}"] = wk[:, c]
            vals[f"{pre}_wv{h}"] = wv[:, c]
            vals[f"{pre}_wo{h}"] = wo[c, :]
            bq_rows[h] = bq[0, c] * scale
            bo_eff = bo_eff + bv[0:1, c] @ wo[c, :]
        vals[f"{pre}_bq"] = bq_rows
        vals[f"{pre}_bo"] = bo_eff
        # p[f"{pre}_bk"] intentionally unused (mathematically a no-op).

    # FFN + my_Layernorm gamma (beta cancels exactly -> unused)
    for pre in ("enc", "dec"):
        vals[f"{pre}_c1"] = p[f"{pre}_c1"]
        vals[f"{pre}_c2"] = p[f"{pre}_c2"]
        vals[f"{pre}_g"] = p[f"{pre}_ng"]

    vals["dproj_w"] = p["dproj_w"]
    vals["dproj_b"] = p["dproj_b"]

    # trend ResidualMLP: batch block-diagonal; moving-average decomposition folded in
    vals["tr_w1a"] = _kron_eye(p["rm_w1"] @ A)
    vals["tr_b1"] = np.tile(p["rm_b1"].reshape(-1, 1), (B, 1))
    vals["tr_w2"] = _kron_eye(p["rm_w2"])
    vals["tr_wsa"] = _kron_eye(p["rm_ws"] @ A)
    vals["tr_b2s"] = np.tile((p["rm_b2"] + p["rm_bs"]).reshape(-1, 1), (B, 1))

    slab = np.zeros((SLAB_ROWS, SLAB_W), np.float32)
    for name, (r0, r, c) in LAYOUT.items():
        v = np.asarray(vals[name], np.float32).reshape(r, c)
        slab[r0:r0 + r, :c] = v
    return jnp.asarray(slab)


# ----------------------------- parameter init -----------------------------
class _KeyGen:
    def __init__(self, key):
        self._key = key

    def __call__(self):
        self._key, sub = jax.random.split(self._key)
        return sub


def init_params(key):
    kg = _KeyGen(key)

    def nrm(shape):
        return INIT_SCALE * jax.random.normal(kg(), shape, jnp.float32)

    p = {}
    # ResidualMLP trend branch (pinned architecture, see TODO in kernel).
    p["rm_w1"], p["rm_b1"] = nrm((D_MODEL, SEQ_LEN)), jnp.zeros((D_MODEL,), jnp.float32)
    p["rm_w2"], p["rm_b2"] = nrm((PRED_LEN, D_MODEL)), jnp.zeros((PRED_LEN,), jnp.float32)
    p["rm_ws"], p["rm_bs"] = nrm((PRED_LEN, SEQ_LEN)), jnp.zeros((PRED_LEN,), jnp.float32)

    # Embeddings: token conv taps pre-transposed (Cin, D); temporal Linear (mark, D), no bias.
    for pre, cin in (("enc", ENC_IN), ("dec", DEC_IN)):
        for k in range(3):
            p[f"{pre}_tok_w{k}"] = nrm((cin, D_MODEL))
        p[f"{pre}_temp_w"] = nrm((MARK_DIM, D_MODEL))

    # Attention blocks: pre-transposed (in, out) weights and (1, out) biases.
    for pre in ("enc", "ds", "dc"):
        for nm in ("wq", "wk", "wv", "wo"):
            p[f"{pre}_{nm}"] = nrm((D_MODEL, D_MODEL))
        for nm in ("bq", "bk", "bv", "bo"):
            p[f"{pre}_{nm}"] = jnp.zeros((1, D_MODEL), jnp.float32)

    # FFN (Conv1d kernel=1, bias=False), pre-transposed (in, out).
    p["enc_c1"], p["enc_c2"] = nrm((D_MODEL, D_FF)), nrm((D_FF, D_MODEL))
    p["dec_c1"], p["dec_c2"] = nrm((D_MODEL, D_FF)), nrm((D_FF, D_MODEL))

    # my_Layernorm affine params (beta kept for fidelity; cancels exactly).
    p["enc_ng"], p["enc_nb"] = jnp.ones((1, D_MODEL), jnp.float32), jnp.zeros((1, D_MODEL), jnp.float32)
    p["dec_ng"], p["dec_nb"] = jnp.ones((1, D_MODEL), jnp.float32), jnp.zeros((1, D_MODEL), jnp.float32)

    # Decoder output projection Linear(d_model, c_out, bias=True), pre-transposed.
    p["dproj_w"], p["dproj_b"] = nrm((D_MODEL, C_OUT)), jnp.zeros((1, C_OUT), jnp.float32)
    return p


# ----------------------------- main -----------------------------
if __name__ == "__main__":
    key = jax.random.PRNGKey(0)
    k_in, k_par = jax.random.split(key)
    k1, k2, k3, k4 = jax.random.split(k_in, 4)

    x_enc = jax.random.normal(k1, (B, SEQ_LEN, ENC_IN), jnp.float32)
    x_mark_enc = jax.random.normal(k2, (B, SEQ_LEN, MARK_DIM), jnp.float32)
    x_dec = jax.random.normal(k3, (B, LABEL_LEN + PRED_LEN, DEC_IN), jnp.float32)
    x_mark_dec = jax.random.normal(k4, (B, LABEL_LEN + PRED_LEN, MARK_DIM), jnp.float32)

    params = init_params(k_par)
    slab = prepare_packed(params)          # one-time host-side weight/operator packing

    fwd = jax.jit(adformer_forward)
    out = fwd(slab, x_enc, x_mark_enc, x_dec, x_mark_dec)
    jax.block_until_ready(out)

    assert out.shape == (B, PRED_LEN, C_OUT), out.shape
    assert bool(jnp.all(jnp.isfinite(out)))
    print("KERNEL_OK")
</pallas_src>

<mosaic_0001>
module attributes {stable_mosaic.version = 11 : i64} {
  func.func @_adformer_kernel(%arg0: memref<2056x64xf32, #tpu.memory_space<vmem>>, %arg1: memref<96x4xf32, #tpu.memory_space<vmem>>, %arg2: memref<16x4xf32, #tpu.memory_space<vmem>>) attributes {dimension_semantics = [], scalar_prefetch = 0 : i64, scratch_operands = 0 : i64, tpu.core_type = #tpu.core_type<tc>} {
    %c0 = arith.constant 0 : index
    %c0_0 = arith.constant 0 : index
    %0 = vector.load %arg1[%c0, %c0_0] : memref<96x4xf32, #tpu.memory_space<vmem>>, vector<32x4xf32>
    %c32 = arith.constant 32 : index
    %c0_1 = arith.constant 0 : index
    %1 = vector.load %arg1[%c32, %c0_1] : memref<96x4xf32, #tpu.memory_space<vmem>>, vector<32x4xf32>
    %c64 = arith.constant 64 : index
    %c0_2 = arith.constant 0 : index
    %2 = vector.load %arg1[%c64, %c0_2] : memref<96x4xf32, #tpu.memory_space<vmem>>, vector<32x4xf32>
    %c0_3 = arith.constant 0 : index
    %c0_4 = arith.constant 0 : index
    %3 = vector.load %arg0[%c0_3, %c0_4] : memref<2056x64xf32, #tpu.memory_space<vmem>>, vector<32x32xf32>
    %c1880 = arith.constant 1880 : index
    %c0_5 = arith.constant 0 : index
    %4 = vector.load %arg0[%c1880, %c0_5] : memref<2056x64xf32, #tpu.memory_space<vmem>>, vector<64x32xf32>
    %cst = arith.constant dense<0.000000e+00> : vector<64x4xf32>
    %5 = tpu.matmul %4, %0, %cst {dimension_numbers = #tpu.dot_dimension_numbers<[1], [0], [0], [1], [0, 0, 1, 1], [], []>} : vector<64x32xf32>, vector<32x4xf32>, vector<64x4xf32> -> vector<64x4xf32>
    %c1944 = arith.constant 1944 : index
    %c0_6 = arith.constant 0 : index
    %6 = vector.load %arg0[%c1944, %c0_6] : memref<2056x64xf32, #tpu.memory_space<vmem>>, vector<64x1xf32>
    %7 = vector.broadcast %6 : vector<64x1xf32> to vector<64x4xf32>
    %8 = arith.addf %5, %7 : vector<64x4xf32>
    %cst_7 = arith.constant 0.000000e+00 : f32
    %9 = vector.broadcast %cst_7 : f32 to vector<64x4xf32>
    %10 = arith.maximumf %8, %9 : vector<64x4xf32>
    %c2008 = arith.constant 2008 : index
    %c0_8 = arith.constant 0 : index
    %11 = vector.load %arg0[%c2008, %c0_8] : memref<2056x64xf32, #tpu.memory_space<vmem>>, vector<16x64xf32>
    %cst_9 = arith.constant dense<0.000000e+00> : vector<16x4xf32>
    %12 = tpu.matmul %11, %10, %cst_9 {dimension_numbers = #tpu.dot_dimension_numbers<[1], [0], [0], [1], [0, 0, 1, 1], [], []>} : vector<16x64xf32>, vector<64x4xf32>, vector<16x4xf32> -> vector<16x4xf32>
    %c2024 = arith.constant 2024 : index
    %c0_10 = arith.constant 0 : index
    %13 = vector.load %arg0[%c2024, %c0_10] : memref<2056x64xf32, #tpu.memory_space<vmem>>, vector<16x32xf32>
    %cst_11 = arith.constant dense<0.000000e+00> : vector<16x4xf32>
    %14 = tpu.matmul %13, %0, %cst_11 {dimension_numbers = #tpu.dot_dimension_numbers<[1], [0], [0], [1], [0, 0, 1, 1], [], []>} : vector<16x32xf32>, vector<32x4xf32>, vector<16x4xf32> -> vector<16x4xf32>
    %15 = arith.addf %12, %14 : vector<16x4xf32>
    %c2040 = arith.constant 2040 : index
    %c0_12 = arith.constant 0 : index
    %16 = vector.load %arg0[%c2040, %c0_12] : memref<2056x64xf32, #tpu.memory_space<vmem>>, vector<16x1xf32>
    %17 = vector.broadcast %16 : vector<16x1xf32> to vector<16x4xf32>
    %18 = arith.addf %15, %17 : vector<16x4xf32>
    %c80 = arith.constant 80 : index
    %c0_13 = arith.constant 0 : index
    %19 = vector.load %arg0[%c80, %c0_13] : memref<2056x64xf32, #tpu.memory_space<vmem>>, vector<32x32xf32>
    %c144 = arith.constant 144 : index
    %c0_14 = arith.constant 0 : index
    %20 = vector.load %arg0[%c144, %c0_14] : memref<2056x64xf32, #tpu.memory_space<vmem>>, vector<96x32xf32>
    %cst_15 = arith.constant dense<0.000000e+00> : vector<96x4xf32>
    %21 = tpu.matmul %20, %0, %cst_15 {dimension_numbers = #tpu.dot_dimension_numbers<[1], [0], [0], [1], [0, 0, 1, 1], [], []>} : vector<96x32xf32>, vector<32x4xf32>, vector<96x4xf32> -> vector<96x4xf32>
    %22 = vector.extract_strided_slice %21 {offsets = [0, 0], sizes = [32, 4], strides = [1, 1]} : vector<96x4xf32> to vector<32x4xf32>
    %c336 = arith.constant 336 : index
    %c0_16 = arith.constant 0 : index
    %23 = vector.load %arg0[%c336, %c0_16] : memref<2056x64xf32, #tpu.memory_space<vmem>>, vector<4x32xf32>
    %cst_17 = arith.constant dense<0.000000e+00> : vector<32x32xf32>
    %24 = tpu.matmul %22, %23, %cst_17 {dimension_numbers = #tpu.dot_dimension_numbers<[1], [0], [0], [1], [0, 0, 1, 1], [], []>} : vector<32x4xf32>, vector<4x32xf32>, vector<32x32xf32> -> vector<32x32xf32>
    %25 = vector.extract_strided_slice %21 {offsets = [32, 0], sizes = [32, 4], strides = [1, 1]} : vector<96x4xf32> to vector<32x4xf32>
    %c344 = arith.constant 344 : index
    %c0_18 = arith.constant 0 : index
    %26 = vector.load %arg0[%c344, %c0_18] : memref<2056x64xf32, #tpu.memory_space<vmem>>, vector<4x32xf32>
    %cst_19 = arith.constant dense<0.000000e+00> : vector<32x32xf32>
    %27 = tpu.matmul %25, %26, %cst_19 {dimension_numbers = #tpu.dot_dimension_numbers<[1], [0], [0], [1], [0, 0, 1, 1], [], []>} : vector<32x4xf32>, vector<4x32xf32>, vector<32x32xf32> -> vector<32x32xf32>
    %28 = arith.addf %24, %27 : vector<32x32xf32>
    %29 = vector.extract_strided_slice %21 {offsets = [64, 0], sizes = [32, 4], strides = [1, 1]} : vector<96x4xf32> to vector<32x4xf32>
    %c352 = arith.constant 352 : index
    %c0_20 = arith.constant 0 : index
    %30 = vector.load %arg0[%c352, %c0_20] : memref<2056x64xf32, #tpu.memory_space<vmem>>, vector<4x32xf32>
    %cst_21 = arith.constant dense<0.000000e+00> : vector<32x32xf32>
    %31 = tpu.matmul %29, %30, %cst_21 {dimension_numbers = #tpu.dot_dimension_numbers<[1], [0], [0], [1], [0, 0, 1, 1], [], []>} : vector<32x4xf32>, vector<4x32xf32>, vector<32x32xf32> -> vector<32x32xf32>
    %32 = arith.addf %28, %31 : vector<32x32xf32>
    %c360 = arith.constant 360 : index
    %c0_22 = arith.constant 0 : index
    %33 = vector.load %arg0[%c360, %c0_22] : memref<2056x64xf32, #tpu.memory_space<vmem>>, vector<4x32xf32>
    %cst_23 = arith.constant dense<0.000000e+00> : vector<32x32xf32>
    %34 = tpu.matmul %1, %33, %cst_23 {dimension_numbers = #tpu.dot_dimension_numbers<[1], [0], [0], [1], [0, 0, 1, 1], [], []>} : vector<32x4xf32>, vector<4x32xf32>, vector<32x32xf32> -> vector<32x32xf32>
    %35 = arith.addf %32, %34 : vector<32x32xf32>
    %c816 = arith.constant 816 : index
    %c0_24 = arith.constant 0 : index
    %36 = vector.load %arg0[%c816, %c0_24] : memref<2056x64xf32, #tpu.memory_space<vmem>>, vector<4x8xf32>
    %c400 = arith.constant 400 : index
    %c0_25 = arith.constant 0 : index
    %37 = vector.load %arg0[%c400, %c0_25] : memref<2056x64xf32, #tpu.memory_space<vmem>>, vector<32x8xf32>
    %cst_26 = arith.constant dense<0.000000e+00> : vector<32x8xf32>
    %38 = tpu.matmul %35, %37, %cst_26 {dimension_numbers = #tpu.dot_dimension_numbers<[1], [0], [0], [1], [0, 0, 1, 1], [], []>} : vector<32x32xf32>, vector<32x8xf32>, vector<32x8xf32> -> vector<32x8xf32>
    %39 = vector.extract_strided_slice %36 {offsets = [0, 0], sizes = [1, 8], strides = [1, 1]} : vector<4x8xf32> to vector<1x8xf32>
    %40 = vector.shape_cast %39 : vector<1x8xf32> to vector<8xf32>
    %41 = vector.shape_cast %40 : vector<8xf32> to vector<1x8xf32>
    %42 = vector.broadcast %41 : vector<1x8xf32> to vector<32x8xf32>
    %43 = arith.addf %38, %42 : vector<32x8xf32>
    %c432 = arith.constant 432 : index
    %c0_27 = arith.constant 0 : index
    %44 = vector.load %arg0[%c432, %c0_27] : memref<2056x64xf32, #tpu.memory_space<vmem>>, vector<32x8xf32>
    %cst_28 = arith.constant dense<0.000000e+00> : vector<32x8xf32>
    %45 = tpu.matmul %35, %44, %cst_28 {dimension_numbers = #tpu.dot_dimension_numbers<[1], [0], [0], [1], [0, 0, 1, 1], [], []>} : vector<32x32xf32>, vector<32x8xf32>, vector<32x8xf32> -> vector<32x8xf32>
    %c464 = arith.constant 464 : index
    %c0_29 = arith.constant 0 : index
    %46 = vector.load %arg0[%c464, %c0_29] : memref<2056x64xf32, #tpu.memory_space<vmem>>, vector<32x8xf32>
    %cst_30 = arith.constant dense<0.000000e+00> : vector<32x8xf32>
    %47 = tpu.matmul %35, %46, %cst_30 {dimension_numbers = #tpu.dot_dimension_numbers<[1], [0], [0], [1], [0, 0, 1, 1], [], []>} : vector<32x32xf32>, vector<32x8xf32>, vector<32x8xf32> -> vector<32x8xf32>
    %cst_31 = arith.constant dense<0.000000e+00> : vector<32x32xf32>
    %48 = tpu.matmul %43, %45, %cst_31 {dimension_numbers = #tpu.dot_dimension_numbers<[1], [1], [0], [0], [0, 0, 1, 0], [], []>} : vector<32x8xf32>, vector<32x8xf32>, vector<32x32xf32> -> vector<32x32xf32>
    %49 = arith.addf %48, %19 : vector<32x32xf32>
    %cst_32 = arith.constant dense<0xFF800000> : vector<32xf32>
    %50 = vector.multi_reduction <maximumf>, %49, %cst_32 [1] : vector<32x32xf32> to vector<32xf32>
    %51 = vector.shape_cast %50 : vector<32xf32> to vector<32x1xf32>
    %52 = vector.broadcast %51 : vector<32x1xf32> to vector<32x32xf32>
    %53 = arith.subf %49, %52 : vector<32x32xf32>
    %54 = math.exp %53 : vector<32x32xf32>
    %cst_33 = arith.constant dense<0.000000e+00> : vector<32xf32>
    %55 = vector.multi_reduction <add>, %54, %cst_33 [1] : vector<32x32xf32> to vector<32xf32>
    %56 = vector.shape_cast %55 : vector<32xf32> to vector<32x1xf32>
    %57 = tpu.reciprocal %56 {approx = true} : vector<32x1xf32> -> vector<32x1xf32>
    %58 = vector.broadcast %57 : vector<32x1xf32> to vector<32x32xf32>
    %59 = arith.mulf %54, %58 : vector<32x32xf32>
    %cst_34 = arith.constant dense<0.000000e+00> : vector<32x8xf32>
    %60 = tpu.matmul %59, %47, %cst_34 {dimension_numbers = #tpu.dot_dimension_numbers<[1], [0], [0], [1], [0, 0, 1, 1], [], []>} : vector<32x32xf32>, vector<32x8xf32>, vector<32x8xf32> -> vector<32x8xf32>
    %c496 = arith.constant 496 : index
    %c0_35 = arith.constant 0 : index
    %61 = vector.load %arg0[%c496, %c0_35] : memref<2056x64xf32, #tpu.memory_space<vmem>>, vector<8x32xf32>
    %cst_36 = arith.constant dense<0.000000e+00> : vector<32x32xf32>
    %62 = tpu.matmul %60, %61, %cst_36 {dimension_numbers = #tpu.dot_dimension_numbers<[1], [0], [0], [1], [0, 0, 1, 1], [], []>} : vector<32x8xf32>, vector<8x32xf32>, vector<32x32xf32> -> vector<32x32xf32>
    %c504 = arith.constant 504 : index
    %c0_37 = arith.constant 0 : index
    %63 = vector.load %arg0[%c504, %c0_37] : memref<2056x64xf32, #tpu.memory_space<vmem>>, vector<32x8xf32>
    %cst_38 = arith.constant dense<0.000000e+00> : vector<32x8xf32>
    %64 = tpu.matmul %35, %63, %cst_38 {dimension_numbers = #tpu.dot_dimension_numbers<[1], [0], [0], [1], [0, 0, 1, 1], [], []>} : vector<32x32xf32>, vector<32x8xf32>, vector<32x8xf32> -> vector<32x8xf32>
    %65 = vector.extract_strided_slice %36 {offsets = [1, 0], sizes = [1, 8], strides = [1, 1]} : vector<4x8xf32> to vector<1x8xf32>
    %66 = vector.shape_cast %65 : vector<1x8xf32> to vector<8xf32>
    %67 = vector.shape_cast %66 : vector<8xf32> to vector<1x8xf32>
    %68 = vector.broadcast %67 : vector<1x8xf32> to vector<32x8xf32>
    %69 = arith.addf %64, %68 : vector<32x8xf32>
    %c536 = arith.constant 536 : index
    %c0_39 = arith.constant 0 : index
    %70 = vector.load %arg0[%c536, %c0_39] : memref<2056x64xf32, #tpu.memory_space<vmem>>, vector<32x8xf32>
    %cst_40 = arith.constant dense<0.000000e+00> : vector<32x8xf32>
    %71 = tpu.matmul %35, %70, %cst_40 {dimension_numbers = #tpu.dot_dimension_numbers<[1], [0], [0], [1], [0, 0, 1, 1], [], []>} : vector<32x32xf32>, vector<32x8xf32>, vector<32x8xf32> -> vector<32x8xf32>
    %c568 = arith.constant 568 : index
    %c0_41 = arith.constant 0 : index
    %72 = vector.load %arg0[%c568, %c0_41] : memref<2056x64xf32, #tpu.memory_space<vmem>>, vector<32x8xf32>
    %cst_42 = arith.constant dense<0.000000e+00> : vector<32x8xf32>
    %73 = tpu.matmul %35, %72, %cst_42 {dimension_numbers = #tpu.dot_dimension_numbers<[1], [0], [0], [1], [0, 0, 1, 1], [], []>} : vector<32x32xf32>, vector<32x8xf32>, vector<32x8xf32> -> vector<32x8xf32>
    %cst_43 = arith.constant dense<0.000000e+00> : vector<32x32xf32>
    %74 = tpu.matmul %69, %71, %cst_43 {dimension_numbers = #tpu.dot_dimension_numbers<[1], [1], [0], [0], [0, 0, 1, 0], [], []>} : vector<32x8xf32>, vector<32x8xf32>, vector<32x32xf32> -> vector<32x32xf32>
    %75 = arith.addf %74, %19 : vector<32x32xf32>
    %cst_44 = arith.constant dense<0xFF800000> : vector<32xf32>
    %76 = vector.multi_reduction <maximumf>, %75, %cst_44 [1] : vector<32x32xf32> to vector<32xf32>
    %77 = vector.shape_cast %76 : vector<32xf32> to vector<32x1xf32>
    %78 = vector.broadcast %77 : vector<32x1xf32> to vector<32x32xf32>
    %79 = arith.subf %75, %78 : vector<32x32xf32>
    %80 = math.exp %79 : vector<32x32xf32>
    %cst_45 = arith.constant dense<0.000000e+00> : vector<32xf32>
    %81 = vector.multi_reduction <add>, %80, %cst_45 [1] : vector<32x32xf32> to vector<32xf32>
    %82 = vector.shape_cast %81 : vector<32xf32> to vector<32x1xf32>
    %83 = tpu.reciprocal %82 {approx = true} : vector<32x1xf32> -> vector<32x1xf32>
    %84 = vector.broadcast %83 : vector<32x1xf32> to vector<32x32xf32>
    %85 = arith.mulf %80, %84 : vector<32x32xf32>
    %cst_46 = arith.constant dense<0.000000e+00> : vector<32x8xf32>
    %86 = tpu.matmul %85, %73, %cst_46 {dimension_numbers = #tpu.dot_dimension_numbers<[1], [0], [0], [1], [0, 0, 1, 1], [], []>} : vector<32x32xf32>, vector<32x8xf32>, vector<32x8xf32> -> vector<32x8xf32>
    %c600 = arith.constant 600 : index
    %c0_47 = arith.constant 0 : index
    %87 = vector.load %arg0[%c600, %c0_47] : memref<2056x64xf32, #tpu.memory_space<vmem>>, vector<8x32xf32>
    %cst_48 = arith.constant dense<0.000000e+00> : vector<32x32xf32>
    %88 = tpu.matmul %86, %87, %cst_48 {dimension_numbers = #tpu.dot_dimension_numbers<[1], [0], [0], [1], [0, 0, 1, 1], [], []>} : vector<32x8xf32>, vector<8x32xf32>, vector<32x32xf32> -> vector<32x32xf32>
    %89 = arith.addf %62, %88 : vector<32x32xf32>
    %c608 = arith.constant 608 : index
    %c0_49 = arith.constant 0 : index
    %90 = vector.load %arg0[%c608, %c0_49] : memref<2056x64xf32, #tpu.memory_space<vmem>>, vector<32x8xf32>
    %cst_50 = arith.constant dense<0.000000e+00> : vector<32x8xf32>
    %91 = tpu.matmul %35, %90, %cst_50 {dimension_numbers = #tpu.dot_dimension_numbers<[1], [0], [0], [1], [0, 0, 1, 1], [], []>} : vector<32x32xf32>, vector<32x8xf32>, vector<32x8xf32> -> vector<32x8xf32>
    %92 = vector.extract_strided_slice %36 {offsets = [2, 0], sizes = [1, 8], strides = [1, 1]} : vector<4x8xf32> to vector<1x8xf32>
    %93 = vector.shape_cast %92 : vector<1x8xf32> to vector<8xf32>
    %94 = vector.shape_cast %93 : vector<8xf32> to vector<1x8xf32>
    %95 = vector.broadcast %94 : vector<1x8xf32> to vector<32x8xf32>
    %96 = arith.addf %91, %95 : vector<32x8xf32>
    %c640 = arith.constant 640 : index
    %c0_51 = arith.constant 0 : index
    %97 = vector.load %arg0[%c640, %c0_51] : memref<2056x64xf32, #tpu.memory_space<vmem>>, vector<32x8xf32>
    %cst_52 = arith.constant dense<0.000000e+00> : vector<32x8xf32>
    %98 = tpu.matmul %35, %97, %cst_52 {dimension_numbers = #tpu.dot_dimension_numbers<[1], [0], [0], [1], [0, 0, 1, 1], [], []>} : vector<32x32xf32>, vector<32x8xf32>, vector<32x8xf32> -> vector<32x8xf32>
    %c672 = arith.constant 672 : index
    %c0_53 = arith.constant 0 : index
    %99 = vector.load %arg0[%c672, %c0_53] : memref<2056x64xf32, #tpu.memory_space<vmem>>, vector<32x8xf32>
    %cst_54 = arith.constant dense<0.000000e+00> : vector<32x8xf32>
    %100 = tpu.matmul %35, %99, %cst_54 {dimension_numbers = #tpu.dot_dimension_numbers<[1], [0], [0], [1], [0, 0, 1, 1], [], []>} : vector<32x32xf32>, vector<32x8xf32>, vector<32x8xf32> -> vector<32x8xf32>
    %cst_55 = arith.constant dense<0.000000e+00> : vector<32x32xf32>
    %101 = tpu.matmul %96, %98, %cst_55 {dimension_numbers = #tpu.dot_dimension_numbers<[1], [1], [0], [0], [0, 0, 1, 0], [], []>} : vector<32x8xf32>, vector<32x8xf32>, vector<32x32xf32> -> vector<32x32xf32>
    %102 = arith.addf %101, %19 : vector<32x32xf32>
    %cst_56 = arith.constant dense<0xFF800000> : vector<32xf32>
    %103 = vector.multi_reduction <maximumf>, %102, %cst_56 [1] : vector<32x32xf32> to vector<32xf32>
    %104 = vector.shape_cast %103 : vector<32xf32> to vector<32x1xf32>
    %105 = vector.broadcast %104 : vector<32x1xf32> to vector<32x32xf32>
    %106 = arith.subf %102, %105 : vector<32x32xf32>
    %107 = math.exp %106 : vector<32x32xf32>
    %cst_57 = arith.constant dense<0.000000e+00> : vector<32xf32>
    %108 = vector.multi_reduction <add>, %107, %cst_57 [1] : vector<32x32xf32> to vector<32xf32>
    %109 = vector.shape_cast %108 : vector<32xf32> to vector<32x1xf32>
    %110 = tpu.reciprocal %109 {approx = true} : vector<32x1xf32> -> vector<32x1xf32>
    %111 = vector.broadcast %110 : vector<32x1xf32> to vector<32x32xf32>
    %112 = arith.mulf %107, %111 : vector<32x32xf32>
    %cst_58 = arith.constant dense<0.000000e+00> : vector<32x8xf32>
    %113 = tpu.matmul %112, %100, %cst_58 {dimension_numbers = #tpu.dot_dimension_numbers<[1], [0], [0], [1], [0, 0, 1, 1], [], []>} : vector<32x32xf32>, vector<32x8xf32>, vector<32x8xf32> -> vector<32x8xf32>
    %c704 = arith.constant 704 : index
    %c0_59 = arith.constant 0 : index
    %114 = vector.load %arg0[%c704, %c0_59] : memref<2056x64xf32, #tpu.memory_space<vmem>>, vector<8x32xf32>
    %cst_60 = arith.constant dense<0.000000e+00> : vector<32x32xf32>
    %115 = tpu.matmul %113, %114, %cst_60 {dimension_numbers = #tpu.dot_dimension_numbers<[1], [0], [0], [1], [0, 0, 1, 1], [], []>} : vector<32x8xf32>, vector<8x32xf32>, vector<32x32xf32> -> vector<32x32xf32>
    %116 = arith.addf %89, %115 : vector<32x32xf32>
    %c712 = arith.constant 712 : index
    %c0_61 = arith.constant 0 : index
    %117 = vector.load %arg0[%c712, %c0_61] : memref<2056x64xf32, #tpu.memory_space<vmem>>, vector<32x8xf32>
    %cst_62 = arith.constant dense<0.000000e+00> : vector<32x8xf32>
    %118 = tpu.matmul %35, %117, %cst_62 {dimension_numbers = #tpu.dot_dimension_numbers<[1], [0], [0], [1], [0, 0, 1, 1], [], []>} : vector<32x32xf32>, vector<32x8xf32>, vector<32x8xf32> -> vector<32x8xf32>
    %119 = vector.extract_strided_slice %36 {offsets = [3, 0], sizes = [1, 8], strides = [1, 1]} : vector<4x8xf32> to vector<1x8xf32>
    %120 = vector.shape_cast %119 : vector<1x8xf32> to vector<8xf32>
    %121 = vector.shape_cast %120 : vector<8xf32> to vector<1x8xf32>
    %122 = vector.broadcast %121 : vector<1x8xf32> to vector<32x8xf32>
    %123 = arith.addf %118, %122 : vector<32x8xf32>
    %c744 = arith.constant 744 : index
    %c0_63 = arith.constant 0 : index
    %124 = vector.load %arg0[%c744, %c0_63] : memref<2056x64xf32, #tpu.memory_space<vmem>>, vector<32x8xf32>
    %cst_64 = arith.constant dense<0.000000e+00> : vector<32x8xf32>
    %125 = tpu.matmul %35, %124, %cst_64 {dimension_numbers = #tpu.dot_dimension_numbers<[1], [0], [0], [1], [0, 0, 1, 1], [], []>} : vector<32x32xf32>, vector<32x8xf32>, vector<32x8xf32> -> vector<32x8xf32>
    %c776 = arith.constant 776 : index
    %c0_65 = arith.constant 0 : index
    %126 = vector.load %arg0[%c776, %c0_65] : memref<2056x64xf32, #tpu.memory_space<vmem>>, vector<32x8xf32>
    %cst_66 = arith.constant dense<0.000000e+00> : vector<32x8xf32>
    %127 = tpu.matmul %35, %126, %cst_66 {dimension_numbers = #tpu.dot_dimension_numbers<[1], [0], [0], [1], [0, 0, 1, 1], [], []>} : vector<32x32xf32>, vector<32x8xf32>, vector<32x8xf32> -> vector<32x8xf32>
    %cst_67 = arith.constant dense<0.000000e+00> : vector<32x32xf32>
    %128 = tpu.matmul %123, %125, %cst_67 {dimension_numbers = #tpu.dot_dimension_numbers<[1], [1], [0], [0], [0, 0, 1, 0], [], []>} : vector<32x8xf32>, vector<32x8xf32>, vector<32x32xf32> -> vector<32x32xf32>
    %129 = arith.addf %128, %19 : vector<32x32xf32>
    %cst_68 = arith.constant dense<0xFF800000> : vector<32xf32>
    %130 = vector.multi_reduction <maximumf>, %129, %cst_68 [1] : vector<32x32xf32> to vector<32xf32>
    %131 = vector.shape_cast %130 : vector<32xf32> to vector<32x1xf32>
    %132 = vector.broadcast %131 : vector<32x1xf32> to vector<32x32xf32>
    %133 = arith.subf %129, %132 : vector<32x32xf32>
    %134 = math.exp %133 : vector<32x32xf32>
    %cst_69 = arith.constant dense<0.000000e+00> : vector<32xf32>
    %135 = vector.multi_reduction <add>, %134, %cst_69 [1] : vector<32x32xf32> to vector<32xf32>
    %136 = vector.shape_cast %135 : vector<32xf32> to vector<32x1xf32>
    %137 = tpu.reciprocal %136 {approx = true} : vector<32x1xf32> -> vector<32x1xf32>
    %138 = vector.broadcast %137 : vector<32x1xf32> to vector<32x32xf32>
    %139 = arith.mulf %134, %138 : vector<32x32xf32>
    %cst_70 = arith.constant dense<0.000000e+00> : vector<32x8xf32>
    %140 = tpu.matmul %139, %127, %cst_70 {dimension_numbers = #tpu.dot_dimension_numbers<[1], [0], [0], [1], [0, 0, 1, 1], [], []>} : vector<32x32xf32>, vector<32x8xf32>, vector<32x8xf32> -> vector<32x8xf32>
    %c808 = arith.constant 808 : index
    %c0_71 = arith.constant 0 : index
    %141 = vector.load %arg0[%c808, %c0_71] : memref<2056x64xf32, #tpu.memory_space<vmem>>, vector<8x32xf32>
    %cst_72 = arith.constant dense<0.000000e+00> : vector<32x32xf32>
    %142 = tpu.matmul %140, %141, %cst_72 {dimension_numbers = #tpu.dot_dimension_numbers<[1], [0], [0], [1], [0, 0, 1, 1], [], []>} : vector<32x8xf32>, vector<8x32xf32>, vector<32x32xf32> -> vector<32x32xf32>
    %143 = arith.addf %116, %142 : vector<32x32xf32>
    %c824 = arith.constant 824 : index
    %c0_73 = arith.constant 0 : index
    %144 = vector.load %arg0[%c824, %c0_73] : memref<2056x64xf32, #tpu.memory_space<vmem>>, vector<1x32xf32>
    %145 = vector.broadcast %144 : vector<1x32xf32> to vector<32x32xf32>
    %146 = arith.addf %143, %145 : vector<32x32xf32>
    %147 = arith.addf %35, %146 : vector<32x32xf32>
    %cst_74 = arith.constant dense<0.000000e+00> : vector<32x32xf32>
    %148 = tpu.matmul %3, %147, %cst_74 {dimension_numbers = #tpu.dot_dimension_numbers<[1], [0], [0], [1], [0, 0, 1, 1], [], []>} : vector<32x32xf32>, vector<32x32xf32>, vector<32x32xf32> -> vector<32x32xf32>
    %c1696 = arith.constant 1696 : index
    %c0_75 = arith.constant 0 : index
    %149 = vector.load %arg0[%c1696, %c0_75] : memref<2056x64xf32, #tpu.memory_space<vmem>>, vector<32x32xf32>
    %cst_76 = arith.constant dense<0.000000e+00> : vector<32x32xf32>
    %150 = tpu.matmul %148, %149, %cst_76 {dimension_numbers = #tpu.dot_dimension_numbers<[1], [0], [0], [1], [0, 0, 1, 1], [], []>} : vector<32x32xf32>, vector<32x32xf32>, vector<32x32xf32> -> vector<32x32xf32>
    %cst_77 = arith.constant 5.000000e-01 : f32
    %151 = vector.broadcast %cst_77 : f32 to vector<32x32xf32>
    %152 = arith.mulf %151, %150 : vector<32x32xf32>
    %cst_78 = arith.constant 0.707106769 : f32
    %153 = vector.broadcast %cst_78 : f32 to vector<32x32xf32>
    %154 = arith.mulf %150, %153 : vector<32x32xf32>
    %155 = math.absf %154 : vector<32x32xf32>
    %cst_79 = arith.constant 0.327591091 : f32
    %156 = vector.broadcast %cst_79 : f32 to vector<32x32xf32>
    %157 = arith.mulf %156, %155 : vector<32x32xf32>
    %cst_80 = arith.constant 1.000000e+00 : f32
    %158 = vector.broadcast %cst_80 : f32 to vector<32x32xf32>
    %159 = arith.addf %158, %157 : vector<32x32xf32>
    %cst_81 = arith.constant 1.000000e+00 : f32
    %160 = vector.broadcast %cst_81 : f32 to vector<32x32xf32>
    %161 = arith.divf %160, %159 : vector<32x32xf32>
    %cst_82 = arith.constant 1.06140542 : f32
    %162 = vector.broadcast %cst_82 : f32 to vector<32x32xf32>
    %163 = arith.mulf %162, %161 : vector<32x32xf32>
    %cst_83 = arith.constant 1.45315206 : f32
    %164 = vector.broadcast %cst_83 : f32 to vector<32x32xf32>
    %165 = arith.subf %163, %164 : vector<32x32xf32>
    %166 = arith.mulf %165, %161 : vector<32x32xf32>
    %cst_84 = arith.constant 1.42141378 : f32
    %167 = vector.broadcast %cst_84 : f32 to vector<32x32xf32>
    %168 = arith.addf %166, %167 : vector<32x32xf32>
    %169 = arith.mulf %168, %161 : vector<32x32xf32>
    %cst_85 = arith.constant 0.284496725 : f32
    %170 = vector.broadcast %cst_85 : f32 to vector<32x32xf32>
    %171 = arith.subf %169, %170 : vector<32x32xf32>
    %172 = arith.mulf %171, %161 : vector<32x32xf32>
    %cst_86 = arith.constant 0.254829586 : f32
    %173 = vector.broadcast %cst_86 : f32 to vector<32x32xf32>
    %174 = arith.addf %172, %173 : vector<32x32xf32>
    %175 = arith.mulf %174, %161 : vector<32x32xf32>
    %cst_87 = arith.constant 0.000000e+00 : f32
    %176 = vector.broadcast %cst_87 : f32 to vector<32x32xf32>
    %177 = arith.subf %176, %155 : vector<32x32xf32>
    %178 = arith.mulf %177, %155 : vector<32x32xf32>
    %179 = math.exp %178 : vector<32x32xf32>
    %180 = arith.mulf %175, %179 : vector<32x32xf32>
    %cst_88 = arith.constant 1.000000e+00 : f32
    %181 = vector.broadcast %cst_88 : f32 to vector<32x32xf32>
    %182 = arith.subf %181, %180 : vector<32x32xf32>
    %cst_89 = arith.constant 0.000000e+00 : f32
    %183 = vector.broadcast %cst_89 : f32 to vector<32x32xf32>
    %184 = arith.cmpf oge, %154, %183 : vector<32x32xf32>
    %cst_90 = arith.constant 0.000000e+00 : f32
    %185 = vector.broadcast %cst_90 : f32 to vector<32x32xf32>
    %186 = arith.subf %185, %182 : vector<32x32xf32>
    %187 = arith.select %184, %182, %186 : vector<32x32xi1>, vector<32x32xf32>
    %cst_91 = arith.constant 1.000000e+00 : f32
    %188 = vector.broadcast %cst_91 : f32 to vector<32x32xf32>
    %189 = arith.addf %188, %187 : vector<32x32xf32>
    %190 = arith.mulf %152, %189 : vector<32x32xf32>
    %c1728 = arith.constant 1728 : index
    %c0_92 = arith.constant 0 : index
    %191 = vector.load %arg0[%c1728, %c0_92] : memref<2056x64xf32, #tpu.memory_space<vmem>>, vector<32x32xf32>
    %cst_93 = arith.constant dense<0.000000e+00> : vector<32x32xf32>
    %192 = tpu.matmul %190, %191, %cst_93 {dimension_numbers = #tpu.dot_dimension_numbers<[1], [0], [0], [1], [0, 0, 1, 1], [], []>} : vector<32x32xf32>, vector<32x32xf32>, vector<32x32xf32> -> vector<32x32xf32>
    %193 = arith.addf %148, %192 : vector<32x32xf32>
    %cst_94 = arith.constant dense<0.000000e+00> : vector<32x32xf32>
    %194 = tpu.matmul %3, %193, %cst_94 {dimension_numbers = #tpu.dot_dimension_numbers<[1], [0], [0], [1], [0, 0, 1, 1], [], []>} : vector<32x32xf32>, vector<32x32xf32>, vector<32x32xf32> -> vector<32x32xf32>
    %c1760 = arith.constant 1760 : index
    %c0_95 = arith.constant 0 : index
    %195 = vector.load %arg0[%c1760, %c0_95] : memref<2056x64xf32, #tpu.memory_space<vmem>>, vector<1x32xf32>
    %cst_96 = arith.constant dense<0.000000e+00> : vector<32xf32>
    %196 = vector.multi_reduction <add>, %194, %cst_96 [1] : vector<32x32xf32> to vector<32xf32>
    %197 = vector.shape_cast %196 : vector<32xf32> to vector<32x1xf32>
    %cst_97 = arith.constant 3.200000e+01 : f32
    %198 = vector.broadcast %cst_97 : f32 to vector<32x1xf32>
    %199 = arith.divf %197, %198 : vector<32x1xf32>
    %200 = vector.broadcast %199 : vector<32x1xf32> to vector<32x32xf32>
    %201 = arith.subf %194, %200 : vector<32x32xf32>
    %202 = arith.mulf %201, %201 : vector<32x32xf32>
    %cst_98 = arith.constant dense<0.000000e+00> : vector<32xf32>
    %203 = vector.multi_reduction <add>, %202, %cst_98 [1] : vector<32x32xf32> to vector<32xf32>
    %204 = vector.shape_cast %203 : vector<32xf32> to vector<32x1xf32>
    %cst_99 = arith.constant 3.200000e+01 : f32
    %205 = vector.broadcast %cst_99 : f32 to vector<32x1xf32>
    %206 = arith.divf %204, %205 : vector<32x1xf32>
    %cst_100 = arith.constant 9.99999974E-6 : f32
    %207 = vector.broadcast %cst_100 : f32 to vector<32x1xf32>
    %208 = arith.addf %206, %207 : vector<32x1xf32>
    %209 = math.rsqrt %208 : vector<32x1xf32>
    %210 = vector.broadcast %209 : vector<32x1xf32> to vector<32x32xf32>
    %211 = arith.mulf %201, %210 : vector<32x32xf32>
    %212 = vector.broadcast %195 : vector<1x32xf32> to vector<32x32xf32>
    %213 = arith.mulf %211, %212 : vector<32x32xf32>
    %c32_101 = arith.constant 32 : index
    %c0_102 = arith.constant 0 : index
    %214 = vector.load %arg0[%c32_101, %c0_102] : memref<2056x64xf32, #tpu.memory_space<vmem>>, vector<32x32xf32>
    %cst_103 = arith.constant dense<0.000000e+00> : vector<32x32xf32>
    %215 = tpu.matmul %214, %213, %cst_103 {dimension_numbers = #tpu.dot_dimension_numbers<[1], [0], [0], [1], [0, 0, 1, 1], [], []>} : vector<32x32xf32>, vector<32x32xf32>, vector<32x32xf32> -> vector<32x32xf32>
    %c240 = arith.constant 240 : index
    %c0_104 = arith.constant 0 : index
    %216 = vector.load %arg0[%c240, %c0_104] : memref<2056x64xf32, #tpu.memory_space<vmem>>, vector<96x32xf32>
    %cst_105 = arith.constant dense<0.000000e+00> : vector<96x4xf32>
    %217 = tpu.matmul %216, %0, %cst_105 {dimension_numbers = #tpu.dot_dimension_numbers<[1], [0], [0], [1], [0, 0, 1, 1], [], []>} : vector<96x32xf32>, vector<32x4xf32>, vector<96x4xf32> -> vector<96x4xf32>
    %218 = vector.extract_strided_slice %217 {offsets = [0, 0], sizes = [32, 4], strides = [1, 1]} : vector<96x4xf32> to vector<32x4xf32>
    %c368 = arith.constant 368 : index
    %c0_106 = arith.constant 0 : index
    %219 = vector.load %arg0[%c368, %c0_106] : memref<2056x64xf32, #tpu.memory_space<vmem>>, vector<4x32xf32>
    %cst_107 = arith.constant dense<0.000000e+00> : vector<32x32xf32>
    %220 = tpu.matmul %218, %219, %cst_107 {dimension_numbers = #tpu.dot_dimension_numbers<[1], [0], [0], [1], [0, 0, 1, 1], [], []>} : vector<32x4xf32>, vector<4x32xf32>, vector<32x32xf32> -> vector<32x32xf32>
    %221 = vector.extract_strided_slice %217 {offsets = [32, 0], sizes = [32, 4], strides = [1, 1]} : vector<96x4xf32> to vector<32x4xf32>
    %c376 = arith.constant 376 : index
    %c0_108 = arith.constant 0 : index
    %222 = vector.load %arg0[%c376, %c0_108] : memref<2056x64xf32, #tpu.memory_space<vmem>>, vector<4x32xf32>
    %cst_109 = arith.constant dense<0.000000e+00> : vector<32x32xf32>
    %223 = tpu.matmul %221, %222, %cst_109 {dimension_numbers = #tpu.dot_dimension_numbers<[1], [0], [0], [1], [0, 0, 1, 1], [], []>} : vector<32x4xf32>, vector<4x32xf32>, vector<32x32xf32> -> vector<32x32xf32>
    %224 = arith.addf %220, %223 : vector<32x32xf32>
    %225 = vector.extract_strided_slice %217 {offsets = [64, 0], sizes = [32, 4], strides = [1, 1]} : vector<96x4xf32> to vector<32x4xf32>
    %c384 = arith.constant 384 : index
    %c0_110 = arith.constant 0 : index
    %226 = vector.load %arg0[%c384, %c0_110] : memref<2056x64xf32, #tpu.memory_space<vmem>>, vector<4x32xf32>
    %cst_111 = arith.constant dense<0.000000e+00> : vector<32x32xf32>
    %227 = tpu.matmul %225, %226, %cst_111 {dimension_numbers = #tpu.dot_dimension_numbers<[1], [0], [0], [1], [0, 0, 1, 1], [], []>} : vector<32x4xf32>, vector<4x32xf32>, vector<32x32xf32> -> vector<32x32xf32>
    %228 = arith.addf %224, %227 : vector<32x32xf32>
    %c392 = arith.constant 392 : index
    %c0_112 = arith.constant 0 : index
    %229 = vector.load %arg0[%c392, %c0_112] : memref<2056x64xf32, #tpu.memory_space<vmem>>, vector<4x32xf32>
    %cst_113 = arith.constant dense<0.000000e+00> : vector<32x32xf32>
    %230 = tpu.matmul %2, %229, %cst_113 {dimension_numbers = #tpu.dot_dimension_numbers<[1], [0], [0], [1], [0, 0, 1, 1], [], []>} : vector<32x4xf32>, vector<4x32xf32>, vector<32x32xf32> -> vector<32x32xf32>
    %231 = arith.addf %228, %230 : vector<32x32xf32>
    %c112 = arith.constant 112 : index
    %c0_114 = arith.constant 0 : index
    %232 = vector.load %arg0[%c112, %c0_114] : memref<2056x64xf32, #tpu.memory_space<vmem>>, vector<32x32xf32>
    %c1248 = arith.constant 1248 : index
    %c0_115 = arith.constant 0 : index
    %233 = vector.load %arg0[%c1248, %c0_115] : memref<2056x64xf32, #tpu.memory_space<vmem>>, vector<4x8xf32>
    %c832 = arith.constant 832 : index
    %c0_116 = arith.constant 0 : index
    %234 = vector.load %arg0[%c832, %c0_116] : memref<2056x64xf32, #tpu.memory_space<vmem>>, vector<32x8xf32>
    %cst_117 = arith.constant dense<0.000000e+00> : vector<32x8xf32>
    %235 = tpu.matmul %231, %234, %cst_117 {dimension_numbers = #tpu.dot_dimension_numbers<[1], [0], [0], [1], [0, 0, 1, 1], [], []>} : vector<32x32xf32>, vector<32x8xf32>, vector<32x8xf32> -> vector<32x8xf32>
    %236 = vector.extract_strided_slice %233 {offsets = [0, 0], sizes = [1, 8], strides = [1, 1]} : vector<4x8xf32> to vector<1x8xf32>
    %237 = vector.shape_cast %236 : vector<1x8xf32> to vector<8xf32>
    %238 = vector.shape_cast %237 : vector<8xf32> to vector<1x8xf32>
    %239 = vector.broadcast %238 : vector<1x8xf32> to vector<32x8xf32>
    %240 = arith.addf %235, %239 : vector<32x8xf32>
    %c864 = arith.constant 864 : index
    %c0_118 = arith.constant 0 : index
    %241 = vector.load %arg0[%c864, %c0_118] : memref<2056x64xf32, #tpu.memory_space<vmem>>, vector<32x8xf32>
    %cst_119 = arith.constant dense<0.000000e+00> : vector<32x8xf32>
    %242 = tpu.matmul %231, %241, %cst_119 {dimension_numbers = #tpu.dot_dimension_numbers<[1], [0], [0], [1], [0, 0, 1, 1], [], []>} : vector<32x32xf32>, vector<32x8xf32>, vector<32x8xf32> -> vector<32x8xf32>
    %c896 = arith.constant 896 : index
    %c0_120 = arith.constant 0 : index
    %243 = vector.load %arg0[%c896, %c0_120] : memref<2056x64xf32, #tpu.memory_space<vmem>>, vector<32x8xf32>
    %cst_121 = arith.constant dense<0.000000e+00> : vector<32x8xf32>
    %244 = tpu.matmul %231, %243, %cst_121 {dimension_numbers = #tpu.dot_dimension_numbers<[1], [0], [0], [1], [0, 0, 1, 1], [], []>} : vector<32x32xf32>, vector<32x8xf32>, vector<32x8xf32> -> vector<32x8xf32>
    %cst_122 = arith.constant dense<0.000000e+00> : vector<32x32xf32>
    %245 = tpu.matmul %240, %242, %cst_122 {dimension_numbers = #tpu.dot_dimension_numbers<[1], [1], [0], [0], [0, 0, 1, 0], [], []>} : vector<32x8xf32>, vector<32x8xf32>, vector<32x32xf32> -> vector<32x32xf32>
    %246 = arith.addf %245, %232 : vector<32x32xf32>
    %cst_123 = arith.constant dense<0xFF800000> : vector<32xf32>
    %247 = vector.multi_reduction <maximumf>, %246, %cst_123 [1] : vector<32x32xf32> to vector<32xf32>
    %248 = vector.shape_cast %247 : vector<32xf32> to vector<32x1xf32>
    %249 = vector.broadcast %248 : vector<32x1xf32> to vector<32x32xf32>
    %250 = arith.subf %246, %249 : vector<32x32xf32>
    %251 = math.exp %250 : vector<32x32xf32>
    %cst_124 = arith.constant dense<0.000000e+00> : vector<32xf32>
    %252 = vector.multi_reduction <add>, %251, %cst_124 [1] : vector<32x32xf32> to vector<32xf32>
    %253 = vector.shape_cast %252 : vector<32xf32> to vector<32x1xf32>
    %254 = tpu.reciprocal %253 {approx = true} : vector<32x1xf32> -> vector<32x1xf32>
    %255 = vector.broadcast %254 : vector<32x1xf32> to vector<32x32xf32>
    %256 = arith.mulf %251, %255 : vector<32x32xf32>
    %cst_125 = arith.constant dense<0.000000e+00> : vector<32x8xf32>
    %257 = tpu.matmul %256, %244, %cst_125 {dimension_numbers = #tpu.dot_dimension_numbers<[1], [0], [0], [1], [0, 0, 1, 1], [], []>} : vector<32x32xf32>, vector<32x8xf32>, vector<32x8xf32> -> vector<32x8xf32>
    %c928 = arith.constant 928 : index
    %c0_126 = arith.constant 0 : index
    %258 = vector.load %arg0[%c928, %c0_126] : memref<2056x64xf32, #tpu.memory_space<vmem>>, vector<8x32xf32>
    %cst_127 = arith.constant dense<0.000000e+00> : vector<32x32xf32>
    %259 = tpu.matmul %257, %258, %cst_127 {dimension_numbers = #tpu.dot_dimension_numbers<[1], [0], [0], [1], [0, 0, 1, 1], [], []>} : vector<32x8xf32>, vector<8x32xf32>, vector<32x32xf32> -> vector<32x32xf32>
    %c936 = arith.constant 936 : index
    %c0_128 = arith.constant 0 : index
    %260 = vector.load %arg0[%c936, %c0_128] : memref<2056x64xf32, #tpu.memory_space<vmem>>, vector<32x8xf32>
    %cst_129 = arith.constant dense<0.000000e+00> : vector<32x8xf32>
    %261 = tpu.matmul %231, %260, %cst_129 {dimension_numbers = #tpu.dot_dimension_numbers<[1], [0], [0], [1], [0, 0, 1, 1], [], []>} : vector<32x32xf32>, vector<32x8xf32>, vector<32x8xf32> -> vector<32x8xf32>
    %262 = vector.extract_strided_slice %233 {offsets = [1, 0], sizes = [1, 8], strides = [1, 1]} : vector<4x8xf32> to vector<1x8xf32>
    %263 = vector.shape_cast %262 : vector<1x8xf32> to vector<8xf32>
    %264 = vector.shape_cast %263 : vector<8xf32> to vector<1x8xf32>
    %265 = vector.broadcast %264 : vector<1x8xf32> to vector<32x8xf32>
    %266 = arith.addf %261, %265 : vector<32x8xf32>
    %c968 = arith.constant 968 : index
    %c0_130 = arith.constant 0 : index
    %267 = vector.load %arg0[%c968, %c0_130] : memref<2056x64xf32, #tpu.memory_space<vmem>>, vector<32x8xf32>
    %cst_131 = arith.constant dense<0.000000e+00> : vector<32x8xf32>
    %268 = tpu.matmul %231, %267, %cst_131 {dimension_numbers = #tpu.dot_dimension_numbers<[1], [0], [0], [1], [0, 0, 1, 1], [], []>} : vector<32x32xf32>, vector<32x8xf32>, vector<32x8xf32> -> vector<32x8xf32>
    %c1000 = arith.constant 1000 : index
    %c0_132 = arith.constant 0 : index
    %269 = vector.load %arg0[%c1000, %c0_132] : memref<2056x64xf32, #tpu.memory_space<vmem>>, vector<32x8xf32>
    %cst_133 = arith.constant dense<0.000000e+00> : vector<32x8xf32>
    %270 = tpu.matmul %231, %269, %cst_133 {dimension_numbers = #tpu.dot_dimension_numbers<[1], [0], [0], [1], [0, 0, 1, 1], [], []>} : vector<32x32xf32>, vector<32x8xf32>, vector<32x8xf32> -> vector<32x8xf32>
    %cst_134 = arith.constant dense<0.000000e+00> : vector<32x32xf32>
    %271 = tpu.matmul %266, %268, %cst_134 {dimension_numbers = #tpu.dot_dimension_numbers<[1], [1], [0], [0], [0, 0, 1, 0], [], []>} : vector<32x8xf32>, vector<32x8xf32>, vector<32x32xf32> -> vector<32x32xf32>
    %272 = arith.addf %271, %232 : vector<32x32xf32>
    %cst_135 = arith.constant dense<0xFF800000> : vector<32xf32>
    %273 = vector.multi_reduction <maximumf>, %272, %cst_135 [1] : vector<32x32xf32> to vector<32xf32>
    %274 = vector.shape_cast %273 : vector<32xf32> to vector<32x1xf32>
    %275 = vector.broadcast %274 : vector<32x1xf32> to vector<32x32xf32>
    %276 = arith.subf %272, %275 : vector<32x32xf32>
    %277 = math.exp %276 : vector<32x32xf32>
    %cst_136 = arith.constant dense<0.000000e+00> : vector<32xf32>
    %278 = vector.multi_reduction <add>, %277, %cst_136 [1] : vector<32x32xf32> to vector<32xf32>
    %279 = vector.shape_cast %278 : vector<32xf32> to vector<32x1xf32>
    %280 = tpu.reciprocal %279 {approx = true} : vector<32x1xf32> -> vector<32x1xf32>
    %281 = vector.broadcast %280 : vector<32x1xf32> to vector<32x32xf32>
    %282 = arith.mulf %277, %281 : vector<32x32xf32>
    %cst_137 = arith.constant dense<0.000000e+00> : vector<32x8xf32>
    %283 = tpu.matmul %282, %270, %cst_137 {dimension_numbers = #tpu.dot_dimension_numbers<[1], [0], [0], [1], [0, 0, 1, 1], [], []>} : vector<32x32xf32>, vector<32x8xf32>, vector<32x8xf32> -> vector<32x8xf32>
    %c1032 = arith.constant 1032 : index
    %c0_138 = arith.constant 0 : index
    %284 = vector.load %arg0[%c1032, %c0_138] : memref<2056x64xf32, #tpu.memory_space<vmem>>, vector<8x32xf32>
    %cst_139 = arith.constant dense<0.000000e+00> : vector<32x32xf32>
    %285 = tpu.matmul %283, %284, %cst_139 {dimension_numbers = #tpu.dot_dimension_numbers<[1], [0], [0], [1], [0, 0, 1, 1], [], []>} : vector<32x8xf32>, vector<8x32xf32>, vector<32x32xf32> -> vector<32x32xf32>
    %286 = arith.addf %259, %285 : vector<32x32xf32>
    %c1040 = arith.constant 1040 : index
    %c0_140 = arith.constant 0 : index
    %287 = vector.load %arg0[%c1040, %c0_140] : memref<2056x64xf32, #tpu.memory_space<vmem>>, vector<32x8xf32>
    %cst_141 = arith.constant dense<0.000000e+00> : vector<32x8xf32>
    %288 = tpu.matmul %231, %287, %cst_141 {dimension_numbers = #tpu.dot_dimension_numbers<[1], [0], [0], [1], [0, 0, 1, 1], [], []>} : vector<32x32xf32>, vector<32x8xf32>, vector<32x8xf32> -> vector<32x8xf32>
    %289 = vector.extract_strided_slice %233 {offsets = [2, 0], sizes = [1, 8], strides = [1, 1]} : vector<4x8xf32> to vector<1x8xf32>
    %290 = vector.shape_cast %289 : vector<1x8xf32> to vector<8xf32>
    %291 = vector.shape_cast %290 : vector<8xf32> to vector<1x8xf32>
    %292 = vector.broadcast %291 : vector<1x8xf32> to vector<32x8xf32>
    %293 = arith.addf %288, %292 : vector<32x8xf32>
    %c1072 = arith.constant 1072 : index
    %c0_142 = arith.constant 0 : index
    %294 = vector.load %arg0[%c1072, %c0_142] : memref<2056x64xf32, #tpu.memory_space<vmem>>, vector<32x8xf32>
    %cst_143 = arith.constant dense<0.000000e+00> : vector<32x8xf32>
    %295 = tpu.matmul %231, %294, %cst_143 {dimension_numbers = #tpu.dot_dimension_numbers<[1], [0], [0], [1], [0, 0, 1, 1], [], []>} : vector<32x32xf32>, vector<32x8xf32>, vector<32x8xf32> -> vector<32x8xf32>
    %c1104 = arith.constant 1104 : index
    %c0_144 = arith.constant 0 : index
    %296 = vector.load %arg0[%c1104, %c0_144] : memref<2056x64xf32, #tpu.memory_space<vmem>>, vector<32x8xf32>
    %cst_145 = arith.constant dense<0.000000e+00> : vector<32x8xf32>
    %297 = tpu.matmul %231, %296, %cst_145 {dimension_numbers = #tpu.dot_dimension_numbers<[1], [0], [0], [1], [0, 0, 1, 1], [], []>} : vector<32x32xf32>, vector<32x8xf32>, vector<32x8xf32> -> vector<32x8xf32>
    %cst_146 = arith.constant dense<0.000000e+00> : vector<32x32xf32>
    %298 = tpu.matmul %293, %295, %cst_146 {dimension_numbers = #tpu.dot_dimension_numbers<[1], [1], [0], [0], [0, 0, 1, 0], [], []>} : vector<32x8xf32>, vector<32x8xf32>, vector<32x32xf32> -> vector<32x32xf32>
    %299 = arith.addf %298, %232 : vector<32x32xf32>
    %cst_147 = arith.constant dense<0xFF800000> : vector<32xf32>
    %300 = vector.multi_reduction <maximumf>, %299, %cst_147 [1] : vector<32x32xf32> to vector<32xf32>
    %301 = vector.shape_cast %300 : vector<32xf32> to vector<32x1xf32>
    %302 = vector.broadcast %301 : vector<32x1xf32> to vector<32x32xf32>
    %303 = arith.subf %299, %302 : vector<32x32xf32>
    %304 = math.exp %303 : vector<32x32xf32>
    %cst_148 = arith.constant dense<0.000000e+00> : vector<32xf32>
    %305 = vector.multi_reduction <add>, %304, %cst_148 [1] : vector<32x32xf32> to vector<32xf32>
    %306 = vector.shape_cast %305 : vector<32xf32> to vector<32x1xf32>
    %307 = tpu.reciprocal %306 {approx = true} : vector<32x1xf32> -> vector<32x1xf32>
    %308 = vector.broadcast %307 : vector<32x1xf32> to vector<32x32xf32>
    %309 = arith.mulf %304, %308 : vector<32x32xf32>
    %cst_149 = arith.constant dense<0.000000e+00> : vector<32x8xf32>
    %310 = tpu.matmul %309, %297, %cst_149 {dimension_numbers = #tpu.dot_dimension_numbers<[1], [0], [0], [1], [0, 0, 1, 1], [], []>} : vector<32x32xf32>, vector<32x8xf32>, vector<32x8xf32> -> vector<32x8xf32>
    %c1136 = arith.constant 1136 : index
    %c0_150 = arith.constant 0 : index
    %311 = vector.load %arg0[%c1136, %c0_150] : memref<2056x64xf32, #tpu.memory_space<vmem>>, vector<8x32xf32>
    %cst_151 = arith.constant dense<0.000000e+00> : vector<32x32xf32>
    %312 = tpu.matmul %310, %311, %cst_151 {dimension_numbers = #tpu.dot_dimension_numbers<[1], [0], [0], [1], [0, 0, 1, 1], [], []>} : vector<32x8xf32>, vector<8x32xf32>, vector<32x32xf32> -> vector<32x32xf32>
    %313 = arith.addf %286, %312 : vector<32x32xf32>
    %c1144 = arith.constant 1144 : index
    %c0_152 = arith.constant 0 : index
    %314 = vector.load %arg0[%c1144, %c0_152] : memref<2056x64xf32, #tpu.memory_space<vmem>>, vector<32x8xf32>
    %cst_153 = arith.constant dense<0.000000e+00> : vector<32x8xf32>
    %315 = tpu.matmul %231, %314, %cst_153 {dimension_numbers = #tpu.dot_dimension_numbers<[1], [0], [0], [1], [0, 0, 1, 1], [], []>} : vector<32x32xf32>, vector<32x8xf32>, vector<32x8xf32> -> vector<32x8xf32>
    %316 = vector.extract_strided_slice %233 {offsets = [3, 0], sizes = [1, 8], strides = [1, 1]} : vector<4x8xf32> to vector<1x8xf32>
    %317 = vector.shape_cast %316 : vector<1x8xf32> to vector<8xf32>
    %318 = vector.shape_cast %317 : vector<8xf32> to vector<1x8xf32>
    %319 = vector.broadcast %318 : vector<1x8xf32> to vector<32x8xf32>
    %320 = arith.addf %315, %319 : vector<32x8xf32>
    %c1176 = arith.constant 1176 : index
    %c0_154 = arith.constant 0 : index
    %321 = vector.load %arg0[%c1176, %c0_154] : memref<2056x64xf32, #tpu.memory_space<vmem>>, vector<32x8xf32>
    %cst_155 = arith.constant dense<0.000000e+00> : vector<32x8xf32>
    %322 = tpu.matmul %231, %321, %cst_155 {dimension_numbers = #tpu.dot_dimension_numbers<[1], [0], [0], [1], [0, 0, 1, 1], [], []>} : vector<32x32xf32>, vector<32x8xf32>, vector<32x8xf32> -> vector<32x8xf32>
    %c1208 = arith.constant 1208 : index
    %c0_156 = arith.constant 0 : index
    %323 = vector.load %arg0[%c1208, %c0_156] : memref<2056x64xf32, #tpu.memory_space<vmem>>, vector<32x8xf32>
    %cst_157 = arith.constant dense<0.000000e+00> : vector<32x8xf32>
    %324 = tpu.matmul %231, %323, %cst_157 {dimension_numbers = #tpu.dot_dimension_numbers<[1], [0], [0], [1], [0, 0, 1, 1], [], []>} : vector<32x32xf32>, vector<32x8xf32>, vector<32x8xf32> -> vector<32x8xf32>
    %cst_158 = arith.constant dense<0.000000e+00> : vector<32x32xf32>
    %325 = tpu.matmul %320, %322, %cst_158 {dimension_numbers = #tpu.dot_dimension_numbers<[1], [1], [0], [0], [0, 0, 1, 0], [], []>} : vector<32x8xf32>, vector<32x8xf32>, vector<32x32xf32> -> vector<32x32xf32>
    %326 = arith.addf %325, %232 : vector<32x32xf32>
    %cst_159 = arith.constant dense<0xFF800000> : vector<32xf32>
    %327 = vector.multi_reduction <maximumf>, %326, %cst_159 [1] : vector<32x32xf32> to vector<32xf32>
    %328 = vector.shape_cast %327 : vector<32xf32> to vector<32x1xf32>
    %329 = vector.broadcast %328 : vector<32x1xf32> to vector<32x32xf32>
    %330 = arith.subf %326, %329 : vector<32x32xf32>
    %331 = math.exp %330 : vector<32x32xf32>
    %cst_160 = arith.constant dense<0.000000e+00> : vector<32xf32>
    %332 = vector.multi_reduction <add>, %331, %cst_160 [1] : vector<32x32xf32> to vector<32xf32>
    %333 = vector.shape_cast %332 : vector<32xf32> to vector<32x1xf32>
    %334 = tpu.reciprocal %333 {approx = true} : vector<32x1xf32> -> vector<32x1xf32>
    %335 = vector.broadcast %334 : vector<32x1xf32> to vector<32x32xf32>
    %336 = arith.mulf %331, %335 : vector<32x32xf32>
    %cst_161 = arith.constant dense<0.000000e+00> : vector<32x8xf32>
    %337 = tpu.matmul %336, %324, %cst_161 {dimension_numbers = #tpu.dot_dimension_numbers<[1], [0], [0], [1], [0, 0, 1, 1], [], []>} : vector<32x32xf32>, vector<32x8xf32>, vector<32x8xf32> -> vector<32x8xf32>
    %c1240 = arith.constant 1240 : index
    %c0_162 = arith.constant 0 : index
    %338 = vector.load %arg0[%c1240, %c0_162] : memref<2056x64xf32, #tpu.memory_space<vmem>>, vector<8x32xf32>
    %cst_163 = arith.constant dense<0.000000e+00> : vector<32x32xf32>
    %339 = tpu.matmul %337, %338, %cst_163 {dimension_numbers = #tpu.dot_dimension_numbers<[1], [0], [0], [1], [0, 0, 1, 1], [], []>} : vector<32x8xf32>, vector<8x32xf32>, vector<32x32xf32> -> vector<32x32xf32>
    %340 = arith.addf %313, %339 : vector<32x32xf32>
    %c1256 = arith.constant 1256 : index
    %c0_164 = arith.constant 0 : index
    %341 = vector.load %arg0[%c1256, %c0_164] : memref<2056x64xf32, #tpu.memory_space<vmem>>, vector<1x32xf32>
    %342 = vector.broadcast %341 : vector<1x32xf32> to vector<32x32xf32>
    %343 = arith.addf %340, %342 : vector<32x32xf32>
    %344 = arith.addf %231, %343 : vector<32x32xf32>
    %cst_165 = arith.constant dense<0.000000e+00> : vector<32x32xf32>
    %345 = tpu.matmul %3, %344, %cst_165 {dimension_numbers = #tpu.dot_dimension_numbers<[1], [0], [0], [1], [0, 0, 1, 1], [], []>} : vector<32x32xf32>, vector<32x32xf32>, vector<32x32xf32> -> vector<32x32xf32>
    %c1680 = arith.constant 1680 : index
    %c0_166 = arith.constant 0 : index
    %346 = vector.load %arg0[%c1680, %c0_166] : memref<2056x64xf32, #tpu.memory_space<vmem>>, vector<4x8xf32>
    %c1264 = arith.constant 1264 : index
    %c0_167 = arith.constant 0 : index
    %347 = vector.load %arg0[%c1264, %c0_167] : memref<2056x64xf32, #tpu.memory_space<vmem>>, vector<32x8xf32>
    %cst_168 = arith.constant dense<0.000000e+00> : vector<32x8xf32>
    %348 = tpu.matmul %345, %347, %cst_168 {dimension_numbers = #tpu.dot_dimension_numbers<[1], [0], [0], [1], [0, 0, 1, 1], [], []>} : vector<32x32xf32>, vector<32x8xf32>, vector<32x8xf32> -> vector<32x8xf32>
    %349 = vector.extract_strided_slice %346 {offsets = [0, 0], sizes = [1, 8], strides = [1, 1]} : vector<4x8xf32> to vector<1x8xf32>
    %350 = vector.shape_cast %349 : vector<1x8xf32> to vector<8xf32>
    %351 = vector.shape_cast %350 : vector<8xf32> to vector<1x8xf32>
    %352 = vector.broadcast %351 : vector<1x8xf32> to vector<32x8xf32>
    %353 = arith.addf %348, %352 : vector<32x8xf32>
    %c1296 = arith.constant 1296 : index
    %c0_169 = arith.constant 0 : index
    %354 = vector.load %arg0[%c1296, %c0_169] : memref<2056x64xf32, #tpu.memory_space<vmem>>, vector<32x8xf32>
    %cst_170 = arith.constant dense<0.000000e+00> : vector<32x8xf32>
    %355 = tpu.matmul %215, %354, %cst_170 {dimension_numbers = #tpu.dot_dimension_numbers<[1], [0], [0], [1], [0, 0, 1, 1], [], []>} : vector<32x32xf32>, vector<32x8xf32>, vector<32x8xf32> -> vector<32x8xf32>
    %c1328 = arith.constant 1328 : index
    %c0_171 = arith.constant 0 : index
    %356 = vector.load %arg0[%c1328, %c0_171] : memref<2056x64xf32, #tpu.memory_space<vmem>>, vector<32x8xf32>
    %cst_172 = arith.constant dense<0.000000e+00> : vector<32x8xf32>
    %357 = tpu.matmul %215, %356, %cst_172 {dimension_numbers = #tpu.dot_dimension_numbers<[1], [0], [0], [1], [0, 0, 1, 1], [], []>} : vector<32x32xf32>, vector<32x8xf32>, vector<32x8xf32> -> vector<32x8xf32>
    %cst_173 = arith.constant dense<0.000000e+00> : vector<32x32xf32>
    %358 = tpu.matmul %353, %355, %cst_173 {dimension_numbers = #tpu.dot_dimension_numbers<[1], [1], [0], [0], [0, 0, 1, 0], [], []>} : vector<32x8xf32>, vector<32x8xf32>, vector<32x32xf32> -> vector<32x32xf32>
    %359 = arith.addf %358, %19 : vector<32x32xf32>
    %cst_174 = arith.constant dense<0xFF800000> : vector<32xf32>
    %360 = vector.multi_reduction <maximumf>, %359, %cst_174 [1] : vector<32x32xf32> to vector<32xf32>
    %361 = vector.shape_cast %360 : vector<32xf32> to vector<32x1xf32>
    %362 = vector.broadcast %361 : vector<32x1xf32> to vector<32x32xf32>
    %363 = arith.subf %359, %362 : vector<32x32xf32>
    %364 = math.exp %363 : vector<32x32xf32>
    %cst_175 = arith.constant dense<0.000000e+00> : vector<32xf32>
    %365 = vector.multi_reduction <add>, %364, %cst_175 [1] : vector<32x32xf32> to vector<32xf32>
    %366 = vector.shape_cast %365 : vector<32xf32> to vector<32x1xf32>
    %367 = tpu.reciprocal %366 {approx = true} : vector<32x1xf32> -> vector<32x1xf32>
    %368 = vector.broadcast %367 : vector<32x1xf32> to vector<32x32xf32>
    %369 = arith.mulf %364, %368 : vector<32x32xf32>
    %cst_176 = arith.constant dense<0.000000e+00> : vector<32x8xf32>
    %370 = tpu.matmul %369, %357, %cst_176 {dimension_numbers = #tpu.dot_dimension_numbers<[1], [0], [0], [1], [0, 0, 1, 1], [], []>} : vector<32x32xf32>, vector<32x8xf32>, vector<32x8xf32> -> vector<32x8xf32>
    %c1360 = arith.constant 1360 : index
    %c0_177 = arith.constant 0 : index
    %371 = vector.load %arg0[%c1360, %c0_177] : memref<2056x64xf32, #tpu.memory_space<vmem>>, vector<8x32xf32>
    %cst_178 = arith.constant dense<0.000000e+00> : vector<32x32xf32>
    %372 = tpu.matmul %370, %371, %cst_178 {dimension_numbers = #tpu.dot_dimension_numbers<[1], [0], [0], [1], [0, 0, 1, 1], [], []>} : vector<32x8xf32>, vector<8x32xf32>, vector<32x32xf32> -> vector<32x32xf32>
    %c1368 = arith.constant 1368 : index
    %c0_179 = arith.constant 0 : index
    %373 = vector.load %arg0[%c1368, %c0_179] : memref<2056x64xf32, #tpu.memory_space<vmem>>, vector<32x8xf32>
    %cst_180 = arith.constant dense<0.000000e+00> : vector<32x8xf32>
    %374 = tpu.matmul %345, %373, %cst_180 {dimension_numbers = #tpu.dot_dimension_numbers<[1], [0], [0], [1], [0, 0, 1, 1], [], []>} : vector<32x32xf32>, vector<32x8xf32>, vector<32x8xf32> -> vector<32x8xf32>
    %375 = vector.extract_strided_slice %346 {offsets = [1, 0], sizes = [1, 8], strides = [1, 1]} : vector<4x8xf32> to vector<1x8xf32>
    %376 = vector.shape_cast %375 : vector<1x8xf32> to vector<8xf32>
    %377 = vector.shape_cast %376 : vector<8xf32> to vector<1x8xf32>
    %378 = vector.broadcast %377 : vector<1x8xf32> to vector<32x8xf32>
    %379 = arith.addf %374, %378 : vector<32x8xf32>
    %c1400 = arith.constant 1400 : index
    %c0_181 = arith.constant 0 : index
    %380 = vector.load %arg0[%c1400, %c0_181] : memref<2056x64xf32, #tpu.memory_space<vmem>>, vector<32x8xf32>
    %cst_182 = arith.constant dense<0.000000e+00> : vector<32x8xf32>
    %381 = tpu.matmul %215, %380, %cst_182 {dimension_numbers = #tpu.dot_dimension_numbers<[1], [0], [0], [1], [0, 0, 1, 1], [], []>} : vector<32x32xf32>, vector<32x8xf32>, vector<32x8xf32> -> vector<32x8xf32>
    %c1432 = arith.constant 1432 : index
    %c0_183 = arith.constant 0 : index
    %382 = vector.load %arg0[%c1432, %c0_183] : memref<2056x64xf32, #tpu.memory_space<vmem>>, vector<32x8xf32>
    %cst_184 = arith.constant dense<0.000000e+00> : vector<32x8xf32>
    %383 = tpu.matmul %215, %382, %cst_184 {dimension_numbers = #tpu.dot_dimension_numbers<[1], [0], [0], [1], [0, 0, 1, 1], [], []>} : vector<32x32xf32>, vector<32x8xf32>, vector<32x8xf32> -> vector<32x8xf32>
    %cst_185 = arith.constant dense<0.000000e+00> : vector<32x32xf32>
    %384 = tpu.matmul %379, %381, %cst_185 {dimension_numbers = #tpu.dot_dimension_numbers<[1], [1], [0], [0], [0, 0, 1, 0], [], []>} : vector<32x8xf32>, vector<32x8xf32>, vector<32x32xf32> -> vector<32x32xf32>
    %385 = arith.addf %384, %19 : vector<32x32xf32>
    %cst_186 = arith.constant dense<0xFF800000> : vector<32xf32>
    %386 = vector.multi_reduction <maximumf>, %385, %cst_186 [1] : vector<32x32xf32> to vector<32xf32>
    %387 = vector.shape_cast %386 : vector<32xf32> to vector<32x1xf32>
    %388 = vector.broadcast %387 : vector<32x1xf32> to vector<32x32xf32>
    %389 = arith.subf %385, %388 : vector<32x32xf32>
    %390 = math.exp %389 : vector<32x32xf32>
    %cst_187 = arith.constant dense<0.000000e+00> : vector<32xf32>
    %391 = vector.multi_reduction <add>, %390, %cst_187 [1] : vector<32x32xf32> to vector<32xf32>
    %392 = vector.shape_cast %391 : vector<32xf32> to vector<32x1xf32>
    %393 = tpu.reciprocal %392 {approx = true} : vector<32x1xf32> -> vector<32x1xf32>
    %394 = vector.broadcast %393 : vector<32x1xf32> to vector<32x32xf32>
    %395 = arith.mulf %390, %394 : vector<32x32xf32>
    %cst_188 = arith.constant dense<0.000000e+00> : vector<32x8xf32>
    %396 = tpu.matmul %395, %383, %cst_188 {dimension_numbers = #tpu.dot_dimension_numbers<[1], [0], [0], [1], [0, 0, 1, 1], [], []>} : vector<32x32xf32>, vector<32x8xf32>, vector<32x8xf32> -> vector<32x8xf32>
    %c1464 = arith.constant 1464 : index
    %c0_189 = arith.constant 0 : index
    %397 = vector.load %arg0[%c1464, %c0_189] : memref<2056x64xf32, #tpu.memory_space<vmem>>, vector<8x32xf32>
    %cst_190 = arith.constant dense<0.000000e+00> : vector<32x32xf32>
    %398 = tpu.matmul %396, %397, %cst_190 {dimension_numbers = #tpu.dot_dimension_numbers<[1], [0], [0], [1], [0, 0, 1, 1], [], []>} : vector<32x8xf32>, vector<8x32xf32>, vector<32x32xf32> -> vector<32x32xf32>
    %399 = arith.addf %372, %398 : vector<32x32xf32>
    %c1472 = arith.constant 1472 : index
    %c0_191 = arith.constant 0 : index
    %400 = vector.load %arg0[%c1472, %c0_191] : memref<2056x64xf32, #tpu.memory_space<vmem>>, vector<32x8xf32>
    %cst_192 = arith.constant dense<0.000000e+00> : vector<32x8xf32>
    %401 = tpu.matmul %345, %400, %cst_192 {dimension_numbers = #tpu.dot_dimension_numbers<[1], [0], [0], [1], [0, 0, 1, 1], [], []>} : vector<32x32xf32>, vector<32x8xf32>, vector<32x8xf32> -> vector<32x8xf32>
    %402 = vector.extract_strided_slice %346 {offsets = [2, 0], sizes = [1, 8], strides = [1, 1]} : vector<4x8xf32> to vector<1x8xf32>
    %403 = vector.shape_cast %402 : vector<1x8xf32> to vector<8xf32>
    %404 = vector.shape_cast %403 : vector<8xf32> to vector<1x8xf32>
    %405 = vector.broadcast %404 : vector<1x8xf32> to vector<32x8xf32>
    %406 = arith.addf %401, %405 : vector<32x8xf32>
    %c1504 = arith.constant 1504 : index
    %c0_193 = arith.constant 0 : index
    %407 = vector.load %arg0[%c1504, %c0_193] : memref<2056x64xf32, #tpu.memory_space<vmem>>, vector<32x8xf32>
    %cst_194 = arith.constant dense<0.000000e+00> : vector<32x8xf32>
    %408 = tpu.matmul %215, %407, %cst_194 {dimension_numbers = #tpu.dot_dimension_numbers<[1], [0], [0], [1], [0, 0, 1, 1], [], []>} : vector<32x32xf32>, vector<32x8xf32>, vector<32x8xf32> -> vector<32x8xf32>
    %c1536 = arith.constant 1536 : index
    %c0_195 = arith.constant 0 : index
    %409 = vector.load %arg0[%c1536, %c0_195] : memref<2056x64xf32, #tpu.memory_space<vmem>>, vector<32x8xf32>
    %cst_196 = arith.constant dense<0.000000e+00> : vector<32x8xf32>
    %410 = tpu.matmul %215, %409, %cst_196 {dimension_numbers = #tpu.dot_dimension_numbers<[1], [0], [0], [1], [0, 0, 1, 1], [], []>} : vector<32x32xf32>, vector<32x8xf32>, vector<32x8xf32> -> vector<32x8xf32>
    %cst_197 = arith.constant dense<0.000000e+00> : vector<32x32xf32>
    %411 = tpu.matmul %406, %408, %cst_197 {dimension_numbers = #tpu.dot_dimension_numbers<[1], [1], [0], [0], [0, 0, 1, 0], [], []>} : vector<32x8xf32>, vector<32x8xf32>, vector<32x32xf32> -> vector<32x32xf32>
    %412 = arith.addf %411, %19 : vector<32x32xf32>
    %cst_198 = arith.constant dense<0xFF800000> : vector<32xf32>
    %413 = vector.multi_reduction <maximumf>, %412, %cst_198 [1] : vector<32x32xf32> to vector<32xf32>
    %414 = vector.shape_cast %413 : vector<32xf32> to vector<32x1xf32>
    %415 = vector.broadcast %414 : vector<32x1xf32> to vector<32x32xf32>
    %416 = arith.subf %412, %415 : vector<32x32xf32>
    %417 = math.exp %416 : vector<32x32xf32>
    %cst_199 = arith.constant dense<0.000000e+00> : vector<32xf32>
    %418 = vector.multi_reduction <add>, %417, %cst_199 [1] : vector<32x32xf32> to vector<32xf32>
    %419 = vector.shape_cast %418 : vector<32xf32> to vector<32x1xf32>
    %420 = tpu.reciprocal %419 {approx = true} : vector<32x1xf32> -> vector<32x1xf32>
    %421 = vector.broadcast %420 : vector<32x1xf32> to vector<32x32xf32>
    %422 = arith.mulf %417, %421 : vector<32x32xf32>
    %cst_200 = arith.constant dense<0.000000e+00> : vector<32x8xf32>
    %423 = tpu.matmul %422, %410, %cst_200 {dimension_numbers = #tpu.dot_dimension_numbers<[1], [0], [0], [1], [0, 0, 1, 1], [], []>} : vector<32x32xf32>, vector<32x8xf32>, vector<32x8xf32> -> vector<32x8xf32>
    %c1568 = arith.constant 1568 : index
    %c0_201 = arith.constant 0 : index
    %424 = vector.load %arg0[%c1568, %c0_201] : memref<2056x64xf32, #tpu.memory_space<vmem>>, vector<8x32xf32>
    %cst_202 = arith.constant dense<0.000000e+00> : vector<32x32xf32>
    %425 = tpu.matmul %423, %424, %cst_202 {dimension_numbers = #tpu.dot_dimension_numbers<[1], [0], [0], [1], [0, 0, 1, 1], [], []>} : vector<32x8xf32>, vector<8x32xf32>, vector<32x32xf32> -> vector<32x32xf32>
    %426 = arith.addf %399, %425 : vector<32x32xf32>
    %c1576 = arith.constant 1576 : index
    %c0_203 = arith.constant 0 : index
    %427 = vector.load %arg0[%c1576, %c0_203] : memref<2056x64xf32, #tpu.memory_space<vmem>>, vector<32x8xf32>
    %cst_204 = arith.constant dense<0.000000e+00> : vector<32x8xf32>
    %428 = tpu.matmul %345, %427, %cst_204 {dimension_numbers = #tpu.dot_dimension_numbers<[1], [0], [0], [1], [0, 0, 1, 1], [], []>} : vector<32x32xf32>, vector<32x8xf32>, vector<32x8xf32> -> vector<32x8xf32>
    %429 = vector.extract_strided_slice %346 {offsets = [3, 0], sizes = [1, 8], strides = [1, 1]} : vector<4x8xf32> to vector<1x8xf32>
    %430 = vector.shape_cast %429 : vector<1x8xf32> to vector<8xf32>
    %431 = vector.shape_cast %430 : vector<8xf32> to vector<1x8xf32>
    %432 = vector.broadcast %431 : vector<1x8xf32> to vector<32x8xf32>
    %433 = arith.addf %428, %432 : vector<32x8xf32>
    %c1608 = arith.constant 1608 : index
    %c0_205 = arith.constant 0 : index
    %434 = vector.load %arg0[%c1608, %c0_205] : memref<2056x64xf32, #tpu.memory_space<vmem>>, vector<32x8xf32>
    %cst_206 = arith.constant dense<0.000000e+00> : vector<32x8xf32>
    %435 = tpu.matmul %215, %434, %cst_206 {dimension_numbers = #tpu.dot_dimension_numbers<[1], [0], [0], [1], [0, 0, 1, 1], [], []>} : vector<32x32xf32>, vector<32x8xf32>, vector<32x8xf32> -> vector<32x8xf32>
    %c1640 = arith.constant 1640 : index
    %c0_207 = arith.constant 0 : index
    %436 = vector.load %arg0[%c1640, %c0_207] : memref<2056x64xf32, #tpu.memory_space<vmem>>, vector<32x8xf32>
    %cst_208 = arith.constant dense<0.000000e+00> : vector<32x8xf32>
    %437 = tpu.matmul %215, %436, %cst_208 {dimension_numbers = #tpu.dot_dimension_numbers<[1], [0], [0], [1], [0, 0, 1, 1], [], []>} : vector<32x32xf32>, vector<32x8xf32>, vector<32x8xf32> -> vector<32x8xf32>
    %cst_209 = arith.constant dense<0.000000e+00> : vector<32x32xf32>
    %438 = tpu.matmul %433, %435, %cst_209 {dimension_numbers = #tpu.dot_dimension_numbers<[1], [1], [0], [0], [0, 0, 1, 0], [], []>} : vector<32x8xf32>, vector<32x8xf32>, vector<32x32xf32> -> vector<32x32xf32>
    %439 = arith.addf %438, %19 : vector<32x32xf32>
    %cst_210 = arith.constant dense<0xFF800000> : vector<32xf32>
    %440 = vector.multi_reduction <maximumf>, %439, %cst_210 [1] : vector<32x32xf32> to vector<32xf32>
    %441 = vector.shape_cast %440 : vector<32xf32> to vector<32x1xf32>
    %442 = vector.broadcast %441 : vector<32x1xf32> to vector<32x32xf32>
    %443 = arith.subf %439, %442 : vector<32x32xf32>
    %444 = math.exp %443 : vector<32x32xf32>
    %cst_211 = arith.constant dense<0.000000e+00> : vector<32xf32>
    %445 = vector.multi_reduction <add>, %444, %cst_211 [1] : vector<32x32xf32> to vector<32xf32>
    %446 = vector.shape_cast %445 : vector<32xf32> to vector<32x1xf32>
    %447 = tpu.reciprocal %446 {approx = true} : vector<32x1xf32> -> vector<32x1xf32>
    %448 = vector.broadcast %447 : vector<32x1xf32> to vector<32x32xf32>
    %449 = arith.mulf %444, %448 : vector<32x32xf32>
    %cst_212 = arith.constant dense<0.000000e+00> : vector<32x8xf32>
    %450 = tpu.matmul %449, %437, %cst_212 {dimension_numbers = #tpu.dot_dimension_numbers<[1], [0], [0], [1], [0, 0, 1, 1], [], []>} : vector<32x32xf32>, vector<32x8xf32>, vector<32x8xf32> -> vector<32x8xf32>
    %c1672 = arith.constant 1672 : index
    %c0_213 = arith.constant 0 : index
    %451 = vector.load %arg0[%c1672, %c0_213] : memref<2056x64xf32, #tpu.memory_space<vmem>>, vector<8x32xf32>
    %cst_214 = arith.constant dense<0.000000e+00> : vector<32x32xf32>
    %452 = tpu.matmul %450, %451, %cst_214 {dimension_numbers = #tpu.dot_dimension_numbers<[1], [0], [0], [1], [0, 0, 1, 1], [], []>} : vector<32x8xf32>, vector<8x32xf32>, vector<32x32xf32> -> vector<32x32xf32>
    %453 = arith.addf %426, %452 : vector<32x32xf32>
    %c1688 = arith.constant 1688 : index
    %c0_215 = arith.constant 0 : index
    %454 = vector.load %arg0[%c1688, %c0_215] : memref<2056x64xf32, #tpu.memory_space<vmem>>, vector<1x32xf32>
    %455 = vector.broadcast %454 : vector<1x32xf32> to vector<32x32xf32>
    %456 = arith.addf %453, %455 : vector<32x32xf32>
    %457 = arith.addf %345, %456 : vector<32x32xf32>
    %cst_216 = arith.constant dense<0.000000e+00> : vector<32x32xf32>
    %458 = tpu.matmul %3, %457, %cst_216 {dimension_numbers = #tpu.dot_dimension_numbers<[1], [0], [0], [1], [0, 0, 1, 1], [], []>} : vector<32x32xf32>, vector<32x32xf32>, vector<32x32xf32> -> vector<32x32xf32>
    %c1768 = arith.constant 1768 : index
    %c0_217 = arith.constant 0 : index
    %459 = vector.load %arg0[%c1768, %c0_217] : memref<2056x64xf32, #tpu.memory_space<vmem>>, vector<32x32xf32>
    %cst_218 = arith.constant dense<0.000000e+00> : vector<32x32xf32>
    %460 = tpu.matmul %458, %459, %cst_218 {dimension_numbers = #tpu.dot_dimension_numbers<[1], [0], [0], [1], [0, 0, 1, 1], [], []>} : vector<32x32xf32>, vector<32x32xf32>, vector<32x32xf32> -> vector<32x32xf32>
    %cst_219 = arith.constant 5.000000e-01 : f32
    %461 = vector.broadcast %cst_219 : f32 to vector<32x32xf32>
    %462 = arith.mulf %461, %460 : vector<32x32xf32>
    %cst_220 = arith.constant 0.707106769 : f32
    %463 = vector.broadcast %cst_220 : f32 to vector<32x32xf32>
    %464 = arith.mulf %460, %463 : vector<32x32xf32>
    %465 = math.absf %464 : vector<32x32xf32>
    %cst_221 = arith.constant 0.327591091 : f32
    %466 = vector.broadcast %cst_221 : f32 to vector<32x32xf32>
    %467 = arith.mulf %466, %465 : vector<32x32xf32>
    %cst_222 = arith.constant 1.000000e+00 : f32
    %468 = vector.broadcast %cst_222 : f32 to vector<32x32xf32>
    %469 = arith.addf %468, %467 : vector<32x32xf32>
    %cst_223 = arith.constant 1.000000e+00 : f32
    %470 = vector.broadcast %cst_223 : f32 to vector<32x32xf32>
    %471 = arith.divf %470, %469 : vector<32x32xf32>
    %cst_224 = arith.constant 1.06140542 : f32
    %472 = vector.broadcast %cst_224 : f32 to vector<32x32xf32>
    %473 = arith.mulf %472, %471 : vector<32x32xf32>
    %cst_225 = arith.constant 1.45315206 : f32
    %474 = vector.broadcast %cst_225 : f32 to vector<32x32xf32>
    %475 = arith.subf %473, %474 : vector<32x32xf32>
    %476 = arith.mulf %475, %471 : vector<32x32xf32>
    %cst_226 = arith.constant 1.42141378 : f32
    %477 = vector.broadcast %cst_226 : f32 to vector<32x32xf32>
    %478 = arith.addf %476, %477 : vector<32x32xf32>
    %479 = arith.mulf %478, %471 : vector<32x32xf32>
    %cst_227 = arith.constant 0.284496725 : f32
    %480 = vector.broadcast %cst_227 : f32 to vector<32x32xf32>
    %481 = arith.subf %479, %480 : vector<32x32xf32>
    %482 = arith.mulf %481, %471 : vector<32x32xf32>
    %cst_228 = arith.constant 0.254829586 : f32
    %483 = vector.broadcast %cst_228 : f32 to vector<32x32xf32>
    %484 = arith.addf %482, %483 : vector<32x32xf32>
    %485 = arith.mulf %484, %471 : vector<32x32xf32>
    %cst_229 = arith.constant 0.000000e+00 : f32
    %486 = vector.broadcast %cst_229 : f32 to vector<32x32xf32>
    %487 = arith.subf %486, %465 : vector<32x32xf32>
    %488 = arith.mulf %487, %465 : vector<32x32xf32>
    %489 = math.exp %488 : vector<32x32xf32>
    %490 = arith.mulf %485, %489 : vector<32x32xf32>
    %cst_230 = arith.constant 1.000000e+00 : f32
    %491 = vector.broadcast %cst_230 : f32 to vector<32x32xf32>
    %492 = arith.subf %491, %490 : vector<32x32xf32>
    %cst_231 = arith.constant 0.000000e+00 : f32
    %493 = vector.broadcast %cst_231 : f32 to vector<32x32xf32>
    %494 = arith.cmpf oge, %464, %493 : vector<32x32xf32>
    %cst_232 = arith.constant 0.000000e+00 : f32
    %495 = vector.broadcast %cst_232 : f32 to vector<32x32xf32>
    %496 = arith.subf %495, %492 : vector<32x32xf32>
    %497 = arith.select %494, %492, %496 : vector<32x32xi1>, vector<32x32xf32>
    %cst_233 = arith.constant 1.000000e+00 : f32
    %498 = vector.broadcast %cst_233 : f32 to vector<32x32xf32>
    %499 = arith.addf %498, %497 : vector<32x32xf32>
    %500 = arith.mulf %462, %499 : vector<32x32xf32>
    %c1800 = arith.constant 1800 : index
    %c0_234 = arith.constant 0 : index
    %501 = vector.load %arg0[%c1800, %c0_234] : memref<2056x64xf32, #tpu.memory_space<vmem>>, vector<32x32xf32>
    %cst_235 = arith.constant dense<0.000000e+00> : vector<32x32xf32>
    %502 = tpu.matmul %500, %501, %cst_235 {dimension_numbers = #tpu.dot_dimension_numbers<[1], [0], [0], [1], [0, 0, 1, 1], [], []>} : vector<32x32xf32>, vector<32x32xf32>, vector<32x32xf32> -> vector<32x32xf32>
    %503 = arith.addf %458, %502 : vector<32x32xf32>
    %cst_236 = arith.constant dense<0.000000e+00> : vector<32x32xf32>
    %504 = tpu.matmul %3, %503, %cst_236 {dimension_numbers = #tpu.dot_dimension_numbers<[1], [0], [0], [1], [0, 0, 1, 1], [], []>} : vector<32x32xf32>, vector<32x32xf32>, vector<32x32xf32> -> vector<32x32xf32>
    %c1832 = arith.constant 1832 : index
    %c0_237 = arith.constant 0 : index
    %505 = vector.load %arg0[%c1832, %c0_237] : memref<2056x64xf32, #tpu.memory_space<vmem>>, vector<1x32xf32>
    %cst_238 = arith.constant dense<0.000000e+00> : vector<32xf32>
    %506 = vector.multi_reduction <add>, %504, %cst_238 [1] : vector<32x32xf32> to vector<32xf32>
    %507 = vector.shape_cast %506 : vector<32xf32> to vector<32x1xf32>
    %cst_239 = arith.constant 3.200000e+01 : f32
    %508 = vector.broadcast %cst_239 : f32 to vector<32x1xf32>
    %509 = arith.divf %507, %508 : vector<32x1xf32>
    %510 = vector.broadcast %509 : vector<32x1xf32> to vector<32x32xf32>
    %511 = arith.subf %504, %510 : vector<32x32xf32>
    %512 = arith.mulf %511, %511 : vector<32x32xf32>
    %cst_240 = arith.constant dense<0.000000e+00> : vector<32xf32>
    %513 = vector.multi_reduction <add>, %512, %cst_240 [1] : vector<32x32xf32> to vector<32xf32>
    %514 = vector.shape_cast %513 : vector<32xf32> to vector<32x1xf32>
    %cst_241 = arith.constant 3.200000e+01 : f32
    %515 = vector.broadcast %cst_241 : f32 to vector<32x1xf32>
    %516 = arith.divf %514, %515 : vector<32x1xf32>
    %cst_242 = arith.constant 9.99999974E-6 : f32
    %517 = vector.broadcast %cst_242 : f32 to vector<32x1xf32>
    %518 = arith.addf %516, %517 : vector<32x1xf32>
    %519 = math.rsqrt %518 : vector<32x1xf32>
    %520 = vector.broadcast %519 : vector<32x1xf32> to vector<32x32xf32>
    %521 = arith.mulf %511, %520 : vector<32x32xf32>
    %522 = vector.broadcast %505 : vector<1x32xf32> to vector<32x32xf32>
    %523 = arith.mulf %521, %522 : vector<32x32xf32>
    %c64_243 = arith.constant 64 : index
    %c0_244 = arith.constant 0 : index
    %524 = vector.load %arg0[%c64_243, %c0_244] : memref<2056x64xf32, #tpu.memory_space<vmem>>, vector<16x32xf32>
    %cst_245 = arith.constant dense<0.000000e+00> : vector<16x32xf32>
    %525 = tpu.matmul %524, %523, %cst_245 {dimension_numbers = #tpu.dot_dimension_numbers<[1], [0], [0], [1], [0, 0, 1, 1], [], []>} : vector<16x32xf32>, vector<32x32xf32>, vector<16x32xf32> -> vector<16x32xf32>
    %c1840 = arith.constant 1840 : index
    %c0_246 = arith.constant 0 : index
    %526 = vector.load %arg0[%c1840, %c0_246] : memref<2056x64xf32, #tpu.memory_space<vmem>>, vector<32x4xf32>
    %cst_247 = arith.constant dense<0.000000e+00> : vector<16x4xf32>
    %527 = tpu.matmul %525, %526, %cst_247 {dimension_numbers = #tpu.dot_dimension_numbers<[1], [0], [0], [1], [0, 0, 1, 1], [], []>} : vector<16x32xf32>, vector<32x4xf32>, vector<16x4xf32> -> vector<16x4xf32>
    %c1872 = arith.constant 1872 : index
    %c0_248 = arith.constant 0 : index
    %528 = vector.load %arg0[%c1872, %c0_248] : memref<2056x64xf32, #tpu.memory_space<vmem>>, vector<1x4xf32>
    %529 = vector.broadcast %528 : vector<1x4xf32> to vector<16x4xf32>
    %530 = arith.addf %527, %529 : vector<16x4xf32>
    %531 = arith.addf %530, %18 : vector<16x4xf32>
    %c0_249 = arith.constant 0 : index
    %c0_250 = arith.constant 0 : index
    %532 = vector.load %arg2[%c0_249, %c0_250] : memref<16x4xf32, #tpu.memory_space<vmem>>, vector<16x4xf32>
    tpu.vector_store %arg2[%c0_249, %c0_250], %531 {strides = array<i32>} : memref<16x4xf32, #tpu.memory_space<vmem>>, vector<16x4xf32>,
    return
  }
}

</mosaic_0001>

<bundles_post_ra>
// kernel: adformer_forward.1
= control target key start
LH: loop header
LB: loop body
LE: loop exit
PB: predicated region body
PF: predicated region fallthrough
CT: control target
= control target key end

     0   :  { %v6008_v1 = vmov 0   ;;  %vm83_vm0 = vcmask 261120   ;;  %vm354_vm1 = vcmask 1043456   ;;  %vm341_vm2 = vcmask 31744   ;;  %s8077_s1 = inlined_call_operand.vmem [shape: f32[96,4], index: 1, kind: input, shape index: {}]   ;;  %s8078_s0 = inlined_call_operand.vmem [shape: f32[2056,64], index: 0, kind: input, shape index: {}]   ;;  %s8079_s2 = inlined_call_operand.vmem [shape: f32[16,4], index: 2, kind: output, shape index: {}]  }
   0x1   :  { %v14_v0 = vld [vmem:[%s8077_s1 + $0x18] sm:$0xff]  ;;  %5742 = vset.pattern.permute.xlu1 %v6008_v1  ;;  %v13_v2 = vld [vmem:[%s8077_s1 + $0x10] sm:$0xff]  ;;  %v40_v3 = vld [vmem:[%s8078_s0 + $0x7c0] sm:$0xff]  ;;  %5741 = vset.pattern.permute.xlu0 %v6008_v1  ;;  %vm190_vm3 = vcmask 523264   ;;  %vm642_vm4 = vcmask 64512  }
   0x2   :  { %120 = vmatpush.msra.mxu0 %v14_v0  ;;  %70 = vperm.xlu1 %5742, %v40_v3   ;;  %v12_v4 = vld [vmem:[%s8077_s1 + $0x8] sm:$0xff]  ;;  %v42_v5 = vld [vmem:[%s8078_s0 + $0x7d0] sm:$0xff]  ;;  %v11_v6 = vld [vmem:[%s8077_s1] sm:$0xff] }
   0x3   :  { %298 = vmatpush.msra.mxu3 %v14_v0  ;;  %5743 = vset.pattern.permute.xlu2 %v6008_v1  ;;  %v27_v7 = vld [vmem:[%s8078_s0 + $0x758] sm:$0xff]  ;;  %v238_v9 = vld [vmem:[%s8078_s0 + $0x90] sm:$0xff]  ;;  %v41_v10 = vld [vmem:[%s8078_s0 + $0x7c8] sm:$0xff] }
   0x4   :  { %121 = vmatpush.msra.mxu0 %v13_v2  ;;  %80 = vperm.xlu0 %5741, %v42_v5   ;;  %v39_v8 = vld [vmem:[%s8078_s0 + $0x7b8] sm:$0xff]  ;;  %v28_v11 = vld [vmem:[%s8078_s0 + $0x760] sm:$0xff]  ;;  %v38_v15 = vld [vmem:[%s8078_s0 + $0x7b0] sm:$0xff] }
   0x5   :  { %299 = vmatpush.msra.mxu3 %v13_v2  ;;  %179 = vmatpush.msra.mxu1 %v14_v0  ;;  %v35_v12 = vld [vmem:[%s8078_s0 + $0x798] sm:$0xff]  ;;  %v36_v14 = vld [vmem:[%s8078_s0 + $0x7a0] sm:$0xff]  ;;  %v29_v16 = vld [vmem:[%s8078_s0 + $0x768] sm:$0xff] }
   0x6   :  { %122 = vmatpush.msra.mxu0 %v12_v4  ;;  %v239_v13 = vld [vmem:[%s8078_s0 + $0x98] sm:$0xff]  ;;  %60 = vperm.xlu2 %5743, %v38_v15   ;;  %v240_v17 = vld [vmem:[%s8078_s0 + $0xa0] sm:$0xff]  ;;  %v37_v18 = vld [vmem:[%s8078_s0 + $0x7a8] sm:$0xff] }
   0x7   :  { %300 = vmatpush.msra.mxu3 %v12_v4  ;;  %180 = vmatpush.msra.mxu1 %v13_v2  ;;  %v30_v19 = vld [vmem:[%s8078_s0 + $0x770] sm:$0xff]  ;;  %v241_v20 = vld [vmem:[%s8078_s0 + $0xa8] sm:$0xff]  ;;  %v31_v21 = vld [vmem:[%s8078_s0 + $0x778] sm:$0xff] }
   0x8   :  { %123 = vmatpush.msra.mxu0 %v11_v6  ;;  %v242_v22 = vld [vmem:[%s8078_s0 + $0xb0] sm:$0xff]  ;;  %v32_v23 = vld [vmem:[%s8078_s0 + $0x780] sm:$0xff]  ;;  %v243_v24 = vld [vmem:[%s8078_s0 + $0xb8] sm:$0xff] }
   0x9   :  { %5267 = vmatmul.msk.f32.vlgmr.msra.gmra.mxu0 %vm83_vm0, %v27_v7  ;;  %301 = vmatpush.msra.mxu3 %v11_v6  ;;  %v33_v25 = vld [vmem:[%s8078_s0 + $0x788] sm:$0xff]  ;;  %v244_v26 = vld [vmem:[%s8078_s0 + $0xc0] sm:$0xff]  ;;  %v34_v27 = vld [vmem:[%s8078_s0 + $0x790] sm:$0xff] }
   0xa   :  { %65 = vperm.xlu1 %5742, %v39_v8   ;;  %5279 = vmatmul.msk.f32.vlgmr.msra.gmra.mxu3 %vm83_vm0, %v238_v9  ;;  %v245_v28 = vld [vmem:[%s8078_s0 + $0xc8] sm:$0xff]  ;;  %v246_v29 = vld [vmem:[%s8078_s0 + $0xd0] sm:$0xff]  ;;  %v247_v30 = vld [vmem:[%s8078_s0 + $0xd8] sm:$0xff] }
   0xb   :  { %181 = vmatpush.msra.mxu1 %v12_v4  ;;  %v248_v31 = vld [vmem:[%s8078_s0 + $0xe0] sm:$0xff]  ;;  %v249_v32 = vld [vmem:[%s8078_s0 + $0xe8] sm:$0xff]  ;;  %v160_v41 = vld [vmem:[%s8078_s0 + $0x7f0] sm:$0xff] }
   0xc   :  { %75 = vperm.xlu0 %5741, %v41_v10   ;;  %v159_v38 = vld [vmem:[%s8078_s0 + $0x7e8] sm:$0xff]  ;;  %v340_v44 = vld [vmem:[%s8078_s0 + $0x158] sm:$0xf]  ;;  %v431_v60 = vld [vmem:[%s8078_s0 + $0x160] sm:$0xf] }
   0xd   :  { %182 = vmatpush.msra.mxu1 %v11_v6  ;;  %v339_v15 = vld [vmem:[%s8078_s0 + $0x150] sm:$0xf] }
   0xe   :  { %55 = vperm.xlu2 %5743, %v37_v18   ;;  %5275 = vmatmul.msk.f32.vlgmr.msra.gmra.mxu1 %vm83_vm0, %v159_v38  ;;  %v480_v18 = vld [vmem:[%s8078_s0 + $0x168] sm:$0xf]  ;;  %v577_v38 = vld [vmem:[%s8078_s0 + $0x1b8] sm:$0xff] }
   0xf   :  { %5291 = vmatpush.msk.msrb.mxu1 %vm354_vm1, %v340_v44 }
  0x11   :  { %5268 = vmatmul.msk.f32.gmra.mxu0 %vm83_vm0, %v28_v11  ;;  %5301 = vmatpush.msk.msra.mxu1 %vm354_vm1, %v431_v60 }
  0x12   :  { %45 = vperm.xlu1 %5742, %v35_v12   ;;  %5280 = vmatmul.msk.f32.gmra.mxu3 %vm83_vm0, %v239_v13 }
  0x14   :  { %50 = vperm.xlu0 %5741, %v36_v14   ;;  %v157_v14 = vld [vmem:[%s8078_s0 + $0x7d8] sm:$0xff] }
  0x16   :  { %5276 = vmatmul.msk.f32.gmra.mxu1 %vm83_vm0, %v160_v41  ;;  %v530_v41 = vld [vmem:[%s8078_s0 + $0x190] sm:$0xff] }
  0x19   :  { %5269 = vmatmul.msk.f32.gmra.mxu0 %vm83_vm0, %v29_v16 }
  0x1a   :  { %5281 = vmatmul.msk.f32.gmra.mxu3 %vm83_vm0, %v240_v17  ;;  %v158_v17 = vld [vmem:[%s8078_s0 + $0x7e0] sm:$0xff] }
  0x21   :  { %5270 = vmatmul.msk.f32.gmra.mxu0 %vm83_vm0, %v30_v19 }
  0x22   :  { %5282 = vmatmul.msk.f32.gmra.mxu3 %vm83_vm0, %v241_v20 }
  0x29   :  { %5271 = vmatmul.msk.f32.gmra.mxu0 %vm83_vm0, %v31_v21  ;;  %v15_v21 = vld [vmem:[%s8077_s1 + $0x20] sm:$0xff] }
  0x2a   :  { %5283 = vmatmul.msk.f32.gmra.mxu3 %vm83_vm0, %v242_v22  ;;  %v16_v22 = vld [vmem:[%s8077_s1 + $0x28] sm:$0xff] }
  0x31   :  { %5272 = vmatmul.msk.f32.gmra.mxu0 %vm83_vm0, %v32_v23  ;;  %v17_v23 = vld [vmem:[%s8077_s1 + $0x30] sm:$0xff] }
  0x32   :  { %5284 = vmatmul.msk.f32.gmra.mxu3 %vm83_vm0, %v243_v24  ;;  %v18_v24 = vld [vmem:[%s8077_s1 + $0x38] sm:$0xff] }
  0x39   :  { %5273 = vmatmul.msk.f32.gmra.mxu0 %vm83_vm0, %v33_v25 }
  0x3a   :  { %5285 = vmatmul.msk.f32.gmra.mxu3 %vm83_vm0, %v244_v26 }
  0x41   :  { %5274 = vmatmul.msk.f32.gmra.mxu0 %vm83_vm0, %v34_v27 }
  0x42   :  { %5286 = vmatmul.msk.f32.gmra.mxu3 %vm83_vm0, %v245_v28 }
  0x4a   :  { %5287 = vmatmul.msk.f32.gmra.mxu3 %vm83_vm0, %v246_v29 }
  0x52   :  { %5288 = vmatmul.msk.f32.gmra.mxu3 %vm83_vm0, %v247_v30 }
  0x5a   :  { %5289 = vmatmul.msk.f32.gmra.mxu3 %vm83_vm0, %v248_v31  ;;  %v533_v31 = vld [vmem:[%s8078_s0 + $0x1a8] sm:$0xff] }
  0x5b   :  { %559 = vmatpush.msrb.mxu0 %v533_v31 }
  0x60   :  { %v61_v51 = vpop.permute.xlu2 %60 }
  0x62   :  { %5290 = vmatmul.msk.f32.gmra.mxu3 %vm83_vm0, %v249_v32  ;;  %v579_v32 = vld [vmem:[%s8078_s0 + $0x1c8] sm:$0xff] }
  0x68   :  { %v56_v63 = vpop.permute.xlu2 %55 }
  0x74   :  { %v71_v48 = vpop.permute.xlu1 %70 }
  0x76   :  { %v81_v47 = vpop.permute.xlu0 %80 }
  0x7c   :  { %v66_v54 = vpop.permute.xlu1 %65 }
  0x7e   :  { %v76_v52 = vpop.permute.xlu0 %75 }
  0x84   :  { %v46_v6 = vpop.permute.xlu1 %45 }
  0x86   :  { %v125_v33 = vpop.f32.mrf.mxu0  ;;  %v51_v3 = vpop.permute.xlu0 %50 }
  0x87   :  { %v126_v9 = vadd.f32 %v125_v33, %v46_v6  ;;  %v612_v33 = vld [vmem:[%s8078_s0 + $0x1e8] sm:$0xff] }
  0x89   :  { %v149_v13 = vmax.f32 %v126_v9, 0.0 }
  0x8b   :  { %v6211_v25 = vpop.f32.mrf.mxu1 }
  0x8d   :  { %v6141_v34 = vpop.f32.mrf.mxu3 }
  0x8e   :  { %v128_v35 = vpop.f32.mrf.mxu0 }
  0x8f   :  { %v129_v7 = vadd.f32 %v128_v35, %v51_v3  ;;  %v578_v35 = vld [vmem:[%s8078_s0 + $0x1c0] sm:$0xff] }
  0x91   :  { %v150_v11 = vmax.f32 %v129_v7, 0.0 }
  0x93   :  { %v6213_v26 = vpop.f32.mrf.mxu1 }
  0x95   :  { %v6143_v36 = vpop.f32.mrf.mxu3 }
  0x96   :  { %v131_v37 = vpop.f32.mrf.mxu0 }
  0x97   :  { %v132_v4 = vadd.f32 %v131_v37, %v56_v63  ;;  %v531_v37 = vld [vmem:[%s8078_s0 + $0x198] sm:$0xff] }
  0x99   :  { %v151_v10 = vmax.f32 %v132_v4, 0.0 }
  0x9d   :  { %v6149_v39 = vpop.f32.mrf.mxu3 }
  0x9e   :  { %v134_v40 = vpop.f32.mrf.mxu0 }
  0x9f   :  { %v135_v0 = vadd.f32 %v134_v40, %v61_v51  ;;  %v785_v51 = vld [vmem:[%s8078_s0 + $0x210] sm:$0xff] }
  0xa1   :  { %v152_v8 = vmax.f32 %v135_v0, 0.0 }
  0xa5   :  { %v6155_v42 = vpop.f32.mrf.mxu3 }
  0xa6   :  { %v137_v43 = vpop.f32.mrf.mxu0 }
  0xa7   :  { %v138_v61 = vadd.f32 %v137_v43, %v66_v54  ;;  %v609_v43 = vld [vmem:[%s8078_s0 + $0x1d0] sm:$0xff]  ;;  %v818_v54 = vld [vmem:[%s8078_s0 + $0x228] sm:$0xff] }
  0xa9   :  { %v153_v5 = vmax.f32 %v138_v61, 0.0  ;;  %v782_v61 = vld [vmem:[%s8078_s0 + $0x1f8] sm:$0xff] }
  0xad   :  { %v315_v45 = vpop.f32.mrf.mxu3 }
  0xae   :  { %v140_v46 = vpop.f32.mrf.mxu0  ;;  %5292 = vmatmul.msk.f32.vlgmr.msrb.gmra.mxu1 %vm341_vm2, %v315_v45 }
  0xaf   :  { %v141_v58 = vadd.f32 %v140_v46, %v71_v48  ;;  %592 = vmatpush.msrb.mxu1 %v579_v32 }
  0xb1   :  { %v154_v1 = vmax.f32 %v141_v58, 0.0  ;;  %593 = vmatpush.msrb.mxu1 %v578_v35 }
  0xb3   :  { %594 = vmatpush.msrb.mxu1 %v577_v38 }
  0xb5   :  { %v318_v49 = vpop.f32.mrf.mxu3 }
  0xb6   :  { %v143_v50 = vpop.f32.mrf.mxu0  ;;  %5293 = vmatmul.msk.f32.gmra.mxu1 %vm341_vm2, %v318_v49 }
  0xb7   :  { %v144_v56 = vadd.f32 %v143_v50, %v76_v52  ;;  %v819_v52 = vld [vmem:[%s8078_s0 + $0x230] sm:$0xff] }
  0xb9   :  { %v155_v62 = vmax.f32 %v144_v56, 0.0  ;;  %v817_v56 = vld [vmem:[%s8078_s0 + $0x220] sm:$0xff] }
  0xbd   :  { %v321_v53 = vpop.f32.mrf.mxu3 }
  0xbe   :  { %v146_v55 = vpop.f32.mrf.mxu0  ;;  %5294 = vmatmul.msk.f32.gmra.mxu1 %vm341_vm2, %v321_v53  ;;  %v784_v53 = vld [vmem:[%s8078_s0 + $0x208] sm:$0xff] }
  0xbf   :  { %v147_v57 = vadd.f32 %v146_v55, %v81_v47  ;;  %v783_v55 = vld [vmem:[%s8078_s0 + $0x200] sm:$0xff] }
  0xc1   :  { %v156_v59 = vmax.f32 %v147_v57, 0.0 }
  0xc3   :  { %205 = vmatpush.msra.mxu2 %v156_v59 }
  0xc5   :  { %206 = vmatpush.msra.mxu2 %v155_v62  ;;  %v324_v2 = vpop.f32.mrf.mxu3  ;;  %v816_v62 = vld [vmem:[%s8078_s0 + $0x218] sm:$0xff] }
  0xc6   :  { %5295 = vmatmul.msk.f32.gmra.mxu1 %vm341_vm2, %v324_v2 }
  0xc7   :  { %207 = vmatpush.msra.mxu2 %v154_v1 }
  0xc9   :  { %208 = vmatpush.msra.mxu2 %v153_v5 }
  0xcb   :  { %209 = vmatpush.msra.mxu2 %v152_v8 }
  0xcd   :  { %210 = vmatpush.msra.mxu2 %v151_v10  ;;  %v327_v12 = vpop.f32.mrf.mxu3 }
  0xce   :  { %5302 = vmatmul.msk.f32.vlgmr.msra.gmra.mxu1 %vm341_vm2, %v327_v12 }
  0xcf   :  { %211 = vmatpush.msra.mxu2 %v150_v11 }
  0xd1   :  { %212 = vmatpush.msra.mxu2 %v149_v13 }
  0xd2   :  { %5277 = vmatmul.msk.f32.vlgmr.msra.gmra.mxu2 %vm190_vm3, %v157_v14 }
  0xd3   :  { %5296 = vmatpush.msk.msrb.mxu2 %vm354_vm1, %v339_v15 }
  0xd5   :  { %v330_v16 = vpop.f32.mrf.mxu3  ;;  %5306 = vmatpush.msk.msra.mxu2 %vm354_vm1, %v480_v18 }
  0xd6   :  { %5303 = vmatmul.msk.f32.gmra.mxu1 %vm341_vm2, %v330_v16 }
  0xda   :  { %5278 = vmatmul.msk.f32.gmra.mxu2 %vm190_vm3, %v158_v17 }
  0xdd   :  { %v333_v19 = vpop.f32.mrf.mxu3 }
  0xde   :  { %5304 = vmatmul.msk.f32.gmra.mxu1 %vm341_vm2, %v333_v19 }
  0xe2   :  { %5297 = vmatmul.msk.f32.vlgmr.msrb.gmra.mxu2 %vm341_vm2, %v6141_v34  ;;  %v532_v34 = vld [vmem:[%s8078_s0 + $0x1a0] sm:$0xff] }
  0xe3   :  { %625 = vmatpush.msrb.mxu2 %v612_v33  ;;  %560 = vmatpush.msrb.mxu0 %v532_v34  ;;  %v850_v33 = vld [vmem:[%s8078_s0 + $0x240] sm:$0xff]  ;;  %v849_v34 = vld [vmem:[%s8078_s0 + $0x238] sm:$0xff] }
  0xe5   :  { %v336_v20 = vpop.f32.mrf.mxu3  ;;  %561 = vmatpush.msrb.mxu0 %v531_v37 }
  0xe6   :  { %5305 = vmatmul.msk.f32.gmra.mxu1 %vm341_vm2, %v336_v20 }
  0xe7   :  { %562 = vmatpush.msrb.mxu0 %v530_v41 }
  0xea   :  { %5298 = vmatmul.msk.f32.gmra.mxu2 %vm341_vm2, %v6143_v36  ;;  %v611_v36 = vld [vmem:[%s8078_s0 + $0x1e0] sm:$0xff] }
  0xeb   :  { %626 = vmatpush.msrb.mxu2 %v611_v36 }
  0xf2   :  { %5299 = vmatmul.msk.f32.gmra.mxu2 %vm341_vm2, %v6149_v39  ;;  %v610_v39 = vld [vmem:[%s8078_s0 + $0x1d8] sm:$0xff] }
  0xf3   :  { %627 = vmatpush.msrb.mxu2 %v610_v39 }
  0xf5   :  { %628 = vmatpush.msrb.mxu2 %v609_v43  ;;  %v6368_v43 = vld [vmem:[%s8078_s0 + $0x50] sm:$0xff] }
  0xfa   :  { %5300 = vmatmul.msk.f32.gmra.mxu2 %vm341_vm2, %v6155_v42  ;;  %v576_v42 = vld [vmem:[%s8078_s0 + $0x1b0] sm:$0xff] }
  0xfb   :  { %595 = vmatpush.msrb.mxu1 %v576_v42 }
  0xfd   :  { %799 = vmatpush.msra.mxu1 %v785_v51  ;;  %v6382_v51 = vld [vmem:[%s8078_s0 + $0x60] sm:$0xff] }
  0xff   :  { %800 = vmatpush.msra.mxu1 %v784_v53 }
 0x101   :  { %801 = vmatpush.msra.mxu1 %v783_v55  ;;  %v6389_v55 = vld [vmem:[%s8078_s0 + $0x68] sm:$0xff] }
 0x102   :  { %5307 = vmatmul.msk.f32.vlgmr.msra.gmra.mxu2 %vm341_vm2, %v15_v21  ;;  %v6332_v21 = vld [vmem:[%s8078_s0 + $0x330] sm:$0xf] }
 0x103   :  { %832 = vmatpush.msra.mxu2 %v819_v52  ;;  %802 = vmatpush.msra.mxu1 %v782_v61 }
 0x105   :  { %833 = vmatpush.msra.mxu2 %v818_v54 }
 0x107   :  { %834 = vmatpush.msra.mxu2 %v817_v56 }
 0x109   :  { %835 = vmatpush.msra.mxu2 %v816_v62 }
 0x10a   :  { %5308 = vmatmul.msk.f32.gmra.mxu2 %vm341_vm2, %v16_v22 }
 0x112   :  { %5309 = vmatmul.msk.f32.gmra.mxu2 %vm341_vm2, %v17_v23  ;;  %v534_v23 = vperm.slane %v6332_v21, 0 }
 0x11a   :  { %5310 = vmatmul.msk.f32.gmra.mxu2 %vm341_vm2, %v18_v24  ;;  %v852_v24 = vld [vmem:[%s8078_s0 + $0x250] sm:$0xff] }
 0x12b   :  { %v375_v27 = vpop.f32.mrf.mxu1 }
 0x133   :  { %v378_v29 = vpop.f32.mrf.mxu1 }
 0x13b   :  { %v381_v44 = vpop.f32.mrf.mxu1 }
 0x143   :  { %v384_v46 = vpop.f32.mrf.mxu1 }
 0x14b   :  { %v464_v48 = vpop.f32.mrf.mxu1 }
 0x153   :  { %v467_v58 = vpop.f32.mrf.mxu1 }
 0x155   :  { %v6215_v28 = vpop.f32.mrf.mxu2 }
 0x15b   :  { %v470_v3 = vpop.f32.mrf.mxu1 }
 0x15d   :  { %v6217_v30 = vpop.f32.mrf.mxu2 }
 0x163   :  { %v473_v9 = vpop.f32.mrf.mxu1 }
 0x165   :  { %v419_v40 = vpop.f32.mrf.mxu2 }
 0x166   :  { %v420_v50 = vadd.f32 %v419_v40, %v375_v27 }
 0x168   :  { %v476_v57 = vadd.f32 %v464_v48, %v420_v50 }
 0x16d   :  { %v422_v45 = vpop.f32.mrf.mxu2 }
 0x16e   :  { %v423_v63 = vadd.f32 %v422_v45, %v378_v29  ;;  %v851_v29 = vld [vmem:[%s8078_s0 + $0x248] sm:$0xff] }
 0x170   :  { %v477_v0 = vadd.f32 %v467_v58, %v423_v63 }
 0x175   :  { %v425_v47 = vpop.f32.mrf.mxu2 }
 0x176   :  { %v426_v4 = vadd.f32 %v425_v47, %v381_v44  ;;  %v6375_v47 = vld [vmem:[%s8078_s0 + $0x58] sm:$0xff] }
 0x178   :  { %v478_v5 = vadd.f32 %v470_v3, %v426_v4 }
 0x17d   :  { %v428_v49 = vpop.f32.mrf.mxu2 }
 0x17e   :  { %v429_v8 = vadd.f32 %v428_v49, %v384_v46 }
 0x180   :  { %v479_v10 = vadd.f32 %v473_v9, %v429_v8 }
 0x185   :  { %v513_v59 = vpop.f32.mrf.mxu2 }
 0x186   :  { %v6273_v60 = vadd.f32 %v513_v59, %v476_v57 }
 0x188   :  { %5311 = vmatmul.msk.f32.vlgmr.msrb.gmra.mxu0 %vm83_vm0, %v6273_v60  ;;  %5315 = vmatmul.msk.f32.vlgmr.msrb.gmra.mxu1 %vm83_vm0, %v6273_v60 }
 0x189   :  { %5319 = vmatmul.msk.f32.vlgmr.msrb.gmra.mxu2 %vm83_vm0, %v6273_v60 }
 0x18d   :  { %v516_v1 = vpop.f32.mrf.mxu2 }
 0x18e   :  { %v6287_v2 = vadd.f32 %v516_v1, %v477_v0 }
 0x190   :  { %5312 = vmatmul.msk.f32.gmra.mxu0 %vm83_vm0, %v6287_v2  ;;  %5316 = vmatmul.msk.f32.gmra.mxu1 %vm83_vm0, %v6287_v2 }
 0x191   :  { %5320 = vmatmul.msk.f32.gmra.mxu2 %vm83_vm0, %v6287_v2 }
 0x195   :  { %v519_v6 = vpop.f32.mrf.mxu2 }
 0x196   :  { %v6295_v7 = vadd.f32 %v519_v6, %v478_v5 }
 0x198   :  { %5313 = vmatmul.msk.f32.gmra.mxu0 %vm83_vm0, %v6295_v7  ;;  %5317 = vmatmul.msk.f32.gmra.mxu1 %vm83_vm0, %v6295_v7 }
 0x199   :  { %5321 = vmatmul.msk.f32.gmra.mxu2 %vm83_vm0, %v6295_v7 }
 0x19d   :  { %v522_v11 = vpop.f32.mrf.mxu2 }
 0x19e   :  { %v6303_v12 = vadd.f32 %v522_v11, %v479_v10 }
 0x1a0   :  { %5314 = vmatmul.msk.f32.gmra.mxu0 %vm83_vm0, %v6303_v12  ;;  %5318 = vmatmul.msk.f32.gmra.mxu1 %vm83_vm0, %v6303_v12 }
 0x1a1   :  { %5322 = vmatmul.msk.f32.gmra.mxu2 %vm83_vm0, %v6303_v12 }
 0x1a8   :  { %5335 = vmatmul.msk.f32.vlgmr.msra.gmra.mxu1 %vm83_vm0, %v6273_v60 }
 0x1a9   :  { %5339 = vmatmul.msk.f32.vlgmr.msra.gmra.mxu2 %vm83_vm0, %v6273_v60 }
 0x1b0   :  { %5336 = vmatmul.msk.f32.gmra.mxu1 %vm83_vm0, %v6287_v2 }
 0x1b1   :  { %5340 = vmatmul.msk.f32.gmra.mxu2 %vm83_vm0, %v6287_v2 }
 0x1b8   :  { %5337 = vmatmul.msk.f32.gmra.mxu1 %vm83_vm0, %v6295_v7 }
 0x1b9   :  { %5341 = vmatmul.msk.f32.gmra.mxu2 %vm83_vm0, %v6295_v7 }
 0x1c0   :  { %5338 = vmatmul.msk.f32.gmra.mxu1 %vm83_vm0, %v6303_v12 }
 0x1c1   :  { %5342 = vmatmul.msk.f32.gmra.mxu2 %vm83_vm0, %v6303_v12 }
 0x205   :  { %v597_v13 = vpop.f32.mrf.mxu1  ;;  %v564_v20 = vpop.f32.mrf.mxu0 }
 0x206   :  { %v565_v27 = vadd.f32 %v564_v20, %v534_v23 }
 0x20c   :  { %v630_v14 = vpop.f32.mrf.mxu2 }
 0x20d   :  { %v600_v15 = vpop.f32.mrf.mxu1  ;;  %v567_v31 = vpop.f32.mrf.mxu0 }
 0x20e   :  { %v568_v35 = vadd.f32 %v567_v31, %v534_v23 }
 0x214   :  { %v633_v16 = vpop.f32.mrf.mxu2 }
 0x215   :  { %v603_v17 = vpop.f32.mrf.mxu1  ;;  %v570_v37 = vpop.f32.mrf.mxu0 }
 0x216   :  { %v571_v38 = vadd.f32 %v570_v37, %v534_v23 }
 0x21c   :  { %v636_v18 = vpop.f32.mrf.mxu2 }
 0x21d   :  { %v606_v19 = vpop.f32.mrf.mxu1  ;;  %v573_v40 = vpop.f32.mrf.mxu0 }
 0x21e   :  { %5323 = vmatpush.xpose.msk.msra.mxu0 %vm642_vm4, %v606_v19  ;;  %v574_v41 = vadd.f32 %v573_v40, %v534_v23 }
 0x222   :  { %5324 = vmatpush.xpose.msk.msra.mxu0 %vm642_vm4, %v603_v17 }
 0x224   :  { %v639_v22 = vpop.f32.mrf.mxu2 }
 0x225   :  { %764 = vmatpush.msrb.mxu3 %v639_v22 }
 0x226   :  { %5325 = vmatpush.xpose.msk.msra.mxu0 %vm642_vm4, %v600_v15 }
 0x227   :  { %765 = vmatpush.msrb.mxu3 %v636_v18 }
 0x229   :  { %766 = vmatpush.msrb.mxu3 %v633_v16 }
 0x22a   :  { %5326 = vmatpush.xpose.msk.msra.mxu0 %vm642_vm4, %v597_v13 }
 0x22b   :  { %767 = vmatpush.msrb.mxu3 %v630_v14 }
 0x22c   :  { %v837_v32 = vpop.f32.mrf.mxu2 }
 0x22d   :  { %5327 = vmatmul.msk.f32.vlgmr.msra.gmra.mxu0 %vm642_vm4, %v565_v27 }
 0x22e   :  { %865 = vmatpush.msrb.mxu0 %v852_v24 }
 0x230   :  { %866 = vmatpush.msrb.mxu0 %v851_v29 }
 0x232   :  { %867 = vmatpush.msrb.mxu0 %v850_v33 }
 0x234   :  { %868 = vmatpush.msrb.mxu0 %v849_v34  ;;  %v840_v36 = vpop.f32.mrf.mxu2 }
 0x235   :  { %5328 = vmatmul.msk.f32.gmra.mxu0 %vm642_vm4, %v568_v35 }
 0x23c   :  { %v843_v39 = vpop.f32.mrf.mxu2 }
 0x23d   :  { %5329 = vmatmul.msk.f32.gmra.mxu0 %vm642_vm4, %v571_v38 }
 0x244   :  { %v846_v42 = vpop.f32.mrf.mxu2 }
 0x245   :  { %5347 = vmatpush.xpose.msk.msra.mxu3 %vm642_vm4, %v846_v42  ;;  %5330 = vmatmul.msk.f32.gmra.mxu0 %vm642_vm4, %v574_v41  ;;  %v1106_v41 = vld [vmem:[%s8078_s0 + $0x278] sm:$0xff]  ;;  %v1105_v42 = vld [vmem:[%s8078_s0 + $0x270] sm:$0xff] }
 0x249   :  { %5348 = vmatpush.xpose.msk.msra.mxu3 %vm642_vm4, %v843_v39  ;;  %v804_v39 = vpop.f32.mrf.mxu1 }
 0x24d   :  { %5349 = vmatpush.xpose.msk.msra.mxu3 %vm642_vm4, %v840_v36  ;;  %5343 = vmatmul.msk.f32.vlgmr.msrb.gmra.mxu0 %vm83_vm0, %v6273_v60 }
 0x251   :  { %5350 = vmatpush.xpose.msk.msra.mxu3 %vm642_vm4, %v837_v32 }
 0x255   :  { %5344 = vmatmul.msk.f32.gmra.mxu0 %vm83_vm0, %v6287_v2 }
 0x25d   :  { %5345 = vmatmul.msk.f32.gmra.mxu0 %vm83_vm0, %v6295_v7 }
 0x265   :  { %5346 = vmatmul.msk.f32.gmra.mxu0 %vm83_vm0, %v6303_v12 }
 0x2aa   :  { %v684_v44 = vpop.f32.mrf.mxu0 }
 0x2ab   :  { %v685_v45 = vadd.f32 %v684_v44, %v6368_v43  ;;  %v786_v44 = vperm.slane %v6332_v21, 1 }
 0x2ad   :  { %v696_v46 = vsel %vm83_vm0, %v685_v45, -inf }
 0x2ae   :  { %697 = vmax.xlane.f32.xlu2 %v696_v46  ;;  %v1103_v46 = vld [vmem:[%s8078_s0 + $0x260] sm:$0xff] }
 0x2b2   :  { %v687_v48 = vpop.f32.mrf.mxu0 }
 0x2b3   :  { %v688_v49 = vadd.f32 %v687_v48, %v6375_v47  ;;  %v805_v48 = vadd.f32 %v804_v39, %v786_v44 }
 0x2b5   :  { %v699_v50 = vsel %vm83_vm0, %v688_v49, -inf }
 0x2b6   :  { %700 = vmax.xlane.f32.xlu0 %v699_v50 }
 0x2ba   :  { %v690_v52 = vpop.f32.mrf.mxu0 }
 0x2bb   :  { %v691_v53 = vadd.f32 %v690_v52, %v6382_v51 }
 0x2bd   :  { %v702_v54 = vsel %vm83_vm0, %v691_v53, -inf }
 0x2be   :  { %703 = vmax.xlane.f32.xlu1 %v702_v54 }
 0x2c2   :  { %v693_v56 = vpop.f32.mrf.mxu0 }
 0x2c3   :  { %v694_v57 = vadd.f32 %v693_v56, %v6389_v55 }
 0x2c5   :  { %v705_v58 = vsel %vm83_vm0, %v694_v57, -inf }
 0x2c6   :  { %706 = vmax.xlane.f32.xlu2 %v705_v58 }
 0x2ca   :  { %v870_v59 = vpop.f32.mrf.mxu0 }
 0x2d2   :  { %v873_v61 = vpop.f32.mrf.mxu0 }
 0x2da   :  { %v876_v62 = vpop.f32.mrf.mxu0 }
 0x2e2   :  { %v879_v63 = vpop.f32.mrf.mxu0 }
 0x2e3   :  { %1003 = vmatpush.msrb.mxu1 %v879_v63 }
 0x2e5   :  { %1004 = vmatpush.msrb.mxu1 %v876_v62 }
 0x2e7   :  { %1005 = vmatpush.msrb.mxu1 %v873_v61 }
 0x2e9   :  { %1006 = vmatpush.msrb.mxu1 %v870_v59 }
 0x321   :  { %v698_v0 = vpop.xlane.xlu2 %697 }
 0x322   :  { %v708_v1 = vsub.f32 %v685_v45, %v698_v0  ;;  %v1104_v45 = vld [vmem:[%s8078_s0 + $0x268] sm:$0xff] }
 0x324   :  { %v712_v3 = vmul.f32 1.442695, %v708_v1 }
 0x326   :  { %5750 = vpow2.f32 %v712_v3 }
 0x329   :  { %v701_v4 = vpop.xlane.xlu0 %700 }
 0x32a   :  { %v709_v5 = vsub.f32 %v688_v49, %v701_v4  ;;  %v807_v49 = vpop.f32.mrf.mxu1 }
 0x32b   :  { %v808_v50 = vadd.f32 %v807_v49, %v786_v44 }
 0x32c   :  { %v5751_v6 = vpop.eup %5750  ;;  %v714_v8 = vmul.f32 1.442695, %v709_v5 }
 0x32d   :  { %v720_v9 = vsel %vm83_vm0, %v5751_v6, 0.0 }
 0x32e   :  { %5752 = vpow2.f32 %v714_v8  ;;  %721 = vadd.xlane.f32.xlu2 %v720_v9 }
 0x331   :  { %v704_v10 = vpop.xlane.xlu1 %703 }
 0x332   :  { %v710_v11 = vsub.f32 %v691_v53, %v704_v10  ;;  %v810_v52 = vpop.f32.mrf.mxu1 }
 0x333   :  { %v811_v53 = vadd.f32 %v810_v52, %v786_v44 }
 0x334   :  { %v5753_v13 = vpop.eup %5752  ;;  %v716_v14 = vmul.f32 1.442695, %v710_v11 }
 0x335   :  { %v723_v15 = vsel %vm83_vm0, %v5753_v13, 0.0 }
 0x336   :  { %5754 = vpow2.f32 %v716_v14  ;;  %724 = vadd.xlane.f32.xlu0 %v723_v15 }
 0x339   :  { %v707_v16 = vpop.xlane.xlu2 %706 }
 0x33a   :  { %v711_v17 = vsub.f32 %v694_v57, %v707_v16  ;;  %v813_v54 = vpop.f32.mrf.mxu1  ;;  %v781_v57 = vld [vmem:[%s8078_s0 + $0x1f0] sm:$0xff] }
 0x33b   :  { %v814_v56 = vadd.f32 %v813_v54, %v786_v44  ;;  %1089 = vmatpush.msra.mxu0 %v781_v57  ;;  %v1137_v44 = vld [vmem:[%s8078_s0 + $0x280] sm:$0xff] }
 0x33c   :  { %v5755_v18 = vpop.eup %5754  ;;  %v718_v19 = vmul.f32 1.442695, %v711_v17 }
 0x33d   :  { %v726_v20 = vsel %vm83_vm0, %v5755_v18, 0.0 }
 0x33e   :  { %5756 = vpow2.f32 %v718_v19  ;;  %727 = vadd.xlane.f32.xlu1 %v726_v20 }
 0x344   :  { %v5757_v22 = vpop.eup %5756 }
 0x345   :  { %v729_v23 = vsel %vm83_vm0, %v5757_v22, 0.0 }
 0x346   :  { %730 = vadd.xlane.f32.xlu2 %v729_v23 }
 0x3a1   :  { %v722_v24 = vpop.xlane.xlu2 %721 }
 0x3a2   :  { %5758 = vrcp.f32 %v722_v24 }
 0x3a8   :  { %v5759_v27 = vpop.eup %5758 }
 0x3a9   :  { %v725_v29 = vpop.xlane.xlu0 %724  ;;  %v736_v31 = vmul.f32 %v5759_v27, %v5751_v6 }
 0x3aa   :  { %5760 = vrcp.f32 %v725_v29 }
 0x3ab   :  { %5331 = vmatmul.msk.f32.vlgmr.msrb.gmra.mxu3 %vm83_vm0, %v736_v31 }
 0x3ac   :  { %1120 = vmatpush.msrb.mxu3 %v1106_v41  ;;  %v1139_v41 = vld [vmem:[%s8078_s0 + $0x290] sm:$0xff] }
 0x3ae   :  { %1121 = vmatpush.msrb.mxu3 %v1105_v42  ;;  %v1138_v42 = vld [vmem:[%s8078_s0 + $0x288] sm:$0xff] }
 0x3b0   :  { %v5761_v32 = vpop.eup %5760  ;;  %1122 = vmatpush.msrb.mxu3 %v1104_v45 }
 0x3b1   :  { %v728_v33 = vpop.xlane.xlu1 %727  ;;  %v737_v34 = vmul.f32 %v5761_v32, %v5753_v13 }
 0x3b2   :  { %5762 = vrcp.f32 %v728_v33  ;;  %1123 = vmatpush.msrb.mxu3 %v1103_v46 }
 0x3b3   :  { %5332 = vmatmul.msk.f32.gmra.mxu3 %vm83_vm0, %v737_v34 }
 0x3b8   :  { %v5763_v35 = vpop.eup %5762 }
 0x3b9   :  { %v731_v36 = vpop.xlane.xlu2 %730  ;;  %v738_v37 = vmul.f32 %v5763_v35, %v5755_v18 }
 0x3ba   :  { %5764 = vrcp.f32 %v731_v36 }
 0x3bb   :  { %5333 = vmatmul.msk.f32.gmra.mxu3 %vm83_vm0, %v738_v37 }
 0x3c0   :  { %v5765_v38 = vpop.eup %5764 }
 0x3c1   :  { %v739_v40 = vmul.f32 %v5765_v38, %v5757_v22 }
 0x3c3   :  { %5334 = vmatmul.msk.f32.gmra.mxu3 %vm83_vm0, %v739_v40  ;;  %v1140_v40 = vld [vmem:[%s8078_s0 + $0x298] sm:$0xff] }
 0x3c4   :  { %1153 = vmatpush.msra.mxu1 %v1140_v40 }
 0x3c6   :  { %1154 = vmatpush.msra.mxu1 %v1139_v41 }
 0x3c8   :  { %1155 = vmatpush.msra.mxu1 %v1138_v42 }
 0x3ca   :  { %1156 = vmatpush.msra.mxu1 %v1137_v44 }
 0x3cb   :  { %5351 = vmatmul.msk.f32.vlgmr.msra.gmra.mxu3 %vm642_vm4, %v805_v48 }
 0x3d3   :  { %5352 = vmatmul.msk.f32.gmra.mxu3 %vm642_vm4, %v808_v50 }
 0x3db   :  { %5353 = vmatmul.msk.f32.gmra.mxu3 %vm642_vm4, %v811_v53 }
 0x3e3   :  { %5354 = vmatmul.msk.f32.gmra.mxu3 %vm642_vm4, %v814_v56 }
 0x3eb   :  { %5367 = vmatmul.msk.f32.vlgmr.msrb.gmra.mxu3 %vm83_vm0, %v6273_v60 }
 0x3f3   :  { %5368 = vmatmul.msk.f32.gmra.mxu3 %vm83_vm0, %v6287_v2 }
 0x3fb   :  { %5369 = vmatmul.msk.f32.gmra.mxu3 %vm83_vm0, %v6295_v7 }
 0x403   :  { %5370 = vmatmul.msk.f32.gmra.mxu3 %vm83_vm0, %v6303_v12 }
 0x42e   :  { %v769_v58 = vpop.f32.mrf.mxu3 }
 0x42f   :  { %5363 = vmatmul.msk.f32.vlgmr.msra.gmra.mxu0 %vm642_vm4, %v769_v58 }
 0x436   :  { %v772_v59 = vpop.f32.mrf.mxu3 }
 0x437   :  { %5364 = vmatmul.msk.f32.gmra.mxu0 %vm642_vm4, %v772_v59  ;;  %v1020_v59 = vld [vmem:[%s8078_s0 + $0x258] sm:$0xff] }
 0x438   :  { %1048 = vmatpush.msrb.mxu2 %v1020_v59 }
 0x43e   :  { %v775_v61 = vpop.f32.mrf.mxu3 }
 0x43f   :  { %5365 = vmatmul.msk.f32.gmra.mxu0 %vm642_vm4, %v775_v61  ;;  %v1173_v61 = vld [vmem:[%s8078_s0 + $0x2b8] sm:$0xff] }
 0x440   :  { %1186 = vmatpush.msra.mxu2 %v1173_v61 }
 0x446   :  { %v778_v62 = vpop.f32.mrf.mxu3 }
 0x447   :  { %5366 = vmatmul.msk.f32.gmra.mxu0 %vm642_vm4, %v778_v62  ;;  %v1172_v62 = vld [vmem:[%s8078_s0 + $0x2b0] sm:$0xff] }
 0x448   :  { %1187 = vmatpush.msra.mxu2 %v1172_v62 }
 0x44e   :  { %v923_v63 = vpop.f32.mrf.mxu3 }
 0x44f   :  { %v924_v0 = vadd.f32 %v923_v63, %v6368_v43  ;;  %v1171_v63 = vld [vmem:[%s8078_s0 + $0x2a8] sm:$0xff] }
 0x450   :  { %1188 = vmatpush.msra.mxu2 %v1171_v63 }
 0x451   :  { %v935_v1 = vsel %vm83_vm0, %v924_v0, -inf }
 0x452   :  { %936 = vmax.xlane.f32.xlu0 %v935_v1  ;;  %v1170_v1 = vld [vmem:[%s8078_s0 + $0x2a0] sm:$0xff] }
 0x453   :  { %1189 = vmatpush.msra.mxu2 %v1170_v1 }
 0x456   :  { %v926_v3 = vpop.f32.mrf.mxu3 }
 0x457   :  { %v927_v4 = vadd.f32 %v926_v3, %v6375_v47 }
 0x459   :  { %v938_v5 = vsel %vm83_vm0, %v927_v4, -inf }
 0x45a   :  { %939 = vmax.xlane.f32.xlu1 %v938_v5 }
 0x45e   :  { %v929_v6 = vpop.f32.mrf.mxu3 }
 0x45f   :  { %v930_v8 = vadd.f32 %v929_v6, %v6382_v51  ;;  %v1390_v6 = vld [vmem:[%s8078_s0 + $0x2e0] sm:$0xff] }
 0x461   :  { %v941_v9 = vsel %vm83_vm0, %v930_v8, -inf }
 0x462   :  { %942 = vmax.xlane.f32.xlu2 %v941_v9  ;;  %v1388_v9 = vld [vmem:[%s8078_s0 + $0x2d0] sm:$0xff] }
 0x466   :  { %v932_v10 = vpop.f32.mrf.mxu3 }
 0x467   :  { %v933_v11 = vadd.f32 %v932_v10, %v6389_v55  ;;  %v1387_v10 = vld [vmem:[%s8078_s0 + $0x2c8] sm:$0xff] }
 0x469   :  { %v944_v13 = vsel %vm83_vm0, %v933_v11, -inf }
 0x46a   :  { %945 = vmax.xlane.f32.xlu0 %v944_v13 }
 0x4c5   :  { %v937_v14 = vpop.xlane.xlu0 %936 }
 0x4c6   :  { %v947_v15 = vsub.f32 %v924_v0, %v937_v14 }
 0x4c8   :  { %v951_v16 = vmul.f32 1.442695, %v947_v15 }
 0x4ca   :  { %5766 = vpow2.f32 %v951_v16  ;;  %v1125_v16 = vpop.f32.mrf.mxu3 }
 0x4cd   :  { %v940_v17 = vpop.xlane.xlu1 %939 }
 0x4ce   :  { %v948_v18 = vsub.f32 %v927_v4, %v940_v17  ;;  %v1107_v17 = vperm.slane %v6332_v21, 2 }
 0x4d0   :  { %v5767_v19 = vpop.eup %5766  ;;  %v953_v20 = vmul.f32 1.442695, %v948_v18  ;;  %v1424_v18 = vld [vmem:[%s8078_s0 + $0x300] sm:$0xff] }
 0x4d1   :  { %v959_v22 = vsel %vm83_vm0, %v5767_v19, 0.0 }
 0x4d2   :  { %5768 = vpow2.f32 %v953_v20  ;;  %960 = vadd.xlane.f32.xlu1 %v959_v22  ;;  %v1423_v20 = vld [vmem:[%s8078_s0 + $0x2f8] sm:$0xff]  ;;  %v1128_v22 = vpop.f32.mrf.mxu3 }
 0x4d5   :  { %v943_v23 = vpop.xlane.xlu2 %942 }
 0x4d6   :  { %v949_v24 = vsub.f32 %v930_v8, %v943_v23  ;;  %v1389_v8 = vld [vmem:[%s8078_s0 + $0x2d8] sm:$0xff]  ;;  %v1422_v23 = vld [vmem:[%s8078_s0 + $0x2f0] sm:$0xff] }
 0x4d8   :  { %v5769_v27 = vpop.eup %5768  ;;  %v955_v29 = vmul.f32 1.442695, %v949_v24  ;;  %v1421_v24 = vld [vmem:[%s8078_s0 + $0x2e8] sm:$0xff] }
 0x4d9   :  { %v962_v31 = vsel %vm83_vm0, %v5769_v27, 0.0 }
 0x4da   :  { %5770 = vpow2.f32 %v955_v29  ;;  %963 = vadd.xlane.f32.xlu2 %v962_v31  ;;  %v1131_v29 = vpop.f32.mrf.mxu3 }
 0x4db   :  { %v1132_v31 = vadd.f32 %v1131_v29, %v1107_v17 }
 0x4dd   :  { %v946_v32 = vpop.xlane.xlu0 %945 }
 0x4de   :  { %v950_v33 = vsub.f32 %v933_v11, %v946_v32 }
 0x4e0   :  { %v5771_v34 = vpop.eup %5770  ;;  %v957_v35 = vmul.f32 1.442695, %v950_v33 }
 0x4e1   :  { %v965_v36 = vsel %vm83_vm0, %v5771_v34, 0.0 }
 0x4e2   :  { %5772 = vpow2.f32 %v957_v35  ;;  %966 = vadd.xlane.f32.xlu0 %v965_v36  ;;  %v1134_v32 = vpop.f32.mrf.mxu3 }
 0x4e3   :  { %v1135_v33 = vadd.f32 %v1134_v32, %v1107_v17 }
 0x4e8   :  { %v5773_v37 = vpop.eup %5772 }
 0x4e9   :  { %v968_v38 = vsel %vm83_vm0, %v5773_v37, 0.0 }
 0x4ea   :  { %969 = vadd.xlane.f32.xlu1 %v968_v38  ;;  %v6553_v38 = vpop.f32.mrf.mxu0 }
 0x4f2   :  { %v6555_v40 = vpop.f32.mrf.mxu0 }
 0x4fa   :  { %v6557_v42 = vpop.f32.mrf.mxu0 }
 0x545   :  { %v961_v39 = vpop.xlane.xlu1 %960 }
 0x546   :  { %5774 = vrcp.f32 %v961_v39 }
 0x54c   :  { %v5775_v45 = vpop.eup %5774 }
 0x54d   :  { %v975_v46 = vmul.f32 %v5775_v45, %v5767_v19  ;;  %v964_v48 = vpop.xlane.xlu2 %963  ;;  %v1126_v19 = vadd.f32 %v1125_v16, %v1107_v17 }
 0x54e   :  { %5776 = vrcp.f32 %v964_v48 }
 0x54f   :  { %5355 = vmatmul.msk.f32.vlgmr.msrb.gmra.mxu1 %vm83_vm0, %v975_v46  ;;  %v6559_v46 = vpop.f32.mrf.mxu0 }
 0x554   :  { %v5777_v49 = vpop.eup %5776 }
 0x555   :  { %v967_v50 = vpop.xlane.xlu0 %966  ;;  %v976_v52 = vmul.f32 %v5777_v49, %v5769_v27  ;;  %v1129_v27 = vadd.f32 %v1128_v22, %v1107_v17 }
 0x556   :  { %5778 = vrcp.f32 %v967_v50 }
 0x557   :  { %5356 = vmatmul.msk.f32.gmra.mxu1 %vm83_vm0, %v976_v52 }
 0x55c   :  { %v5779_v53 = vpop.eup %5778 }
 0x55d   :  { %v970_v54 = vpop.xlane.xlu1 %969  ;;  %v977_v56 = vmul.f32 %v5779_v53, %v5771_v34 }
 0x55e   :  { %5780 = vrcp.f32 %v970_v54 }
 0x55f   :  { %5357 = vmatmul.msk.f32.gmra.mxu1 %vm83_vm0, %v977_v56 }
 0x564   :  { %v5781_v57 = vpop.eup %5780 }
 0x565   :  { %v978_v58 = vmul.f32 %v5781_v57, %v5773_v37  ;;  %v1341_v57 = vld [vmem:[%s8078_s0 + $0x2c0] sm:$0xff] }
 0x566   :  { %1369 = vmatpush.msrb.mxu1 %v1341_v57 }
 0x567   :  { %5358 = vmatmul.msk.f32.gmra.mxu1 %vm83_vm0, %v978_v58 }
 0x56f   :  { %5371 = vmatmul.msk.f32.vlgmr.msra.gmra.mxu1 %vm83_vm0, %v6273_v60 }
 0x577   :  { %5372 = vmatmul.msk.f32.gmra.mxu1 %vm83_vm0, %v6287_v2 }
 0x57f   :  { %5373 = vmatmul.msk.f32.gmra.mxu1 %vm83_vm0, %v6295_v7 }
 0x587   :  { %5374 = vmatmul.msk.f32.gmra.mxu1 %vm83_vm0, %v6303_v12 }
 0x5cc   :  { %v1008_v0 = vpop.f32.mrf.mxu1 }
 0x5cd   :  { %5359 = vmatmul.msk.f32.vlgmr.msrb.gmra.mxu2 %vm642_vm4, %v1008_v0 }
 0x5ce   :  { %1404 = vmatpush.msrb.mxu2 %v1390_v6 }
 0x5d0   :  { %1405 = vmatpush.msrb.mxu2 %v1389_v8 }
 0x5d2   :  { %1406 = vmatpush.msrb.mxu2 %v1388_v9 }
 0x5d4   :  { %v1011_v3 = vpop.f32.mrf.mxu1  ;;  %1407 = vmatpush.msrb.mxu2 %v1387_v10 }
 0x5d5   :  { %5360 = vmatmul.msk.f32.gmra.mxu2 %vm642_vm4, %v1011_v3 }
 0x5dc   :  { %v1014_v4 = vpop.f32.mrf.mxu1 }
 0x5dd   :  { %5361 = vmatmul.msk.f32.gmra.mxu2 %vm642_vm4, %v1014_v4 }
 0x5e4   :  { %v1017_v5 = vpop.f32.mrf.mxu1 }
 0x5e5   :  { %5362 = vmatmul.msk.f32.gmra.mxu2 %vm642_vm4, %v1017_v5 }
 0x5ec   :  { %v1158_v11 = vpop.f32.mrf.mxu1 }
 0x5ed   :  { %5375 = vmatmul.msk.f32.vlgmr.msra.gmra.mxu2 %vm83_vm0, %v6273_v60 }
 0x5f4   :  { %v1161_v13 = vpop.f32.mrf.mxu1 }
 0x5f5   :  { %5376 = vmatmul.msk.f32.gmra.mxu2 %vm83_vm0, %v6287_v2 }
 0x5fc   :  { %v1164_v14 = vpop.f32.mrf.mxu1 }
 0x5fd   :  { %5377 = vmatmul.msk.f32.gmra.mxu2 %vm83_vm0, %v6295_v7 }
 0x604   :  { %v1167_v15 = vpop.f32.mrf.mxu1 }
 0x605   :  { %5378 = vmatmul.msk.f32.gmra.mxu2 %vm83_vm0, %v6303_v12  ;;  %5379 = vmatpush.xpose.msk.msrb.mxu0 %vm642_vm4, %v1167_v15 }
 0x609   :  { %5380 = vmatpush.xpose.msk.msrb.mxu0 %vm642_vm4, %v1164_v14 }
 0x60d   :  { %5381 = vmatpush.xpose.msk.msrb.mxu0 %vm642_vm4, %v1161_v13  ;;  %5395 = vmatmul.msk.f32.vlgmr.msrb.gmra.mxu2 %vm83_vm0, %v6273_v60 }
 0x611   :  { %5382 = vmatpush.xpose.msk.msrb.mxu0 %vm642_vm4, %v1158_v11 }
 0x614   :  { %5383 = vmatmul.msk.f32.vlgmr.msrb.gmra.mxu0 %vm642_vm4, %v1126_v19 }
 0x615   :  { %1437 = vmatpush.msra.mxu0 %v1424_v18  ;;  %5396 = vmatmul.msk.f32.gmra.mxu2 %vm83_vm0, %v6287_v2 }
 0x617   :  { %1438 = vmatpush.msra.mxu0 %v1423_v20 }
 0x619   :  { %1439 = vmatpush.msra.mxu0 %v1422_v23 }
 0x61b   :  { %1440 = vmatpush.msra.mxu0 %v1421_v24 }
 0x61c   :  { %5384 = vmatmul.msk.f32.gmra.mxu0 %vm642_vm4, %v1129_v27 }
 0x61d   :  { %5397 = vmatmul.msk.f32.gmra.mxu2 %vm83_vm0, %v6295_v7 }
 0x624   :  { %5385 = vmatmul.msk.f32.gmra.mxu0 %vm642_vm4, %v1132_v31 }
 0x625   :  { %5398 = vmatmul.msk.f32.gmra.mxu2 %vm83_vm0, %v6303_v12 }
 0x62c   :  { %5386 = vmatmul.msk.f32.gmra.mxu0 %vm642_vm4, %v1135_v33  ;;  %v1457_v33 = vld [vmem:[%s8078_s0 + $0x320] sm:$0xff] }
 0x634   :  { %5399 = vmatmul.msk.f32.vlgmr.msra.gmra.mxu0 %vm83_vm0, %v6273_v60 }
 0x63c   :  { %5400 = vmatmul.msk.f32.gmra.mxu0 %vm83_vm0, %v6287_v2 }
 0x644   :  { %5401 = vmatmul.msk.f32.gmra.mxu0 %vm83_vm0, %v6295_v7 }
 0x64c   :  { %5402 = vmatmul.msk.f32.gmra.mxu0 %vm83_vm0, %v6303_v12 }
 0x650   :  { %v6545_v34 = vpop.f32.mrf.mxu2 }
 0x658   :  { %v6547_v35 = vpop.f32.mrf.mxu2 }
 0x660   :  { %v6549_v36 = vpop.f32.mrf.mxu2 }
 0x668   :  { %v6551_v37 = vpop.f32.mrf.mxu2 }
 0x670   :  { %v1191_v39 = vpop.f32.mrf.mxu2 }
 0x678   :  { %v1194_v41 = vpop.f32.mrf.mxu2 }
 0x680   :  { %v1197_v44 = vpop.f32.mrf.mxu2 }
 0x688   :  { %v1200_v45 = vpop.f32.mrf.mxu2 }
 0x689   :  { %1324 = vmatpush.msra.mxu3 %v1200_v45 }
 0x68b   :  { %1325 = vmatpush.msra.mxu3 %v1197_v44  ;;  %v1454_v44 = vld [vmem:[%s8078_s0 + $0x308] sm:$0xff] }
 0x68d   :  { %1326 = vmatpush.msra.mxu3 %v1194_v41  ;;  %v1455_v41 = vld [vmem:[%s8078_s0 + $0x310] sm:$0xff] }
 0x68f   :  { %1327 = vmatpush.msra.mxu3 %v1191_v39  ;;  %v1456_v39 = vld [vmem:[%s8078_s0 + $0x318] sm:$0xff] }
 0x691   :  { %v1244_v48 = vpop.f32.mrf.mxu0  ;;  %1470 = vmatpush.msrb.mxu3 %v1457_v33 }
 0x692   :  { %v1245_v49 = vadd.f32 %v1244_v48, %v6368_v43 }
 0x693   :  { %1471 = vmatpush.msrb.mxu3 %v1456_v39 }
 0x694   :  { %v1256_v50 = vsel %vm83_vm0, %v1245_v49, -inf }
 0x695   :  { %1257 = vmax.xlane.f32.xlu2 %v1256_v50  ;;  %1472 = vmatpush.msrb.mxu3 %v1455_v41 }
 0x697   :  { %1473 = vmatpush.msrb.mxu3 %v1454_v44 }
 0x699   :  { %v1247_v52 = vpop.f32.mrf.mxu0 }
 0x69a   :  { %v1248_v53 = vadd.f32 %v1247_v52, %v6375_v47 }
 0x69c   :  { %v1259_v54 = vsel %vm83_vm0, %v1248_v53, -inf }
 0x69d   :  { %1260 = vmax.xlane.f32.xlu0 %v1259_v54 }
 0x6a1   :  { %v1250_v56 = vpop.f32.mrf.mxu0 }
 0x6a2   :  { %v1251_v58 = vadd.f32 %v1250_v56, %v6382_v51 }
 0x6a4   :  { %v1262_v59 = vsel %vm83_vm0, %v1251_v58, -inf }
 0x6a5   :  { %1263 = vmax.xlane.f32.xlu1 %v1262_v59 }
 0x6a9   :  { %v1253_v61 = vpop.f32.mrf.mxu0 }
 0x6aa   :  { %v1254_v62 = vadd.f32 %v1253_v61, %v6389_v55 }
 0x6ac   :  { %v1265_v63 = vsel %vm83_vm0, %v1254_v62, -inf }
 0x6ad   :  { %1266 = vmax.xlane.f32.xlu2 %v1265_v63 }
 0x6b1   :  { %v1442_v0 = vpop.f32.mrf.mxu0 }
 0x6b9   :  { %v1445_v1 = vpop.f32.mrf.mxu0 }
 0x6c1   :  { %v1448_v3 = vpop.f32.mrf.mxu0 }
 0x6c9   :  { %v1451_v4 = vpop.f32.mrf.mxu0 }
 0x6ca   :  { %5407 = vmatpush.xpose.msk.msra.mxu1 %vm642_vm4, %v1451_v4 }
 0x6ce   :  { %5408 = vmatpush.xpose.msk.msra.mxu1 %vm642_vm4, %v1448_v3  ;;  %v1391_v3 = vperm.slane %v6332_v21, 3 }
 0x6d2   :  { %5409 = vmatpush.xpose.msk.msra.mxu1 %vm642_vm4, %v1445_v1 }
 0x6d6   :  { %5410 = vmatpush.xpose.msk.msra.mxu1 %vm642_vm4, %v1442_v0  ;;  %v1409_v0 = vpop.f32.mrf.mxu2 }
 0x6d7   :  { %v1410_v4 = vadd.f32 %v1409_v0, %v1391_v3 }
 0x708   :  { %v1258_v5 = vpop.xlane.xlu2 %1257 }
 0x709   :  { %v1268_v6 = vsub.f32 %v1245_v49, %v1258_v5  ;;  %v1412_v5 = vpop.f32.mrf.mxu2 }
 0x70b   :  { %v1272_v8 = vmul.f32 1.442695, %v1268_v6 }
 0x70d   :  { %5782 = vpow2.f32 %v1272_v8  ;;  %v1413_v8 = vadd.f32 %v1412_v5, %v1391_v3 }
 0x710   :  { %v1261_v9 = vpop.xlane.xlu0 %1260 }
 0x711   :  { %v1269_v10 = vsub.f32 %v1248_v53, %v1261_v9 }
 0x713   :  { %v5783_v11 = vpop.eup %5782  ;;  %v1274_v13 = vmul.f32 1.442695, %v1269_v10  ;;  %v1415_v10 = vpop.f32.mrf.mxu2 }
 0x714   :  { %v1280_v14 = vsel %vm83_vm0, %v5783_v11, 0.0 }
 0x715   :  { %5784 = vpow2.f32 %v1274_v13  ;;  %1281 = vadd.xlane.f32.xlu0 %v1280_v14 }
 0x718   :  { %v1264_v15 = vpop.xlane.xlu1 %1263 }
 0x719   :  { %v1270_v16 = vsub.f32 %v1251_v58, %v1264_v15 }
 0x71b   :  { %v5785_v17 = vpop.eup %5784  ;;  %v1276_v18 = vmul.f32 1.442695, %v1270_v16  ;;  %v1418_v14 = vpop.f32.mrf.mxu2 }
 0x71c   :  { %v1283_v19 = vsel %vm83_vm0, %v5785_v17, 0.0  ;;  %v1419_v15 = vadd.f32 %v1418_v14, %v1391_v3 }
 0x71d   :  { %5786 = vpow2.f32 %v1276_v18  ;;  %1284 = vadd.xlane.f32.xlu1 %v1283_v19 }
 0x720   :  { %v1267_v20 = vpop.xlane.xlu2 %1266 }
 0x721   :  { %v1271_v22 = vsub.f32 %v1254_v62, %v1267_v20 }
 0x723   :  { %v5787_v23 = vpop.eup %5786  ;;  %v1278_v24 = vmul.f32 1.442695, %v1271_v22 }
 0x724   :  { %v1286_v27 = vsel %vm83_vm0, %v5787_v23, 0.0 }
 0x725   :  { %5788 = vpow2.f32 %v1278_v24  ;;  %1287 = vadd.xlane.f32.xlu2 %v1286_v27 }
 0x72b   :  { %v5789_v29 = vpop.eup %5788 }
 0x72c   :  { %v1289_v31 = vsel %vm83_vm0, %v5789_v29, 0.0 }
 0x72d   :  { %1290 = vadd.xlane.f32.xlu0 %v1289_v31 }
 0x788   :  { %v1282_v32 = vpop.xlane.xlu0 %1281 }
 0x789   :  { %5790 = vrcp.f32 %v1282_v32 }
 0x78f   :  { %v5791_v45 = vpop.eup %5790 }
 0x790   :  { %v1296_v48 = vmul.f32 %v5791_v45, %v5783_v11  ;;  %v1285_v49 = vpop.xlane.xlu1 %1284  ;;  %v1416_v11 = vadd.f32 %v1415_v10, %v1391_v3 }
 0x791   :  { %5792 = vrcp.f32 %v1285_v49 }
 0x792   :  { %5387 = vmatmul.msk.f32.vlgmr.msra.gmra.mxu3 %vm83_vm0, %v1296_v48 }
 0x797   :  { %v5793_v50 = vpop.eup %5792 }
 0x798   :  { %v1288_v52 = vpop.xlane.xlu2 %1287  ;;  %v1297_v53 = vmul.f32 %v5793_v50, %v5785_v17 }
 0x799   :  { %5794 = vrcp.f32 %v1288_v52 }
 0x79a   :  { %5388 = vmatmul.msk.f32.gmra.mxu3 %vm83_vm0, %v1297_v53 }
 0x79f   :  { %v5795_v54 = vpop.eup %5794 }
 0x7a0   :  { %v1291_v56 = vpop.xlane.xlu0 %1290  ;;  %v1298_v57 = vmul.f32 %v5795_v54, %v5787_v23 }
 0x7a1   :  { %5796 = vrcp.f32 %v1291_v56 }
 0x7a2   :  { %5389 = vmatmul.msk.f32.gmra.mxu3 %vm83_vm0, %v1298_v57 }
 0x7a7   :  { %v5797_v58 = vpop.eup %5796 }
 0x7a8   :  { %v1299_v59 = vmul.f32 %v5797_v58, %v5789_v29 }
 0x7aa   :  { %5390 = vmatmul.msk.f32.gmra.mxu3 %vm83_vm0, %v1299_v59 }
 0x7b2   :  { %5403 = vmatmul.msk.f32.vlgmr.msrb.gmra.mxu3 %vm83_vm0, %v6273_v60 }
 0x7ba   :  { %5404 = vmatmul.msk.f32.gmra.mxu3 %vm83_vm0, %v6287_v2 }
 0x7c2   :  { %5405 = vmatmul.msk.f32.gmra.mxu3 %vm83_vm0, %v6295_v7 }
 0x7ca   :  { %5406 = vmatmul.msk.f32.gmra.mxu3 %vm83_vm0, %v6303_v12 }
 0x815   :  { %v1329_v61 = vpop.f32.mrf.mxu3 }
 0x816   :  { %5391 = vmatmul.msk.f32.vlgmr.msrb.gmra.mxu1 %vm642_vm4, %v1329_v61 }
 0x81d   :  { %v1332_v62 = vpop.f32.mrf.mxu3 }
 0x81e   :  { %5392 = vmatmul.msk.f32.gmra.mxu1 %vm642_vm4, %v1332_v62 }
 0x825   :  { %v1335_v63 = vpop.f32.mrf.mxu3 }
 0x826   :  { %5393 = vmatmul.msk.f32.gmra.mxu1 %vm642_vm4, %v1335_v63 }
 0x82d   :  { %v1338_v1 = vpop.f32.mrf.mxu3 }
 0x82e   :  { %5394 = vmatmul.msk.f32.gmra.mxu1 %vm642_vm4, %v1338_v1 }
 0x835   :  { %v1475_v6 = vpop.f32.mrf.mxu3 }
 0x836   :  { %5411 = vmatmul.msk.f32.vlgmr.msra.gmra.mxu1 %vm642_vm4, %v1410_v4  ;;  %v1625_v4 = vld [vmem:[%s8078_s0 + $0x328] sm:$0xff] }
 0x837   :  { %1653 = vmatpush.msrb.mxu0 %v1625_v4 }
 0x83d   :  { %v1478_v9 = vpop.f32.mrf.mxu3 }
 0x83e   :  { %5412 = vmatmul.msk.f32.gmra.mxu1 %vm642_vm4, %v1413_v8 }
 0x845   :  { %v1481_v13 = vpop.f32.mrf.mxu3 }
 0x846   :  { %5413 = vmatmul.msk.f32.gmra.mxu1 %vm642_vm4, %v1416_v11 }
 0x84d   :  { %v1484_v16 = vpop.f32.mrf.mxu3 }
 0x84e   :  { %5414 = vmatmul.msk.f32.gmra.mxu1 %vm642_vm4, %v1419_v15  ;;  %1608 = vmatpush.msra.mxu2 %v1484_v16 }
 0x850   :  { %1609 = vmatpush.msra.mxu2 %v1481_v13 }
 0x852   :  { %1610 = vmatpush.msra.mxu2 %v1478_v9 }
 0x854   :  { %1611 = vmatpush.msra.mxu2 %v1475_v6 }
 0x893   :  { %v6613_v21 = vpop.f32.mrf.mxu1 }
 0x89b   :  { %v6615_v17 = vpop.f32.mrf.mxu1 }
 0x8a3   :  { %v6617_v18 = vpop.f32.mrf.mxu1 }
 0x8ab   :  { %v6619_v19 = vpop.f32.mrf.mxu1 }
 0x8b3   :  { %v1528_v20 = vpop.f32.mrf.mxu1 }
 0x8b4   :  { %v1529_v22 = vadd.f32 %v1528_v20, %v6368_v43 }
 0x8b6   :  { %v1540_v23 = vsel %vm83_vm0, %v1529_v22, -inf }
 0x8b7   :  { %1541 = vmax.xlane.f32.xlu1 %v1540_v23 }
 0x8bb   :  { %v1531_v24 = vpop.f32.mrf.mxu1 }
 0x8bc   :  { %v1532_v27 = vadd.f32 %v1531_v24, %v6375_v47 }
 0x8be   :  { %v1543_v29 = vsel %vm83_vm0, %v1532_v27, -inf }
 0x8bf   :  { %1544 = vmax.xlane.f32.xlu2 %v1543_v29 }
 0x8c3   :  { %v1534_v31 = vpop.f32.mrf.mxu1 }
 0x8c4   :  { %v1535_v32 = vadd.f32 %v1534_v31, %v6382_v51 }
 0x8c6   :  { %v1546_v33 = vsel %vm83_vm0, %v1535_v32, -inf }
 0x8c7   :  { %1547 = vmax.xlane.f32.xlu0 %v1546_v33  ;;  %v1098_v33 = vadd.f32 %v6557_v42, %v6549_v36 }
 0x8cb   :  { %v1537_v39 = vpop.f32.mrf.mxu1 }
 0x8cc   :  { %v1538_v41 = vadd.f32 %v1537_v39, %v6389_v55  ;;  %v1095_v39 = vadd.f32 %v6555_v40, %v6547_v35  ;;  %v5744_v35 = vld [vmem:[%s8078_s0 + $0x338] ss:$0 sm:$0xff] }
 0x8ce   :  { %v1549_v43 = vsel %vm83_vm0, %v1538_v41, -inf }
 0x8cf   :  { %1550 = vmax.xlane.f32.xlu1 %v1549_v43  ;;  %v1385_v43 = vadd.f32 %v6617_v18, %v1098_v33 }
 0x92a   :  { %v1542_v44 = vpop.xlane.xlu1 %1541 }
 0x92b   :  { %v1552_v45 = vsub.f32 %v1529_v22, %v1542_v44  ;;  %v1092_v44 = vadd.f32 %v6553_v38, %v6545_v34  ;;  %v1725_v38 = vld [vmem:[%s8078_s0 + $0x6b8] sm:$0xff] }
 0x92c   :  { %1750 = vmatpush.msrb.mxu1 %v1725_v38 }
 0x92d   :  { %v1556_v48 = vmul.f32 1.442695, %v1552_v45  ;;  %v1384_v45 = vadd.f32 %v6615_v17, %v1095_v39  ;;  %v1928_v39 = vld [vmem:[%s8078_s0 + $0x6c8] sm:$0xff] }
 0x92f   :  { %5798 = vpow2.f32 %v1556_v48 }
 0x932   :  { %v1545_v47 = vpop.xlane.xlu2 %1544 }
 0x933   :  { %v1553_v49 = vsub.f32 %v1532_v27, %v1545_v47 }
 0x935   :  { %v5799_v50 = vpop.eup %5798  ;;  %v1558_v52 = vmul.f32 1.442695, %v1553_v49 }
 0x936   :  { %v1564_v53 = vsel %vm83_vm0, %v5799_v50, 0.0 }
 0x937   :  { %5800 = vpow2.f32 %v1558_v52  ;;  %1565 = vadd.xlane.f32.xlu2 %v1564_v53  ;;  %v1723_v52 = vld [vmem:[%s8078_s0 + $0x6a8] sm:$0xff] }
 0x93a   :  { %v1548_v51 = vpop.xlane.xlu0 %1547 }
 0x93b   :  { %v1554_v54 = vsub.f32 %v1535_v32, %v1548_v51  ;;  %v6675_v51 = vld [vmem:[%s8078_s0] sm:$0xff] }
 0x93d   :  { %v5801_v56 = vpop.eup %5800  ;;  %v1560_v57 = vmul.f32 1.442695, %v1554_v54  ;;  %v1722_v54 = vld [vmem:[%s8078_s0 + $0x6a0] sm:$0xff] }
 0x93e   :  { %v1567_v55 = vsel %vm83_vm0, %v5801_v56, 0.0 }
 0x93f   :  { %5802 = vpow2.f32 %v1560_v57  ;;  %1568 = vadd.xlane.f32.xlu0 %v1567_v55  ;;  %v5993_v57 = vld [vmem:[%s8077_s1 + $0x10] sm:$0xff]  ;;  %v5994_v55 = vld [vmem:[%s8077_s1 + $0x8] sm:$0xff] }
 0x942   :  { %v1551_v58 = vpop.xlane.xlu1 %1550 }
 0x943   :  { %v1555_v59 = vsub.f32 %v1538_v41, %v1551_v58  ;;  %v1101_v41 = vadd.f32 %v6559_v46, %v6551_v37  ;;  %v5995_v58 = vld [vmem:[%s8077_s1] sm:$0xff] }
 0x945   :  { %v5803_v61 = vpop.eup %5802  ;;  %v1562_v62 = vmul.f32 1.442695, %v1555_v59  ;;  %v1386_v48 = vadd.f32 %v6619_v19, %v1101_v41 }
 0x946   :  { %v1570_v63 = vsel %vm83_vm0, %v5803_v61, 0.0 }
 0x947   :  { %5804 = vpow2.f32 %v1562_v62  ;;  %1571 = vadd.xlane.f32.xlu1 %v1570_v63 }
 0x94d   :  { %v5805_v0 = vpop.eup %5804 }
 0x94e   :  { %v1573_v1 = vsel %vm83_vm0, %v5805_v0, 0.0 }
 0x94f   :  { %1574 = vadd.xlane.f32.xlu2 %v1573_v1 }
 0x9aa   :  { %v1566_v3 = vpop.xlane.xlu2 %1565 }
 0x9ab   :  { %5806 = vrcp.f32 %v1566_v3 }
 0x9b1   :  { %v5807_v5 = vpop.eup %5806 }
 0x9b2   :  { %v1580_v6 = vmul.f32 %v5807_v5, %v5799_v50  ;;  %v1569_v8 = vpop.xlane.xlu0 %1568  ;;  %v1383_v50 = vadd.f32 %v6613_v21, %v1092_v44  ;;  %v1724_v21 = vld [vmem:[%s8078_s0 + $0x6b0] sm:$0xff] }
 0x9b3   :  { %5808 = vrcp.f32 %v1569_v8  ;;  %1751 = vmatpush.msrb.mxu1 %v1724_v21 }
 0x9b4   :  { %5415 = vmatmul.msk.f32.vlgmr.msra.gmra.mxu2 %vm83_vm0, %v1580_v6 }
 0x9b5   :  { %1752 = vmatpush.msrb.mxu1 %v1723_v52 }
 0x9b7   :  { %1753 = vmatpush.msrb.mxu1 %v1722_v54 }
 0x9b9   :  { %v5809_v9 = vpop.eup %5808 }
 0x9ba   :  { %v1572_v10 = vpop.xlane.xlu1 %1571  ;;  %v1581_v11 = vmul.f32 %v5809_v9, %v5801_v56  ;;  %v5992_v56 = vld [vmem:[%s8077_s1 + $0x18] sm:$0xff] }
 0x9bb   :  { %5810 = vrcp.f32 %v1572_v10  ;;  %2211 = vmatpush.msra.mxu1 %v5992_v56 }
 0x9bc   :  { %5416 = vmatmul.msk.f32.gmra.mxu2 %vm83_vm0, %v1581_v11 }
 0x9bd   :  { %2212 = vmatpush.msra.mxu1 %v5993_v57 }
 0x9bf   :  { %2213 = vmatpush.msra.mxu1 %v5994_v55 }
 0x9c1   :  { %v5811_v13 = vpop.eup %5810  ;;  %2214 = vmatpush.msra.mxu1 %v5995_v58 }
 0x9c2   :  { %v1575_v14 = vpop.xlane.xlu2 %1574  ;;  %v1582_v15 = vmul.f32 %v5811_v13, %v5803_v61 }
 0x9c3   :  { %5812 = vrcp.f32 %v1575_v14 }
 0x9c4   :  { %5417 = vmatmul.msk.f32.gmra.mxu2 %vm83_vm0, %v1582_v15 }
 0x9c9   :  { %v5813_v16 = vpop.eup %5812 }
 0x9ca   :  { %v1583_v20 = vmul.f32 %v5813_v16, %v5805_v0 }
 0x9cc   :  { %5418 = vmatmul.msk.f32.gmra.mxu2 %vm83_vm0, %v1583_v20 }
 0xa37   :  { %v1613_v22 = vpop.f32.mrf.mxu2 }
 0xa38   :  { %5419 = vmatmul.msk.f32.vlgmr.msrb.gmra.mxu0 %vm642_vm4, %v1613_v22  ;;  %v1930_v22 = vld [vmem:[%s8078_s0 + $0x6d8] sm:$0xff] }
 0xa39   :  { %1955 = vmatpush.msrb.mxu2 %v1930_v22 }
 0xa3f   :  { %v1616_v23 = vpop.f32.mrf.mxu2 }
 0xa40   :  { %5420 = vmatmul.msk.f32.gmra.mxu0 %vm642_vm4, %v1616_v23 }
 0xa47   :  { %v1619_v24 = vpop.f32.mrf.mxu2 }
 0xa48   :  { %5421 = vmatmul.msk.f32.gmra.mxu0 %vm642_vm4, %v1619_v24 }
 0xa4f   :  { %v1622_v27 = vpop.f32.mrf.mxu2 }
 0xa50   :  { %5422 = vmatmul.msk.f32.gmra.mxu0 %vm642_vm4, %v1622_v27 }
 0xab5   :  { %v1655_v29 = vpop.f32.mrf.mxu0 }
 0xab6   :  { %v1667_v37 = vadd.f32 %v1655_v29, %v1383_v50 }
 0xab8   :  { %v1673_v17 = vadd.f32 %v5744_v35, %v1667_v37 }
 0xaba   :  { %v1677_v53 = vadd.f32 %v1673_v17, %v6273_v60  ;;  %v6689_v60 = vld [vmem:[%s8078_s0 + $0x10] sm:$0xff] }
 0xabd   :  { %v1658_v31 = vpop.f32.mrf.mxu0 }
 0xabe   :  { %v1668_v36 = vadd.f32 %v1658_v31, %v1384_v45  ;;  %v1929_v31 = vld [vmem:[%s8078_s0 + $0x6d0] sm:$0xff] }
 0xabf   :  { %1956 = vmatpush.msrb.mxu2 %v1929_v31 }
 0xac0   :  { %v1674_v18 = vadd.f32 %v5744_v35, %v1668_v36 }
 0xac1   :  { %1957 = vmatpush.msrb.mxu2 %v1928_v39 }
 0xac5   :  { %v1661_v32 = vpop.f32.mrf.mxu0 }
 0xac6   :  { %v1669_v47 = vadd.f32 %v1661_v32, %v1385_v43 }
 0xac8   :  { %v1675_v42 = vadd.f32 %v5744_v35, %v1669_v47 }
 0xaca   :  { %v1679_v19 = vadd.f32 %v1675_v42, %v6295_v7  ;;  %v6682_v7 = vld [vmem:[%s8078_s0 + $0x8] sm:$0xff] }
 0xacd   :  { %v1664_v49 = vpop.f32.mrf.mxu0 }
 0xace   :  { %v1670_v40 = vadd.f32 %v1664_v49, %v1386_v48  ;;  %v1927_v49 = vld [vmem:[%s8078_s0 + $0x6c0] sm:$0xff] }
 0xacf   :  { %1958 = vmatpush.msrb.mxu2 %v1927_v49 }
 0xad0   :  { %v1676_v46 = vadd.f32 %v5744_v35, %v1670_v40 }
 0xad2   :  { %v1680_v34 = vadd.f32 %v1676_v46, %v6303_v12  ;;  %v1678_v12 = vadd.f32 %v1674_v18, %v6287_v2  ;;  %v6696_v2 = vld [vmem:[%s8078_s0 + $0x18] sm:$0xff] }
 0xad4   :  { %1705 = vmatpush.msra.mxu3 %v1680_v34 }
 0xad6   :  { %1706 = vmatpush.msra.mxu3 %v1679_v19 }
 0xad8   :  { %1707 = vmatpush.msra.mxu3 %v1678_v12 }
 0xada   :  { %1708 = vmatpush.msra.mxu3 %v1677_v53 }
 0xadb   :  { %5423 = vmatmul.msk.f32.vlgmr.msra.gmra.mxu3 %vm83_vm0, %v6675_v51 }
 0xae3   :  { %5424 = vmatmul.msk.f32.gmra.mxu3 %vm83_vm0, %v6682_v7 }
 0xaeb   :  { %5425 = vmatmul.msk.f32.gmra.mxu3 %vm83_vm0, %v6689_v60 }
 0xaf3   :  { %5426 = vmatmul.msk.f32.gmra.mxu3 %vm83_vm0, %v6696_v2 }
 0xb5e   :  { %v6715_v59 = vpop.f32.mrf.mxu3 }
 0xb5f   :  { %5427 = vmatmul.msk.f32.vlgmr.msrb.gmra.mxu1 %vm83_vm0, %v6715_v59 }
 0xb66   :  { %v6719_v61 = vpop.f32.mrf.mxu3 }
 0xb67   :  { %5428 = vmatmul.msk.f32.gmra.mxu1 %vm83_vm0, %v6719_v61 }
 0xb6e   :  { %v6723_v62 = vpop.f32.mrf.mxu3 }
 0xb6f   :  { %5429 = vmatmul.msk.f32.gmra.mxu1 %vm83_vm0, %v6723_v62 }
 0xb76   :  { %v6727_v63 = vpop.f32.mrf.mxu3 }
 0xb77   :  { %5430 = vmatmul.msk.f32.gmra.mxu1 %vm83_vm0, %v6727_v63 }
 0xbdc   :  { %v6731_v0 = vpop.f32.mrf.mxu1 }
 0xbdd   :  { %v6734_v1 = vmul.f32 0.70710677, %v6731_v0 }
 0xbdf   :  { %v1775_v3 = vand.u32 2147483647, %v6734_v1 }
 0xbe1   :  { %v1779_v4 = vmul.f32 0.3275911, %v1775_v3  ;;  %v1883_v48 = vsub.f32 0.0, %v1775_v3 }
 0xbe3   :  { %v1783_v5 = vadd.f32 1.0, %v1779_v4  ;;  %v1887_v46 = vmul.f32 %v1883_v48, %v1775_v3 }
 0xbe4   :  { %v6737_v6 = vpop.f32.mrf.mxu1 }
 0xbe5   :  { %5814 = vrcp.f32 %v1783_v5  ;;  %v6740_v8 = vmul.f32 0.70710677, %v6737_v6  ;;  %v1798_v23 = vand.u32 2147483648, %v1783_v5  ;;  %v1796_v29 = vand.u32 2147483647, %v1783_v5 }
 0xbe6   :  { %vm1792_vm6 = vweird.f32 %v1783_v5  ;;  %v1891_v55 = vmul.f32 1.442695, %v1887_v46 }
 0xbe7   :  { %v6743_v9 = vand.u32 2147483647, %v6740_v8  ;;  %v1799_v41 = vor.u32 1.1754944e-38, %v1798_v23  ;;  %vm1797_vm8 = vcmp.eq.f32.partialorder %v1796_v29, 8.507059e+37 }
 0xbe9   :  { %v1780_v10 = vmul.f32 0.3275911, %v6743_v9  ;;  %v1884_v12 = vsub.f32 0.0, %v6743_v9 }
 0xbeb   :  { %v5815_v11 = vpop.eup %5814  ;;  %v1784_v14 = vadd.f32 1.0, %v1780_v10 }
 0xbec   :  { %v1788_v13 = vmul.f32 %v5815_v11, %v1783_v5  ;;  %v6746_v15 = vpop.f32.mrf.mxu1  ;;  %vm1793_vm5 = vweird.f32 %v5815_v11 }
 0xbed   :  { %v6749_v16 = vmul.f32 0.70710677, %v6746_v15  ;;  %5816 = vrcp.f32 %v1784_v14  ;;  %vm1794_vm7 = vmor %vm1792_vm6, %vm1793_vm5  ;;  %v1813_v18 = vand.u32 2147483648, %v1784_v14  ;;  %v1811_v38 = vand.u32 2147483647, %v1784_v14 }
 0xbee   :  { %v1789_v20 = vsub.f32 1.0, %v1788_v13  ;;  %vm1807_vm10 = vweird.f32 %v1784_v14  ;;  %v1888_v13 = vmul.f32 %v1884_v12, %v6743_v9 }
 0xbef   :  { %v6755_v24 = vand.u32 2147483647, %v6749_v16  ;;  %v1814_v56 = vor.u32 1.1754944e-38, %v1813_v18  ;;  %vm1812_vm12 = vcmp.eq.f32.partialorder %v1811_v38, 8.507059e+37 }
 0xbf0   :  { %v1790_v27 = vmul.f32 %v5815_v11, %v1789_v20 }
 0xbf1   :  { %v1781_v32 = vmul.f32 0.3275911, %v6755_v24  ;;  %v1885_v49 = vsub.f32 0.0, %v6755_v24 }
 0xbf2   :  { %v1791_v33 = vadd.f32 %v5815_v11, %v1790_v27 }
 0xbf3   :  { %v1785_v43 = vadd.f32 1.0, %v1781_v32  ;;  %v5817_v44 = vpop.eup %5816 }
 0xbf4   :  { %v1795_v45 = vsel %vm1794_vm7, %v5815_v11, %v1791_v33  ;;  %v6764_v47 = vpop.f32.mrf.mxu1  ;;  %v1803_v35 = vmul.f32 %v5817_v44, %v1784_v14  ;;  %vm1808_vm9 = vweird.f32 %v5817_v44  ;;  %vm1907_vm7 = vcmp.ge.f32.partialorder %v6734_v1, 0.0 }
 0xbf5   :  { %v1800_v50 = vsel %vm1797_vm8, %v1799_v41, %v1795_v45  ;;  %5818 = vrcp.f32 %v1785_v43  ;;  %v6770_v37 = vmul.f32 0.70710677, %v6764_v47  ;;  %vm1809_vm11 = vmor %vm1807_vm10, %vm1808_vm9  ;;  %v1828_v20 = vand.u32 2147483648, %v1785_v43 }
 0xbf6   :  { %v1847_v36 = vmul.f32 1.0614054, %v1800_v50  ;;  %v1804_v40 = vsub.f32 1.0, %v1803_v35  ;;  %v1826_v23 = vand.u32 2147483647, %v1785_v43  ;;  %vm1822_vm14 = vweird.f32 %v1785_v43 }
 0xbf7   :  { %v6773_v21 = vand.u32 2147483647, %v6770_v37  ;;  %v1829_v33 = vor.u32 1.1754944e-38, %v1828_v20  ;;  %v1893_v41 = vmul.f32 1.442695, %v1888_v13  ;;  %vm1908_vm10 = vcmp.ge.f32.partialorder %v6740_v8, 0.0 }
 0xbf8   :  { %v5431_v42 = vadd.f32 -1.4531521, %v1847_v36  ;;  %v1805_v34 = vmul.f32 %v5817_v44, %v1804_v40  ;;  %vm1827_vm3 = vcmp.eq.f32.partialorder %v1826_v23, 8.507059e+37 }
 0xbf9   :  { %v1782_v53 = vmul.f32 0.3275911, %v6773_v21 }
 0xbfa   :  { %v1855_v17 = vmul.f32 %v5431_v42, %v1800_v50  ;;  %v1806_v52 = vadd.f32 %v5817_v44, %v1805_v34 }
 0xbfb   :  { %v5819_v19 = vpop.eup %5818  ;;  %v1786_v3 = vadd.f32 1.0, %v1782_v53 }
 0xbfc   :  { %v1859_v54 = vadd.f32 1.4214138, %v1855_v17  ;;  %v1818_v57 = vmul.f32 %v5819_v19, %v1785_v43  ;;  %v1810_v58 = vsel %vm1809_vm11, %v5817_v44, %v1806_v52  ;;  %vm1823_vm13 = vweird.f32 %v5819_v19 }
 0xbfd   :  { %v1815_v5 = vsel %vm1812_vm12, %v1814_v56, %v1810_v58  ;;  %5820 = vrcp.f32 %v1786_v3  ;;  %vm1824_vm15 = vmor %vm1822_vm14, %vm1823_vm13  ;;  %v1889_v17 = vmul.f32 %v1885_v49, %v6755_v24  ;;  %v1841_v52 = vand.u32 2147483647, %v1786_v3 }
 0xbfe   :  { %v1863_v4 = vmul.f32 %v1859_v54, %v1800_v50  ;;  %v1819_v10 = vsub.f32 1.0, %v1818_v57  ;;  %v1848_v11 = vmul.f32 1.0614054, %v1815_v5  ;;  %5822 = vpow2.f32 %v1891_v55 }
 0xbff   :  { %5824 = vpow2.f32 %v1893_v41  ;;  %v1767_v56 = vmul.f32 0.5, %v6731_v0  ;;  %vm1837_vm6 = vweird.f32 %v1786_v3  ;;  %vm1842_vm9 = vcmp.eq.f32.partialorder %v1841_v52, 8.507059e+37 }
 0xc00   :  { %v5435_v14 = vadd.f32 -0.28449672, %v1863_v4  ;;  %v1820_v22 = vmul.f32 %v5819_v19, %v1819_v10  ;;  %v5432_v27 = vadd.f32 -1.4531521, %v1848_v11  ;;  %v1895_v10 = vmul.f32 1.442695, %v1889_v17 }
 0xc01   :  { %v1886_v0 = vsub.f32 0.0, %v6773_v21  ;;  %vm1909_vm11 = vcmp.ge.f32.partialorder %v6749_v16, 0.0  ;;  %vm1910_vm12 = vcmp.ge.f32.partialorder %v6770_v37, 0.0 }
 0xc02   :  { %v1871_v29 = vmul.f32 %v5435_v14, %v1800_v50  ;;  %v1821_v31 = vadd.f32 %v5819_v19, %v1820_v22  ;;  %v1856_v32 = vmul.f32 %v5432_v27, %v1815_v5  ;;  %5826 = vpow2.f32 %v1895_v10 }
 0xc03   :  { %v5821_v45 = vpop.eup %5820  ;;  %v1890_v41 = vmul.f32 %v1886_v0, %v6773_v21  ;;  %v6009_v0 = vmov 32.0  }
 0xc04   :  { %v1875_v39 = vadd.f32 0.2548296, %v1871_v29  ;;  %v1825_v44 = vsel %vm1824_vm15, %v5819_v19, %v1821_v31  ;;  %v1860_v9 = vadd.f32 1.4214138, %v1856_v32  ;;  %v1833_v40 = vmul.f32 %v5821_v45, %v1786_v3  ;;  %v5823_v42 = vpop.eup %5822 }
 0xc05   :  { %v1830_v48 = vsel %vm1827_vm3, %v1829_v33, %v1825_v44  ;;  %v1843_v19 = vand.u32 2147483648, %v1786_v3  ;;  %vm1838_vm5 = vweird.f32 %v5821_v45  ;;  %v5825_v24 = vpop.eup %5824 }
 0xc06   :  { %v1879_v35 = vmul.f32 %v1875_v39, %v1800_v50  ;;  %v1849_v36 = vmul.f32 1.0614054, %v1830_v48  ;;  %v1864_v46 = vmul.f32 %v1860_v9, %v1815_v5  ;;  %v1834_v34 = vsub.f32 1.0, %v1833_v40  ;;  %vm1839_vm8 = vmor %vm1837_vm6, %vm1838_vm5 }
 0xc07   :  { %v1844_v11 = vor.u32 1.1754944e-38, %v1843_v19  ;;  %v1897_v40 = vmul.f32 1.442695, %v1890_v41  ;;  %v1769_v19 = vmul.f32 0.5, %v6746_v15  ;;  %v2157_v41 = vld [vmem:[%s8078_s0 + $0x120] sm:$0xff] }
 0xc08   :  { %v1899_v18 = vmul.f32 %v5823_v42, %v1879_v35  ;;  %v5433_v43 = vadd.f32 -1.4531521, %v1849_v36  ;;  %v5436_v38 = vadd.f32 -0.28449672, %v1864_v46  ;;  %v1835_v54 = vmul.f32 %v5821_v45, %v1834_v34  ;;  %v5827_v35 = vpop.eup %5826 }
 0xc09   :  { %v1768_v42 = vmul.f32 0.5, %v6737_v6  ;;  %5828 = vpow2.f32 %v1897_v40 }
 0xc0a   :  { %v1903_v12 = vsub.f32 1.0, %v1899_v18  ;;  %v1857_v53 = vmul.f32 %v5433_v43, %v1830_v48  ;;  %v1872_v50 = vmul.f32 %v5436_v38, %v1815_v5  ;;  %v1836_v58 = vadd.f32 %v5821_v45, %v1835_v54 }
 0xc0b   :  { %5830 = vrcp.f32 %v6009_v0 }
 0xc0c   :  { %v1911_v57 = vsub.f32 0.0, %v1903_v12  ;;  %v1861_v55 = vadd.f32 1.4214138, %v1857_v53  ;;  %v1876_v4 = vadd.f32 0.2548296, %v1872_v50  ;;  %v1840_v14 = vsel %vm1839_vm8, %v5821_v45, %v1836_v58 }
 0xc0d   :  { %v1845_v27 = vsel %vm1842_vm9, %v1844_v11, %v1840_v14  ;;  %v1770_v58 = vmul.f32 0.5, %v6764_v47 }
 0xc0e   :  { %v1915_v13 = vsel %vm1907_vm7, %v1903_v12, %v1911_v57  ;;  %v1865_v20 = vmul.f32 %v1861_v55, %v1830_v48  ;;  %v1880_v23 = vmul.f32 %v1876_v4, %v1815_v5  ;;  %v1850_v31 = vmul.f32 1.0614054, %v1845_v27 }
 0xc0f   :  { %v1919_v22 = vadd.f32 1.0, %v1915_v13  ;;  %v5829_v6 = vpop.eup %5828 }
 0xc10   :  { %v5437_v29 = vadd.f32 -0.28449672, %v1865_v20  ;;  %v1900_v3 = vmul.f32 %v5825_v24, %v1880_v23  ;;  %v5434_v33 = vadd.f32 -1.4531521, %v1850_v31  ;;  %v2155_v31 = vld [vmem:[%s8078_s0 + $0x110] sm:$0xff] }
 0xc11   :  { %v1923_v32 = vmul.f32 %v1919_v22, %v1767_v56 }
 0xc12   :  { %v1873_v1 = vmul.f32 %v5437_v29, %v1830_v48  ;;  %v1904_v39 = vsub.f32 1.0, %v1900_v3  ;;  %v1858_v45 = vmul.f32 %v5434_v33, %v1845_v27  ;;  %v5831_v29 = vpop.eup %5830 }
 0xc13   :  { %5439 = vmatmul.msk.f32.vlgmr.msrb.gmra.mxu2 %vm83_vm0, %v1923_v32  ;;  %v2019_v32 = vmul.f32 32.0, %v5831_v29  ;;  %vm2023_vm13 = vweird.f32 %v5831_v29 }
 0xc14   :  { %v1877_v44 = vadd.f32 0.2548296, %v1873_v1  ;;  %v1912_v9 = vsub.f32 0.0, %v1904_v39  ;;  %v1862_v49 = vadd.f32 1.4214138, %v1858_v45  ;;  %v2156_v1 = vld [vmem:[%s8078_s0 + $0x118] sm:$0xff] }
 0xc15   :  { %v2020_v3 = vsub.f32 1.0, %v2019_v32 }
 0xc16   :  { %v1881_v5 = vmul.f32 %v1877_v44, %v1830_v48  ;;  %v1916_v36 = vsel %vm1908_vm10, %v1904_v39, %v1912_v9  ;;  %v1866_v43 = vmul.f32 %v1862_v49, %v1845_v27 }
 0xc17   :  { %v1920_v46 = vadd.f32 1.0, %v1916_v36  ;;  %v2021_v33 = vmul.f32 %v5831_v29, %v2020_v3 }
 0xc18   :  { %v1901_v18 = vmul.f32 %v5827_v35, %v1881_v5  ;;  %v5438_v21 = vadd.f32 -0.28449672, %v1866_v43  ;;  %v2158_v5 = vld [vmem:[%s8078_s0 + $0x128] sm:$0xff] }
 0xc19   :  { %v1924_v34 = vmul.f32 %v1920_v46, %v1768_v42  ;;  %v2022_v39 = vadd.f32 %v5831_v29, %v2021_v33  ;;  %v2159_v46 = vld [vmem:[%s8078_s0 + $0x130] sm:$0xff] }
 0xc1a   :  { %v1905_v38 = vsub.f32 1.0, %v1901_v18  ;;  %v1874_v52 = vmul.f32 %v5438_v21, %v1845_v27 }
 0xc1b   :  { %5440 = vmatmul.msk.f32.gmra.mxu2 %vm83_vm0, %v1924_v34  ;;  %v6838_v44 = vsel %vm2023_vm13, %v5831_v29, %v2022_v39 }
 0xc1c   :  { %v1913_v17 = vsub.f32 0.0, %v1905_v38  ;;  %v1878_v48 = vadd.f32 0.2548296, %v1874_v52 }
 0xc1e   :  { %v1917_v8 = vsel %vm1909_vm11, %v1905_v38, %v1913_v17  ;;  %v1882_v53 = vmul.f32 %v1878_v48, %v1845_v27  ;;  %v2154_v27 = vld [vmem:[%s8078_s0 + $0x108] sm:$0xff]  ;;  %v2160_v17 = vld [vmem:[%s8078_s0 + $0x138] sm:$0xff] }
 0xc1f   :  { %v1921_v12 = vadd.f32 1.0, %v1917_v8 }
 0xc20   :  { %v1902_v56 = vmul.f32 %v5829_v6, %v1882_v53  ;;  %v2161_v53 = vld [vmem:[%s8078_s0 + $0x140] sm:$0xff] }
 0xc21   :  { %v1925_v54 = vmul.f32 %v1921_v12, %v1769_v19 }
 0xc22   :  { %v1906_v50 = vsub.f32 1.0, %v1902_v56 }
 0xc23   :  { %5441 = vmatmul.msk.f32.gmra.mxu2 %vm83_vm0, %v1925_v54 }
 0xc24   :  { %v1914_v57 = vsub.f32 0.0, %v1906_v50 }
 0xc26   :  { %v1918_v55 = vsel %vm1910_vm12, %v1906_v50, %v1914_v57  ;;  %v2162_v50 = vld [vmem:[%s8078_s0 + $0x148] sm:$0xff] }
 0xc27   :  { %v1922_v4 = vadd.f32 1.0, %v1918_v55 }
 0xc29   :  { %v1926_v16 = vmul.f32 %v1922_v4, %v1770_v58 }
 0xc2b   :  { %5442 = vmatmul.msk.f32.gmra.mxu2 %vm83_vm0, %v1926_v16  ;;  %v2253_v16 = vld [vmem:[%s8078_s0 + $0x178] sm:$0xf] }
 0xc2c   :  { %5463 = vmatpush.msk.msra.mxu2 %vm354_vm1, %v2253_v16  ;;  %v19_v16 = vld [vmem:[%s8077_s1 + $0x40] sm:$0xff] }
 0xc96   :  { %v1960_v10 = vpop.f32.mrf.mxu2 }
 0xc97   :  { %v1972_v37 = vadd.f32 %v1960_v10, %v6715_v59 }
 0xc9e   :  { %v1963_v15 = vpop.f32.mrf.mxu2 }
 0xc9f   :  { %v1973_v14 = vadd.f32 %v1963_v15, %v6719_v61  ;;  %v2151_v61 = vld [vmem:[%s8078_s0 + $0xf0] sm:$0xff] }
 0xca0   :  { %5451 = vmatmul.msk.f32.vlgmr.msra.gmra.mxu1 %vm83_vm0, %v2151_v61  ;;  %v2252_v15 = vld [vmem:[%s8078_s0 + $0x170] sm:$0xf] }
 0xca6   :  { %v1966_v11 = vpop.f32.mrf.mxu2 }
 0xca7   :  { %v1974_v20 = vadd.f32 %v1966_v11, %v6723_v62 }
 0xcae   :  { %v1969_v24 = vpop.f32.mrf.mxu2 }
 0xcaf   :  { %v1975_v13 = vadd.f32 %v1969_v24, %v6727_v63 }
 0xcb1   :  { %1988 = vmatpush.msra.mxu0 %v1975_v13 }
 0xcb3   :  { %1989 = vmatpush.msra.mxu0 %v1974_v20 }
 0xcb5   :  { %1990 = vmatpush.msra.mxu0 %v1973_v14 }
 0xcb7   :  { %1991 = vmatpush.msra.mxu0 %v1972_v37 }
 0xcb8   :  { %5443 = vmatmul.msk.f32.vlgmr.msra.gmra.mxu0 %vm83_vm0, %v6675_v51  ;;  %v2152_v51 = vld [vmem:[%s8078_s0 + $0xf8] sm:$0xff] }
 0xcb9   :  { %5452 = vmatmul.msk.f32.gmra.mxu1 %vm83_vm0, %v2152_v51  ;;  %5468 = vmatpush.msk.msrb.mxu0 %vm354_vm1, %v2252_v15  ;;  %v2108_v15 = vld [vmem:[%s8078_s0 + $0x30] sm:$0xff] }
 0xcc0   :  { %5444 = vmatmul.msk.f32.gmra.mxu0 %vm83_vm0, %v6682_v7 }
 0xcc8   :  { %5445 = vmatmul.msk.f32.gmra.mxu0 %vm83_vm0, %v6689_v60 }
 0xcd0   :  { %5446 = vmatmul.msk.f32.gmra.mxu0 %vm83_vm0, %v6696_v2  ;;  %v2153_v2 = vld [vmem:[%s8078_s0 + $0x100] sm:$0xff] }
 0xcd1   :  { %5453 = vmatmul.msk.f32.gmra.mxu1 %vm83_vm0, %v2153_v2 }
 0xcd9   :  { %5454 = vmatmul.msk.f32.gmra.mxu1 %vm83_vm0, %v2154_v27 }
 0xce1   :  { %5455 = vmatmul.msk.f32.gmra.mxu1 %vm83_vm0, %v2155_v31 }
 0xce9   :  { %5456 = vmatmul.msk.f32.gmra.mxu1 %vm83_vm0, %v2156_v1 }
 0xcf1   :  { %5457 = vmatmul.msk.f32.gmra.mxu1 %vm83_vm0, %v2157_v41 }
 0xcf9   :  { %5458 = vmatmul.msk.f32.gmra.mxu1 %vm83_vm0, %v2158_v5 }
 0xd01   :  { %5459 = vmatmul.msk.f32.gmra.mxu1 %vm83_vm0, %v2159_v46 }
 0xd09   :  { %5460 = vmatmul.msk.f32.gmra.mxu1 %vm83_vm0, %v2160_v17 }
 0xd11   :  { %5461 = vmatmul.msk.f32.gmra.mxu1 %vm83_vm0, %v2161_v53 }
 0xd19   :  { %5462 = vmatmul.msk.f32.gmra.mxu1 %vm83_vm0, %v2162_v50 }
 0xd1d   :  { %v2216_v57 = vpop.f32.mrf.mxu1 }
 0xd1e   :  { %5469 = vmatmul.msk.f32.vlgmr.msrb.gmra.mxu0 %vm341_vm2, %v2216_v57 }
 0xd35   :  { %v1993_v62 = vpop.f32.mrf.mxu0 }
 0xd36   :  { %v2006_v23 = vsel %vm83_vm0, %v1993_v62, 0.0  ;;  %v2219_v55 = vpop.f32.mrf.mxu1 }
 0xd37   :  { %5470 = vmatmul.msk.f32.gmra.mxu0 %vm341_vm2, %v2219_v55 }
 0xd3d   :  { %v1996_v59 = vpop.f32.mrf.mxu0 }
 0xd3e   :  { %v2009_v7 = vsel %vm83_vm0, %v1996_v59, 0.0 }
 0xd3f   :  { %2010 = vadd.xlane.f32.xlu2 %v2009_v7 }
 0xd45   :  { %v1999_v60 = vpop.f32.mrf.mxu0 }
 0xd46   :  { %v2012_v63 = vsel %vm83_vm0, %v1999_v60, 0.0 }
 0xd47   :  { %2013 = vadd.xlane.f32.xlu1 %v2012_v63 }
 0xd4d   :  { %v2002_v47 = vpop.f32.mrf.mxu0 }
 0xd4e   :  { %v2015_v22 = vsel %vm83_vm0, %v2002_v47, 0.0  ;;  %v2222_v58 = vpop.f32.mrf.mxu1 }
 0xd4f   :  { %2016 = vadd.xlane.f32.xlu0 %v2015_v22  ;;  %5471 = vmatmul.msk.f32.gmra.mxu0 %vm341_vm2, %v2222_v58  ;;  %v2106_v58 = vld [vmem:[%s8078_s0 + $0x20] sm:$0xff] }
 0xd56   :  { %v2225_v4 = vpop.f32.mrf.mxu1 }
 0xd57   :  { %2007 = vadd.xlane.f32.xlu0 %v2006_v23  ;;  %5472 = vmatmul.msk.f32.gmra.mxu0 %vm341_vm2, %v2225_v4  ;;  %v2342_v4 = vld [vmem:[%s8078_s0 + $0x180] sm:$0xf] }
 0xd5e   :  { %v2228_v10 = vpop.f32.mrf.mxu1 }
 0xd5f   :  { %5464 = vmatmul.msk.f32.vlgmr.msra.gmra.mxu2 %vm341_vm2, %v2228_v10  ;;  %v20_v10 = vld [vmem:[%s8077_s1 + $0x48] sm:$0xff] }
 0xd66   :  { %v2231_v11 = vpop.f32.mrf.mxu1 }
 0xd67   :  { %5465 = vmatmul.msk.f32.gmra.mxu2 %vm341_vm2, %v2231_v11  ;;  %v21_v11 = vld [vmem:[%s8077_s1 + $0x50] sm:$0xff] }
 0xd6e   :  { %v2234_v24 = vpop.f32.mrf.mxu1 }
 0xd6f   :  { %5466 = vmatmul.msk.f32.gmra.mxu2 %vm341_vm2, %v2234_v24  ;;  %v2109_v24 = vld [vmem:[%s8078_s0 + $0x38] sm:$0xff] }
 0xd76   :  { %v2237_v37 = vpop.f32.mrf.mxu1 }
 0xd77   :  { %5467 = vmatmul.msk.f32.gmra.mxu2 %vm341_vm2, %v2237_v37 }
 0xdb2   :  { %v2011_v45 = vpop.xlane.xlu2 %2010 }
 0xdb3   :  { %v2026_v9 = vmul.f32 %v6838_v44, %v2011_v45 }
 0xdb5   :  { %v6844_v49 = vsub.f32 %v1996_v59, %v2026_v9 }
 0xdb7   :  { %v2034_v35 = vmul.f32 %v6844_v49, %v6844_v49 }
 0xdb9   :  { %v2040_v36 = vsel %vm83_vm0, %v2034_v35, 0.0 }
 0xdba   :  { %v2014_v40 = vpop.xlane.xlu1 %2013  ;;  %2041 = vadd.xlane.f32.xlu0 %v2040_v36 }
 0xdbb   :  { %v2027_v42 = vmul.f32 %v6838_v44, %v2014_v40 }
 0xdbd   :  { %v6854_v18 = vsub.f32 %v1999_v60, %v2027_v42 }
 0xdbf   :  { %v2035_v43 = vmul.f32 %v6854_v18, %v6854_v18 }
 0xdc1   :  { %v2043_v34 = vsel %vm83_vm0, %v2035_v43, 0.0 }
 0xdc2   :  { %2044 = vadd.xlane.f32.xlu2 %v2043_v34  ;;  %v2017_v38 = vpop.xlane.xlu0 %2016 }
 0xdc3   :  { %v2028_v21 = vmul.f32 %v6838_v44, %v2017_v38 }
 0xdc5   :  { %v6864_v52 = vsub.f32 %v2002_v47, %v2028_v21 }
 0xdc7   :  { %v2036_v8 = vmul.f32 %v6864_v52, %v6864_v52 }
 0xdc9   :  { %v2046_v48 = vsel %vm83_vm0, %v2036_v8, 0.0  ;;  %v5745_v8 = vld [vmem:[%s8078_s0 + $0x6e0] ss:$0 sm:$0xff] }
 0xdca   :  { %2047 = vadd.xlane.f32.xlu1 %v2046_v48  ;;  %v2008_v19 = vpop.xlane.xlu0 %2007 }
 0xdcb   :  { %v2025_v12 = vmul.f32 %v6838_v44, %v2008_v19 }
 0xdcd   :  { %v6874_v6 = vsub.f32 %v1993_v62, %v2025_v12 }
 0xdcf   :  { %v2033_v54 = vmul.f32 %v6874_v6, %v6874_v6 }
 0xdd1   :  { %v2037_v56 = vsel %vm83_vm0, %v2033_v54, 0.0 }
 0xdd2   :  { %2038 = vadd.xlane.f32.xlu1 %v2037_v56 }
 0xe2d   :  { %v2042_v13 = vpop.xlane.xlu0 %2041 }
 0xe2e   :  { %v2050_v20 = vmul.f32 %v2042_v13, %v6838_v44  ;;  %v2240_v13 = vpop.f32.mrf.mxu1 }
 0xe30   :  { %v2054_v14 = vadd.f32 1e-05, %v2050_v20  ;;  %v22_v20 = vld [vmem:[%s8077_s1 + $0x58] sm:$0xff] }
 0xe32   :  { %5832 = vrsqrt.f32 %v2054_v14  ;;  %vm2073_vm6 = vweird.f32 %v2054_v14 }
 0xe35   :  { %v2045_v62 = vpop.xlane.xlu2 %2044 }
 0xe36   :  { %v2051_v61 = vmul.f32 %v2045_v62, %v6838_v44 }
 0xe38   :  { %v2055_v59 = vadd.f32 1e-05, %v2051_v61  ;;  %v5833_v51 = vpop.eup %5832  ;;  %v2286_v61 = vpop.f32.mrf.mxu2 }
 0xe39   :  { %v2068_v2 = vmul.f32 %v5833_v51, %v2054_v14  ;;  %vm2074_vm15 = vweird.f32 %v5833_v51  ;;  %v2243_v14 = vpop.f32.mrf.mxu1 }
 0xe3a   :  { %5834 = vrsqrt.f32 %v2055_v59  ;;  %vm2083_vm3 = vweird.f32 %v2055_v59  ;;  %vm2075_vm8 = vmor %vm2073_vm6, %vm2074_vm15 }
 0xe3b   :  { %v2069_v23 = vmul.f32 %v5833_v51, %v2068_v2 }
 0xe3d   :  { %v2048_v7 = vpop.xlane.xlu1 %2047  ;;  %v2070_v32 = vmul.f32 0.5, %v2069_v23  ;;  %v2526_v23 = vld [vmem:[%s8078_s0 + $0x390] sm:$0xff] }
 0xe3e   :  { %v2052_v60 = vmul.f32 %v2048_v7, %v6838_v44  ;;  %v2527_v7 = vld [vmem:[%s8078_s0 + $0x398] sm:$0xff] }
 0xe3f   :  { %v2071_v41 = vsub.f32 1.5, %v2070_v32  ;;  %v2697_v32 = vld [vmem:[%s8078_s0 + $0x3b0] sm:$0xff] }
 0xe40   :  { %v5835_v63 = vpop.eup %5834  ;;  %v2056_v47 = vadd.f32 1e-05, %v2052_v60  ;;  %v2699_v60 = vld [vmem:[%s8078_s0 + $0x3c0] sm:$0xff]  ;;  %v2289_v2 = vpop.f32.mrf.mxu2 }
 0xe41   :  { %v2078_v22 = vmul.f32 %v5835_v63, %v2055_v59  ;;  %vm2084_vm14 = vweird.f32 %v5835_v63  ;;  %v2072_v35 = vmul.f32 %v5833_v51, %v2071_v41  ;;  %v2246_v37 = vpop.f32.mrf.mxu1  ;;  %v2448_v59 = vld [vmem:[%s8078_s0 + $0x358] sm:$0xff]  ;;  %2713 = vmatpush.msrb.mxu1 %v2699_v60 }
 0xe42   :  { %5836 = vrsqrt.f32 %v2056_v47  ;;  %vm2085_vm7 = vmor %vm2083_vm3, %vm2084_vm14  ;;  %vm2093_vm9 = vweird.f32 %v2056_v47  ;;  %2474 = vmatpush.msra.mxu0 %v2448_v59 }
 0xe43   :  { %v2079_v27 = vmul.f32 %v5835_v63, %v2078_v22  ;;  %v2076_v21 = vsel %vm2075_vm8, %v5833_v51, %v2072_v35  ;;  %v2494_v51 = vld [vmem:[%s8078_s0 + $0x378] sm:$0xff]  ;;  %v2493_v22 = vld [vmem:[%s8078_s0 + $0x370] sm:$0xff]  ;;  %v2330_v35 = vpop.f32.mrf.mxu0 }
 0xe44   :  { %v2098_v53 = vmul.f32 %v2076_v21, %v6844_v49  ;;  %v2731_v21 = vld [vmem:[%s8078_s0 + $0x3d0] sm:$0xff] }
 0xe45   :  { %v2080_v0 = vmul.f32 0.5, %v2079_v27  ;;  %v2039_v29 = vpop.xlane.xlu1 %2038  ;;  %v2698_v27 = vld [vmem:[%s8078_s0 + $0x3b8] sm:$0xff] }
 0xe46   :  { %v2049_v31 = vmul.f32 %v2039_v29, %v6838_v44  ;;  %v2103_v57 = vmul.f32 %v5745_v8, %v2098_v53  ;;  %2714 = vmatpush.msrb.mxu1 %v2698_v27  ;;  %v2492_v29 = vld [vmem:[%s8078_s0 + $0x368] sm:$0xff]  ;;  %v2764_v27 = vld [vmem:[%s8078_s0 + $0x3f0] sm:$0xff] }
 0xe47   :  { %v2081_v33 = vsub.f32 1.5, %v2080_v0  ;;  %v2446_v0 = vld [vmem:[%s8078_s0 + $0x348] sm:$0xff] }
 0xe48   :  { %v5837_v3 = vpop.eup %5836  ;;  %v2053_v1 = vadd.f32 1e-05, %v2049_v31  ;;  %v2525_v31 = vld [vmem:[%s8078_s0 + $0x388] sm:$0xff]  ;;  %2715 = vmatpush.msrb.mxu1 %v2697_v32  ;;  %v2292_v41 = vpop.f32.mrf.mxu2 }
 0xe49   :  { %v2088_v39 = vmul.f32 %v5837_v3, %v2056_v47  ;;  %v2082_v9 = vmul.f32 %v5835_v63, %v2081_v33  ;;  %vm2094_vm5 = vweird.f32 %v5837_v3  ;;  %v2249_v62 = vpop.f32.mrf.mxu1  ;;  %v2447_v47 = vld [vmem:[%s8078_s0 + $0x350] sm:$0xff]  ;;  %v2524_v33 = vld [vmem:[%s8078_s0 + $0x380] sm:$0xff] }
 0xe4a   :  { %5838 = vrsqrt.f32 %v2053_v1  ;;  %vm2095_vm10 = vmor %vm2093_vm9, %vm2094_vm5  ;;  %vm2063_vm12 = vweird.f32 %v2053_v1  ;;  %2475 = vmatpush.msra.mxu0 %v2447_v47 }
 0xe4b   :  { %v2089_v45 = vmul.f32 %v5837_v3, %v2088_v39  ;;  %v2086_v43 = vsel %vm2085_vm7, %v5835_v63, %v2082_v9  ;;  %v2696_v39 = vld [vmem:[%s8078_s0 + $0x3a8] sm:$0xff] }
 0xe4c   :  { %v2099_v48 = vmul.f32 %v2086_v43, %v6854_v18  ;;  %2476 = vmatpush.msra.mxu0 %v2446_v0  ;;  %2716 = vmatpush.msrb.mxu1 %v2696_v39  ;;  %v2331_v43 = vadd.f32 %v2330_v35, %v2286_v61 }
 0xe4d   :  { %v2090_v5 = vmul.f32 0.5, %v2089_v45 }
 0xe4e   :  { %v2104_v56 = vmul.f32 %v5745_v8, %v2099_v48 }
 0xe4f   :  { %v2091_v36 = vsub.f32 1.5, %v2090_v5 }
 0xe50   :  { %v5839_v40 = vpop.eup %5838  ;;  %v2295_v5 = vpop.f32.mrf.mxu2 }
 0xe51   :  { %v2092_v42 = vmul.f32 %v5837_v3, %v2091_v36  ;;  %v2058_v46 = vmul.f32 %v5839_v40, %v2053_v1  ;;  %vm2064_vm11 = vweird.f32 %v5839_v40  ;;  %v2491_v1 = vld [vmem:[%s8078_s0 + $0x360] sm:$0xff] }
 0xe52   :  { %vm2065_vm13 = vmor %vm2063_vm12, %vm2064_vm11 }
 0xe53   :  { %v2096_v34 = vsel %vm2095_vm10, %v5837_v3, %v2092_v42  ;;  %v2059_v38 = vmul.f32 %v5839_v40, %v2058_v46  ;;  %v2445_v3 = vld [vmem:[%s8078_s0 + $0x340] sm:$0xff]  ;;  %v2732_v46 = vld [vmem:[%s8078_s0 + $0x3d8] sm:$0xff] }
 0xe54   :  { %v2100_v17 = vmul.f32 %v2096_v34, %v6864_v52  ;;  %v2391_v52 = vld [vmem:[%s8078_s0 + $0x188] sm:$0xf]  ;;  %2477 = vmatpush.msra.mxu0 %v2445_v3  ;;  %v2733_v42 = vld [vmem:[%s8078_s0 + $0x3e0] sm:$0xff]  ;;  %v2333_v34 = vpop.f32.mrf.mxu0 }
 0xe55   :  { %v2060_v19 = vmul.f32 0.5, %v2059_v38  ;;  %5478 = vmatpush.msk.msrb.mxu2 %vm354_vm1, %v2391_v52 }
 0xe56   :  { %v2105_v12 = vmul.f32 %v5745_v8, %v2100_v17  ;;  %5479 = vmatmul.msk.f32.vlgmr.msrb.gmra.mxu2 %vm341_vm2, %v19_v16 }
 0xe57   :  { %v2061_v54 = vsub.f32 1.5, %v2060_v19  ;;  %2540 = vmatpush.msra.mxu2 %v2527_v7  ;;  %v2730_v19 = vld [vmem:[%s8078_s0 + $0x3c8] sm:$0xff] }
 0xe58   :  { %2134 = vmatpush.msrb.mxu3 %v2105_v12  ;;  %v2334_v12 = vadd.f32 %v2333_v34, %v2289_v2  ;;  %v2766_v2 = vld [vmem:[%s8078_s0 + $0x400] sm:$0xff] }
 0xe59   :  { %v2062_v50 = vmul.f32 %v5839_v40, %v2061_v54  ;;  %2541 = vmatpush.msra.mxu2 %v2526_v23 }
 0xe5a   :  { %2135 = vmatpush.msrb.mxu3 %v2104_v56 }
 0xe5b   :  { %v2066_v18 = vsel %vm2065_vm13, %v5839_v40, %v2062_v50  ;;  %2542 = vmatpush.msra.mxu2 %v2525_v31 }
 0xe5c   :  { %2136 = vmatpush.msrb.mxu3 %v2103_v57  ;;  %v2097_v55 = vmul.f32 %v2066_v18, %v6874_v6  ;;  %v2107_v6 = vld [vmem:[%s8078_s0 + $0x28] sm:$0xff]  ;;  %v2336_v56 = vpop.f32.mrf.mxu0 }
 0xe5d   :  { %2543 = vmatpush.msra.mxu2 %v2524_v33  ;;  %v2337_v57 = vadd.f32 %v2336_v56, %v2292_v41 }
 0xe5e   :  { %v2102_v49 = vmul.f32 %v5745_v8, %v2097_v55  ;;  %5480 = vmatmul.msk.f32.gmra.mxu2 %vm341_vm2, %v20_v10 }
 0xe5f   :  { %2746 = vmatpush.msrb.mxu2 %v2733_v42 }
 0xe60   :  { %2137 = vmatpush.msrb.mxu3 %v2102_v49 }
 0xe61   :  { %5447 = vmatmul.msk.f32.vlgmr.msrb.gmra.mxu3 %vm83_vm0, %v2106_v58  ;;  %2747 = vmatpush.msrb.mxu2 %v2732_v46  ;;  %v7119_v46 = vld [vmem:[%s8078_s0 + $0x78] sm:$0xff] }
 0xe62   :  { %5473 = vmatpush.msk.msra.mxu3 %vm354_vm1, %v2342_v4 }
 0xe63   :  { %2748 = vmatpush.msrb.mxu2 %v2731_v21  ;;  %v7126_v21 = vld [vmem:[%s8078_s0 + $0x80] sm:$0xff] }
 0xe64   :  { %2507 = vmatpush.msrb.mxu3 %v2494_v51  ;;  %v2339_v58 = vpop.f32.mrf.mxu0  ;;  %v7076_v51 = vld [vmem:[%s8078_s0 + $0x4e0] sm:$0xf] }
 0xe65   :  { %2749 = vmatpush.msrb.mxu2 %v2730_v19  ;;  %v2340_v4 = vadd.f32 %v2339_v58, %v2295_v5  ;;  %v2449_v60 = vperm.slane %v7076_v51, 0  ;;  %v7112_v5 = vld [vmem:[%s8078_s0 + $0x70] sm:$0xff] }
 0xe66   :  { %5481 = vmatmul.msk.f32.gmra.mxu2 %vm341_vm2, %v21_v11  ;;  %2508 = vmatpush.msrb.mxu3 %v2493_v22  ;;  %v2765_v22 = vld [vmem:[%s8078_s0 + $0x3f8] sm:$0xff] }
 0xe68   :  { %2509 = vmatpush.msrb.mxu3 %v2492_v29  ;;  %v2763_v29 = vld [vmem:[%s8078_s0 + $0x3e8] sm:$0xff] }
 0xe69   :  { %5448 = vmatmul.msk.f32.gmra.mxu3 %vm83_vm0, %v2107_v6 }
 0xe6a   :  { %2510 = vmatpush.msrb.mxu3 %v2491_v1 }
 0xe6e   :  { %5482 = vmatmul.msk.f32.gmra.mxu2 %vm341_vm2, %v22_v20 }
 0xe71   :  { %5449 = vmatmul.msk.f32.gmra.mxu3 %vm83_vm0, %v2108_v15 }
 0xe79   :  { %5450 = vmatmul.msk.f32.gmra.mxu3 %vm83_vm0, %v2109_v24 }
 0xe81   :  { %5474 = vmatmul.msk.f32.vlgmr.msra.gmra.mxu3 %vm341_vm2, %v2240_v13 }
 0xe89   :  { %5475 = vmatmul.msk.f32.gmra.mxu3 %vm341_vm2, %v2243_v14 }
 0xe91   :  { %5476 = vmatmul.msk.f32.gmra.mxu3 %vm341_vm2, %v2246_v37 }
 0xe99   :  { %5477 = vmatmul.msk.f32.gmra.mxu3 %vm341_vm2, %v2249_v62 }
 0xed9   :  { %v2424_v40 = vpop.f32.mrf.mxu2 }
 0xee1   :  { %v2427_v48 = vpop.f32.mrf.mxu2 }
 0xee4   :  { %v6967_v63 = vpop.f32.mrf.mxu3 }
 0xee9   :  { %v2430_v52 = vpop.f32.mrf.mxu2 }
 0xeec   :  { %v7005_v45 = vpop.f32.mrf.mxu3 }
 0xef1   :  { %v2433_v6 = vpop.f32.mrf.mxu2 }
 0xef4   :  { %v7007_v9 = vpop.f32.mrf.mxu3 }
 0xefc   :  { %v7009_v36 = vpop.f32.mrf.mxu3 }
 0xf04   :  { %v2375_v38 = vpop.f32.mrf.mxu3 }
 0xf05   :  { %v2387_v17 = vadd.f32 %v2375_v38, %v2331_v43 }
 0xf07   :  { %v7020_v8 = vadd.f32 %v2424_v40, %v2387_v17 }
 0xf09   :  { %5483 = vmatmul.msk.f32.vlgmr.msra.gmra.mxu0 %vm83_vm0, %v7020_v8  ;;  %5487 = vmatmul.msk.f32.vlgmr.msrb.gmra.mxu3 %vm83_vm0, %v7020_v8 }
 0xf0a   :  { %5491 = vmatmul.msk.f32.vlgmr.msra.gmra.mxu2 %vm83_vm0, %v7020_v8  ;;  %5507 = vmatmul.msk.f32.vlgmr.msrb.gmra.mxu1 %vm83_vm0, %v7020_v8 }
 0xf0c   :  { %v2378_v53 = vpop.f32.mrf.mxu3 }
 0xf0d   :  { %v2388_v54 = vadd.f32 %v2378_v53, %v2334_v12  ;;  %v7133_v12 = vld [vmem:[%s8078_s0 + $0x88] sm:$0xff] }
 0xf0f   :  { %v7033_v50 = vadd.f32 %v2427_v48, %v2388_v54 }
 0xf11   :  { %5484 = vmatmul.msk.f32.gmra.mxu0 %vm83_vm0, %v7033_v50  ;;  %5488 = vmatmul.msk.f32.gmra.mxu3 %vm83_vm0, %v7033_v50 }
 0xf12   :  { %5492 = vmatmul.msk.f32.gmra.mxu2 %vm83_vm0, %v7033_v50  ;;  %5508 = vmatmul.msk.f32.gmra.mxu1 %vm83_vm0, %v7033_v50 }
 0xf14   :  { %v2381_v18 = vpop.f32.mrf.mxu3 }
 0xf15   :  { %v2389_v55 = vadd.f32 %v2381_v18, %v2337_v57 }
 0xf17   :  { %v7043_v49 = vadd.f32 %v2430_v52, %v2389_v55 }
 0xf19   :  { %5485 = vmatmul.msk.f32.gmra.mxu0 %vm83_vm0, %v7043_v49  ;;  %5489 = vmatmul.msk.f32.gmra.mxu3 %vm83_vm0, %v7043_v49 }
 0xf1a   :  { %5493 = vmatmul.msk.f32.gmra.mxu2 %vm83_vm0, %v7043_v49  ;;  %5509 = vmatmul.msk.f32.gmra.mxu1 %vm83_vm0, %v7043_v49 }
 0xf1c   :  { %v2384_v16 = vpop.f32.mrf.mxu3 }
 0xf1d   :  { %v2390_v10 = vadd.f32 %v2384_v16, %v2340_v4 }
 0xf1f   :  { %v7053_v15 = vadd.f32 %v2433_v6, %v2390_v10 }
 0xf21   :  { %5486 = vmatmul.msk.f32.gmra.mxu0 %vm83_vm0, %v7053_v15  ;;  %5490 = vmatmul.msk.f32.gmra.mxu3 %vm83_vm0, %v7053_v15 }
 0xf22   :  { %5494 = vmatmul.msk.f32.gmra.mxu2 %vm83_vm0, %v7053_v15  ;;  %5510 = vmatmul.msk.f32.gmra.mxu1 %vm83_vm0, %v7053_v15 }
 0xf2a   :  { %5511 = vmatmul.msk.f32.vlgmr.msrb.gmra.mxu2 %vm83_vm0, %v7020_v8 }
 0xf32   :  { %5512 = vmatmul.msk.f32.gmra.mxu2 %vm83_vm0, %v7033_v50 }
 0xf3a   :  { %5513 = vmatmul.msk.f32.gmra.mxu2 %vm83_vm0, %v7043_v49 }
 0xf42   :  { %5514 = vmatmul.msk.f32.gmra.mxu2 %vm83_vm0, %v7053_v15 }
 0xf86   :  { %v2479_v59 = vpop.f32.mrf.mxu0 }
 0xf87   :  { %v2480_v47 = vadd.f32 %v2479_v59, %v2449_v60 }
 0xf8c   :  { %v2512_v11 = vpop.f32.mrf.mxu3 }
 0xf8d   :  { %v2545_v24 = vpop.f32.mrf.mxu2 }
 0xf8e   :  { %v2482_v23 = vpop.f32.mrf.mxu0 }
 0xf8f   :  { %v2483_v31 = vadd.f32 %v2482_v23, %v2449_v60 }
 0xf94   :  { %v2515_v13 = vpop.f32.mrf.mxu3 }
 0xf95   :  { %v2548_v20 = vpop.f32.mrf.mxu2 }
 0xf96   :  { %v2485_v32 = vpop.f32.mrf.mxu0 }
 0xf97   :  { %v2486_v1 = vadd.f32 %v2485_v32, %v2449_v60 }
 0xf9c   :  { %v2518_v14 = vpop.f32.mrf.mxu3 }
 0xf9d   :  { %v2551_v37 = vpop.f32.mrf.mxu2 }
 0xf9e   :  { %v2488_v39 = vpop.f32.mrf.mxu0 }
 0xf9f   :  { %v2489_v41 = vadd.f32 %v2488_v39, %v2449_v60 }
 0xfa4   :  { %v2521_v62 = vpop.f32.mrf.mxu3 }
 0xfa5   :  { %v2554_v61 = vpop.f32.mrf.mxu2  ;;  %5495 = vmatpush.xpose.msk.msrb.mxu0 %vm642_vm4, %v2521_v62 }
 0xfa6   :  { %2678 = vmatpush.msra.mxu3 %v2554_v61 }
 0xfa8   :  { %2679 = vmatpush.msra.mxu3 %v2551_v37 }
 0xfa9   :  { %5496 = vmatpush.xpose.msk.msrb.mxu0 %vm642_vm4, %v2518_v14 }
 0xfaa   :  { %2680 = vmatpush.msra.mxu3 %v2548_v20 }
 0xfac   :  { %2681 = vmatpush.msra.mxu3 %v2545_v24 }
 0xfad   :  { %v2751_v7 = vpop.f32.mrf.mxu2  ;;  %5497 = vmatpush.xpose.msk.msrb.mxu0 %vm642_vm4, %v2515_v13 }
 0xfb1   :  { %5498 = vmatpush.xpose.msk.msrb.mxu0 %vm642_vm4, %v2512_v11 }
 0xfb4   :  { %5499 = vmatmul.msk.f32.vlgmr.msrb.gmra.mxu0 %vm642_vm4, %v2480_v47 }
 0xfb5   :  { %2779 = vmatpush.msra.mxu0 %v2766_v2  ;;  %v2754_v0 = vpop.f32.mrf.mxu2 }
 0xfb7   :  { %2780 = vmatpush.msra.mxu0 %v2765_v22 }
 0xfb9   :  { %2781 = vmatpush.msra.mxu0 %v2764_v27 }
 0xfbb   :  { %2782 = vmatpush.msra.mxu0 %v2763_v29 }
 0xfbc   :  { %5500 = vmatmul.msk.f32.gmra.mxu0 %vm642_vm4, %v2483_v31 }
 0xfbd   :  { %v2757_v3 = vpop.f32.mrf.mxu2 }
 0xfc4   :  { %5501 = vmatmul.msk.f32.gmra.mxu0 %vm642_vm4, %v2486_v1 }
 0xfc5   :  { %v2760_v33 = vpop.f32.mrf.mxu2 }
 0xfc6   :  { %5519 = vmatpush.xpose.msk.msrb.mxu3 %vm642_vm4, %v2760_v33 }
 0xfca   :  { %5520 = vmatpush.xpose.msk.msrb.mxu3 %vm642_vm4, %v2757_v3 }
 0xfcc   :  { %5502 = vmatmul.msk.f32.gmra.mxu0 %vm642_vm4, %v2489_v41 }
 0xfce   :  { %5521 = vmatpush.xpose.msk.msrb.mxu3 %vm642_vm4, %v2754_v0 }
 0xfd2   :  { %5522 = vmatpush.xpose.msk.msrb.mxu3 %vm642_vm4, %v2751_v7 }
 0xfd4   :  { %5515 = vmatmul.msk.f32.vlgmr.msra.gmra.mxu0 %vm83_vm0, %v7020_v8 }
 0xfdc   :  { %5516 = vmatmul.msk.f32.gmra.mxu0 %vm83_vm0, %v7033_v50 }
 0xfe4   :  { %5517 = vmatmul.msk.f32.gmra.mxu0 %vm83_vm0, %v7043_v49 }
 0xfec   :  { %5518 = vmatmul.msk.f32.gmra.mxu0 %vm83_vm0, %v7053_v15 }
0x1031   :  { %v2598_v35 = vpop.f32.mrf.mxu0 }
0x1032   :  { %v2599_v40 = vadd.f32 %v2598_v35, %v7112_v5 }
0x1034   :  { %v2610_v42 = vsel %vm83_vm0, %v2599_v40, -inf }
0x1035   :  { %2611 = vmax.xlane.f32.xlu2 %v2610_v42 }
0x1039   :  { %v2601_v43 = vpop.f32.mrf.mxu0 }
0x103a   :  { %v2602_v34 = vadd.f32 %v2601_v43, %v7119_v46  ;;  %v3020_v43 = vld [vmem:[%s8078_s0 + $0x428] sm:$0xff] }
0x103c   :  { %v2613_v38 = vsel %vm83_vm0, %v2602_v34, -inf }
0x103d   :  { %2614 = vmax.xlane.f32.xlu0 %v2613_v38  ;;  %v2700_v38 = vperm.slane %v7076_v51, 1 }
0x1041   :  { %v2604_v17 = vpop.f32.mrf.mxu0 }
0x1042   :  { %v2605_v48 = vadd.f32 %v2604_v17, %v7126_v21  ;;  %v3018_v17 = vld [vmem:[%s8078_s0 + $0x418] sm:$0xff] }
0x1044   :  { %v2616_v19 = vsel %vm83_vm0, %v2605_v48, -inf }
0x1045   :  { %2617 = vmax.xlane.f32.xlu1 %v2616_v19 }
0x1049   :  { %v2607_v53 = vpop.f32.mrf.mxu0 }
0x104a   :  { %v2608_v54 = vadd.f32 %v2607_v53, %v7133_v12 }
0x104c   :  { %v2619_v56 = vsel %vm83_vm0, %v2608_v54, -inf }
0x104d   :  { %2620 = vmax.xlane.f32.xlu2 %v2619_v56 }
0x1051   :  { %v2784_v52 = vpop.f32.mrf.mxu0 }
0x1059   :  { %v2787_v57 = vpop.f32.mrf.mxu0 }
0x1061   :  { %v2790_v18 = vpop.f32.mrf.mxu0 }
0x1069   :  { %v2793_v55 = vpop.f32.mrf.mxu0 }
0x106a   :  { %2917 = vmatpush.msra.mxu1 %v2793_v55  ;;  %v2695_v55 = vld [vmem:[%s8078_s0 + $0x3a0] sm:$0xff] }
0x106b   :  { %3003 = vmatpush.msrb.mxu0 %v2695_v55 }
0x106c   :  { %2918 = vmatpush.msra.mxu1 %v2790_v18 }
0x106e   :  { %2919 = vmatpush.msra.mxu1 %v2787_v57 }
0x1070   :  { %2920 = vmatpush.msra.mxu1 %v2784_v52 }
0x10a8   :  { %v2612_v58 = vpop.xlane.xlu2 %2611 }
0x10a9   :  { %v2622_v4 = vsub.f32 %v2599_v40, %v2612_v58  ;;  %v2718_v40 = vpop.f32.mrf.mxu1 }
0x10aa   :  { %v2719_v19 = vadd.f32 %v2718_v40, %v2700_v38 }
0x10ab   :  { %v2626_v16 = vmul.f32 1.442695, %v2622_v4 }
0x10ad   :  { %5840 = vpow2.f32 %v2626_v16 }
0x10b0   :  { %v2615_v6 = vpop.xlane.xlu0 %2614 }
0x10b1   :  { %v2623_v10 = vsub.f32 %v2602_v34, %v2615_v6  ;;  %v3019_v34 = vld [vmem:[%s8078_s0 + $0x420] sm:$0xff]  ;;  %v2721_v53 = vpop.f32.mrf.mxu1 }
0x10b3   :  { %v5841_v11 = vpop.eup %5840  ;;  %v2628_v24 = vmul.f32 1.442695, %v2623_v10 }
0x10b4   :  { %v2634_v13 = vsel %vm83_vm0, %v5841_v11, 0.0 }
0x10b5   :  { %5842 = vpow2.f32 %v2628_v24  ;;  %2635 = vadd.xlane.f32.xlu0 %v2634_v13 }
0x10b8   :  { %v2618_v20 = vpop.xlane.xlu1 %2617 }
0x10b9   :  { %v2624_v14 = vsub.f32 %v2605_v48, %v2618_v20  ;;  %v3017_v48 = vld [vmem:[%s8078_s0 + $0x410] sm:$0xff]  ;;  %v2724_v56 = vpop.f32.mrf.mxu1 }
0x10ba   :  { %v2725_v52 = vadd.f32 %v2724_v56, %v2700_v38 }
0x10bb   :  { %v5843_v37 = vpop.eup %5842  ;;  %v2630_v62 = vmul.f32 1.442695, %v2624_v14 }
0x10bc   :  { %v2637_v61 = vsel %vm83_vm0, %v5843_v37, 0.0 }
0x10bd   :  { %5844 = vpow2.f32 %v2630_v62  ;;  %2638 = vadd.xlane.f32.xlu1 %v2637_v61 }
0x10c0   :  { %v2621_v59 = vpop.xlane.xlu2 %2620 }
0x10c1   :  { %v2625_v7 = vsub.f32 %v2608_v54, %v2621_v59  ;;  %v2722_v54 = vadd.f32 %v2721_v53, %v2700_v38  ;;  %v2727_v57 = vpop.f32.mrf.mxu1  ;;  %v3052_v53 = vld [vmem:[%s8078_s0 + $0x438] sm:$0xff] }
0x10c2   :  { %v2728_v18 = vadd.f32 %v2727_v57, %v2700_v38 }
0x10c3   :  { %v5845_v60 = vpop.eup %5844  ;;  %v2632_v2 = vmul.f32 1.442695, %v2625_v7 }
0x10c4   :  { %v2640_v47 = vsel %vm83_vm0, %v5845_v60, 0.0 }
0x10c5   :  { %5846 = vpow2.f32 %v2632_v2  ;;  %2641 = vadd.xlane.f32.xlu2 %v2640_v47 }
0x10cb   :  { %v5847_v22 = vpop.eup %5846 }
0x10cc   :  { %v2643_v23 = vsel %vm83_vm0, %v5847_v22, 0.0 }
0x10cd   :  { %2644 = vadd.xlane.f32.xlu0 %v2643_v23 }
0x1128   :  { %v2636_v27 = vpop.xlane.xlu0 %2635 }
0x1129   :  { %5848 = vrcp.f32 %v2636_v27 }
0x112f   :  { %v5849_v0 = vpop.eup %5848 }
0x1130   :  { %v2650_v29 = vmul.f32 %v5849_v0, %v5841_v11  ;;  %v2639_v31 = vpop.xlane.xlu1 %2638 }
0x1131   :  { %5850 = vrcp.f32 %v2639_v31 }
0x1132   :  { %5503 = vmatmul.msk.f32.vlgmr.msra.gmra.mxu3 %vm83_vm0, %v2650_v29 }
0x1133   :  { %3034 = vmatpush.msra.mxu3 %v3020_v43 }
0x1135   :  { %3035 = vmatpush.msra.mxu3 %v3019_v34 }
0x1137   :  { %v5851_v32 = vpop.eup %5850  ;;  %3036 = vmatpush.msra.mxu3 %v3018_v17 }
0x1138   :  { %v2642_v3 = vpop.xlane.xlu2 %2641  ;;  %v2651_v1 = vmul.f32 %v5851_v32, %v5843_v37 }
0x1139   :  { %5852 = vrcp.f32 %v2642_v3  ;;  %3037 = vmatpush.msra.mxu3 %v3017_v48  ;;  %v3054_v48 = vld [vmem:[%s8078_s0 + $0x448] sm:$0xff] }
0x113a   :  { %5504 = vmatmul.msk.f32.gmra.mxu3 %vm83_vm0, %v2651_v1  ;;  %3067 = vmatpush.msrb.mxu1 %v3054_v48 }
0x113f   :  { %v5853_v33 = vpop.eup %5852 }
0x1140   :  { %v2645_v39 = vpop.xlane.xlu0 %2644  ;;  %v2652_v41 = vmul.f32 %v5853_v33, %v5845_v60 }
0x1141   :  { %5854 = vrcp.f32 %v2645_v39 }
0x1142   :  { %5505 = vmatmul.msk.f32.gmra.mxu3 %vm83_vm0, %v2652_v41 }
0x1147   :  { %v5855_v35 = vpop.eup %5854 }
0x1148   :  { %v2653_v42 = vmul.f32 %v5855_v35, %v5847_v22 }
0x114a   :  { %5506 = vmatmul.msk.f32.gmra.mxu3 %vm83_vm0, %v2653_v42 }
0x1152   :  { %5523 = vmatmul.msk.f32.vlgmr.msrb.gmra.mxu3 %vm642_vm4, %v2719_v19  ;;  %v3053_v19 = vld [vmem:[%s8078_s0 + $0x440] sm:$0xff] }
0x1153   :  { %3068 = vmatpush.msrb.mxu1 %v3053_v19 }
0x1155   :  { %3069 = vmatpush.msrb.mxu1 %v3052_v53 }
0x115a   :  { %5524 = vmatmul.msk.f32.gmra.mxu3 %vm642_vm4, %v2722_v54  ;;  %v3051_v54 = vld [vmem:[%s8078_s0 + $0x430] sm:$0xff] }
0x115b   :  { %3070 = vmatpush.msrb.mxu1 %v3051_v54 }
0x1162   :  { %5525 = vmatmul.msk.f32.gmra.mxu3 %vm642_vm4, %v2725_v52 }
0x116a   :  { %5526 = vmatmul.msk.f32.gmra.mxu3 %vm642_vm4, %v2728_v18 }
0x1172   :  { %5539 = vmatmul.msk.f32.vlgmr.msra.gmra.mxu3 %vm83_vm0, %v7020_v8 }
0x117a   :  { %5540 = vmatmul.msk.f32.gmra.mxu3 %vm83_vm0, %v7033_v50 }
0x1182   :  { %5541 = vmatmul.msk.f32.gmra.mxu3 %vm83_vm0, %v7043_v49 }
0x118a   :  { %5542 = vmatmul.msk.f32.gmra.mxu3 %vm83_vm0, %v7053_v15 }
0x11b5   :  { %v2683_v58 = vpop.f32.mrf.mxu3 }
0x11b6   :  { %5535 = vmatmul.msk.f32.vlgmr.msrb.gmra.mxu0 %vm642_vm4, %v2683_v58 }
0x11bd   :  { %v2686_v4 = vpop.f32.mrf.mxu3 }
0x11be   :  { %5536 = vmatmul.msk.f32.gmra.mxu0 %vm642_vm4, %v2686_v4 }
0x11c5   :  { %v2689_v16 = vpop.f32.mrf.mxu3 }
0x11c6   :  { %5537 = vmatmul.msk.f32.gmra.mxu0 %vm642_vm4, %v2689_v16 }
0x11cd   :  { %v2692_v6 = vpop.f32.mrf.mxu3 }
0x11ce   :  { %5538 = vmatmul.msk.f32.gmra.mxu0 %vm642_vm4, %v2692_v6 }
0x11d5   :  { %v2837_v10 = vpop.f32.mrf.mxu3 }
0x11d6   :  { %v2838_v11 = vadd.f32 %v2837_v10, %v7112_v5 }
0x11d8   :  { %v2849_v24 = vsel %vm83_vm0, %v2838_v11, -inf }
0x11d9   :  { %2850 = vmax.xlane.f32.xlu1 %v2849_v24  ;;  %v2934_v24 = vld [vmem:[%s8078_s0 + $0x408] sm:$0xff] }
0x11da   :  { %2962 = vmatpush.msra.mxu2 %v2934_v24 }
0x11dd   :  { %v2840_v13 = vpop.f32.mrf.mxu3 }
0x11de   :  { %v2841_v20 = vadd.f32 %v2840_v13, %v7119_v46  ;;  %v3087_v13 = vld [vmem:[%s8078_s0 + $0x468] sm:$0xff] }
0x11df   :  { %3100 = vmatpush.msrb.mxu2 %v3087_v13 }
0x11e0   :  { %v2852_v14 = vsel %vm83_vm0, %v2841_v20, -inf }
0x11e1   :  { %2853 = vmax.xlane.f32.xlu2 %v2852_v14  ;;  %v3085_v14 = vld [vmem:[%s8078_s0 + $0x458] sm:$0xff] }
0x11e5   :  { %v2843_v37 = vpop.f32.mrf.mxu3 }
0x11e6   :  { %v2844_v62 = vadd.f32 %v2843_v37, %v7126_v21 }
0x11e8   :  { %v2855_v61 = vsel %vm83_vm0, %v2844_v62, -inf }
0x11e9   :  { %2856 = vmax.xlane.f32.xlu0 %v2855_v61 }
0x11ed   :  { %v2846_v59 = vpop.f32.mrf.mxu3 }
0x11ee   :  { %v2847_v7 = vadd.f32 %v2846_v59, %v7133_v12 }
0x11f0   :  { %v2858_v60 = vsel %vm83_vm0, %v2847_v7, -inf }
0x11f1   :  { %2859 = vmax.xlane.f32.xlu1 %v2858_v60  ;;  %v3304_v60 = vld [vmem:[%s8078_s0 + $0x490] sm:$0xff] }
0x1233   :  { %v7297_v54 = vpop.f32.mrf.mxu0 }
0x124c   :  { %v2851_v2 = vpop.xlane.xlu1 %2850 }
0x124d   :  { %v2861_v47 = vsub.f32 %v2838_v11, %v2851_v2  ;;  %v3303_v2 = vld [vmem:[%s8078_s0 + $0x488] sm:$0xff] }
0x124f   :  { %v2865_v22 = vmul.f32 1.442695, %v2861_v47  ;;  %v3302_v47 = vld [vmem:[%s8078_s0 + $0x480] sm:$0xff] }
0x1251   :  { %5856 = vpow2.f32 %v2865_v22  ;;  %v3301_v22 = vld [vmem:[%s8078_s0 + $0x478] sm:$0xff] }
0x1254   :  { %v2854_v23 = vpop.xlane.xlu2 %2853 }
0x1255   :  { %v2862_v27 = vsub.f32 %v2841_v20, %v2854_v23  ;;  %v3086_v20 = vld [vmem:[%s8078_s0 + $0x460] sm:$0xff] }
0x1256   :  { %3101 = vmatpush.msrb.mxu2 %v3086_v20 }
0x1257   :  { %v5857_v0 = vpop.eup %5856  ;;  %v2867_v29 = vmul.f32 1.442695, %v2862_v27 }
0x1258   :  { %v2873_v31 = vsel %vm83_vm0, %v5857_v0, 0.0  ;;  %3102 = vmatpush.msrb.mxu2 %v3085_v14  ;;  %v3255_v14 = vld [vmem:[%s8078_s0 + $0x470] sm:$0xff] }
0x1259   :  { %5858 = vpow2.f32 %v2867_v29  ;;  %2874 = vadd.xlane.f32.xlu2 %v2873_v31  ;;  %v3039_v31 = vpop.f32.mrf.mxu3 }
0x125c   :  { %v2857_v32 = vpop.xlane.xlu0 %2856 }
0x125d   :  { %v2863_v3 = vsub.f32 %v2844_v62, %v2857_v32  ;;  %v3084_v62 = vld [vmem:[%s8078_s0 + $0x450] sm:$0xff]  ;;  %v3021_v32 = vperm.slane %v7076_v51, 2 }
0x125e   :  { %3103 = vmatpush.msrb.mxu2 %v3084_v62 }
0x125f   :  { %v5859_v1 = vpop.eup %5858  ;;  %v2869_v33 = vmul.f32 1.442695, %v2863_v3  ;;  %v3338_v3 = vld [vmem:[%s8078_s0 + $0x4b0] sm:$0xff] }
0x1260   :  { %v2876_v39 = vsel %vm83_vm0, %v5859_v1, 0.0 }
0x1261   :  { %5860 = vpow2.f32 %v2869_v33  ;;  %2877 = vadd.xlane.f32.xlu0 %v2876_v39  ;;  %v3337_v33 = vld [vmem:[%s8078_s0 + $0x4a8] sm:$0xff]  ;;  %v3042_v39 = vpop.f32.mrf.mxu3 }
0x1264   :  { %v2860_v41 = vpop.xlane.xlu1 %2859 }
0x1265   :  { %v2864_v35 = vsub.f32 %v2847_v7, %v2860_v41  ;;  %v3336_v41 = vld [vmem:[%s8078_s0 + $0x4a0] sm:$0xff] }
0x1267   :  { %v5861_v40 = vpop.eup %5860  ;;  %v2871_v42 = vmul.f32 1.442695, %v2864_v35  ;;  %v3335_v35 = vld [vmem:[%s8078_s0 + $0x498] sm:$0xff] }
0x1268   :  { %v2879_v43 = vsel %vm83_vm0, %v5861_v40, 0.0 }
0x1269   :  { %5862 = vpow2.f32 %v2871_v42  ;;  %2880 = vadd.xlane.f32.xlu1 %v2879_v43  ;;  %v3045_v42 = vpop.f32.mrf.mxu3 }
0x126a   :  { %v3046_v43 = vadd.f32 %v3045_v42, %v3021_v32 }
0x126f   :  { %v5863_v34 = vpop.eup %5862 }
0x1270   :  { %v2882_v38 = vsel %vm83_vm0, %v5863_v34, 0.0 }
0x1271   :  { %2883 = vadd.xlane.f32.xlu2 %v2882_v38 }
0x12cc   :  { %v2875_v17 = vpop.xlane.xlu2 %2874 }
0x12cd   :  { %5864 = vrcp.f32 %v2875_v17 }
0x12d3   :  { %v5865_v56 = vpop.eup %5864 }
0x12d4   :  { %v2889_v52 = vmul.f32 %v5865_v56, %v5857_v0  ;;  %v2878_v57 = vpop.xlane.xlu0 %2877 }
0x12d5   :  { %5866 = vrcp.f32 %v2878_v57 }
0x12d6   :  { %5527 = vmatmul.msk.f32.vlgmr.msra.gmra.mxu1 %vm83_vm0, %v2889_v52  ;;  %v7299_v52 = vpop.f32.mrf.mxu0 }
0x12d7   :  { %3283 = vmatpush.msra.mxu1 %v3255_v14 }
0x12db   :  { %v5867_v18 = vpop.eup %5866 }
0x12dc   :  { %v2881_v55 = vpop.xlane.xlu1 %2880  ;;  %v2890_v58 = vmul.f32 %v5867_v18, %v5859_v1  ;;  %v3040_v1 = vadd.f32 %v3039_v31, %v3021_v32 }
0x12dd   :  { %5868 = vrcp.f32 %v2881_v55 }
0x12de   :  { %5528 = vmatmul.msk.f32.gmra.mxu1 %vm83_vm0, %v2890_v58  ;;  %v7301_v18 = vpop.f32.mrf.mxu0 }
0x12e3   :  { %v5869_v4 = vpop.eup %5868 }
0x12e4   :  { %v2884_v16 = vpop.xlane.xlu2 %2883  ;;  %v2891_v6 = vmul.f32 %v5869_v4, %v5861_v40  ;;  %v3043_v40 = vadd.f32 %v3042_v39, %v3021_v32 }
0x12e5   :  { %5870 = vrcp.f32 %v2884_v16 }
0x12e6   :  { %5529 = vmatmul.msk.f32.gmra.mxu1 %vm83_vm0, %v2891_v6  ;;  %v7303_v4 = vpop.f32.mrf.mxu0 }
0x12eb   :  { %v5871_v10 = vpop.eup %5870 }
0x12ec   :  { %v2892_v11 = vmul.f32 %v5871_v10, %v5863_v34  ;;  %v3048_v34 = vpop.f32.mrf.mxu3 }
0x12ed   :  { %v3049_v38 = vadd.f32 %v3048_v34, %v3021_v32 }
0x12ee   :  { %5530 = vmatmul.msk.f32.gmra.mxu1 %vm83_vm0, %v2892_v11 }
0x12f6   :  { %5543 = vmatmul.msk.f32.vlgmr.msrb.gmra.mxu1 %vm83_vm0, %v7020_v8 }
0x12fe   :  { %5544 = vmatmul.msk.f32.gmra.mxu1 %vm83_vm0, %v7033_v50 }
0x1306   :  { %5545 = vmatmul.msk.f32.gmra.mxu1 %vm83_vm0, %v7043_v49 }
0x130e   :  { %5546 = vmatmul.msk.f32.gmra.mxu1 %vm83_vm0, %v7053_v15 }
0x1353   :  { %v2922_v37 = vpop.f32.mrf.mxu1 }
0x1354   :  { %5531 = vmatmul.msk.f32.vlgmr.msra.gmra.mxu2 %vm642_vm4, %v2922_v37 }
0x1355   :  { %3318 = vmatpush.msra.mxu2 %v3304_v60 }
0x1357   :  { %3319 = vmatpush.msra.mxu2 %v3303_v2 }
0x1359   :  { %3320 = vmatpush.msra.mxu2 %v3302_v47 }
0x135b   :  { %v2925_v61 = vpop.f32.mrf.mxu1  ;;  %3321 = vmatpush.msra.mxu2 %v3301_v22 }
0x135c   :  { %5532 = vmatmul.msk.f32.gmra.mxu2 %vm642_vm4, %v2925_v61 }
0x1363   :  { %v2928_v59 = vpop.f32.mrf.mxu1 }
0x1364   :  { %5533 = vmatmul.msk.f32.gmra.mxu2 %vm642_vm4, %v2928_v59 }
0x136b   :  { %v2931_v7 = vpop.f32.mrf.mxu1 }
0x136c   :  { %5534 = vmatmul.msk.f32.gmra.mxu2 %vm642_vm4, %v2931_v7 }
0x1373   :  { %v3072_v23 = vpop.f32.mrf.mxu1 }
0x1374   :  { %5547 = vmatmul.msk.f32.vlgmr.msrb.gmra.mxu2 %vm83_vm0, %v7020_v8 }
0x137b   :  { %v3075_v27 = vpop.f32.mrf.mxu1 }
0x137c   :  { %5548 = vmatmul.msk.f32.gmra.mxu2 %vm83_vm0, %v7033_v50 }
0x1383   :  { %v3078_v0 = vpop.f32.mrf.mxu1 }
0x1384   :  { %5549 = vmatmul.msk.f32.gmra.mxu2 %vm83_vm0, %v7043_v49 }
0x138b   :  { %v3081_v29 = vpop.f32.mrf.mxu1 }
0x138c   :  { %5550 = vmatmul.msk.f32.gmra.mxu2 %vm83_vm0, %v7053_v15  ;;  %5551 = vmatpush.xpose.msk.msra.mxu0 %vm642_vm4, %v3081_v29 }
0x1390   :  { %5552 = vmatpush.xpose.msk.msra.mxu0 %vm642_vm4, %v3078_v0 }
0x1394   :  { %5553 = vmatpush.xpose.msk.msra.mxu0 %vm642_vm4, %v3075_v27  ;;  %5567 = vmatmul.msk.f32.vlgmr.msra.gmra.mxu2 %vm83_vm0, %v7020_v8 }
0x1398   :  { %5554 = vmatpush.xpose.msk.msra.mxu0 %vm642_vm4, %v3072_v23 }
0x139b   :  { %5555 = vmatmul.msk.f32.vlgmr.msra.gmra.mxu0 %vm642_vm4, %v3040_v1 }
0x139c   :  { %3351 = vmatpush.msrb.mxu0 %v3338_v3  ;;  %5568 = vmatmul.msk.f32.gmra.mxu2 %vm83_vm0, %v7033_v50 }
0x139e   :  { %3352 = vmatpush.msrb.mxu0 %v3337_v33 }
0x13a0   :  { %3353 = vmatpush.msrb.mxu0 %v3336_v41 }
0x13a2   :  { %3354 = vmatpush.msrb.mxu0 %v3335_v35 }
0x13a3   :  { %5556 = vmatmul.msk.f32.gmra.mxu0 %vm642_vm4, %v3043_v40 }
0x13a4   :  { %5569 = vmatmul.msk.f32.gmra.mxu2 %vm83_vm0, %v7043_v49 }
0x13ab   :  { %5557 = vmatmul.msk.f32.gmra.mxu0 %vm642_vm4, %v3046_v43 }
0x13ac   :  { %5570 = vmatmul.msk.f32.gmra.mxu2 %vm83_vm0, %v7053_v15 }
0x13b3   :  { %5558 = vmatmul.msk.f32.gmra.mxu0 %vm642_vm4, %v3049_v38 }
0x13bb   :  { %5571 = vmatmul.msk.f32.vlgmr.msrb.gmra.mxu0 %vm83_vm0, %v7020_v8 }
0x13c3   :  { %5572 = vmatmul.msk.f32.gmra.mxu0 %vm83_vm0, %v7033_v50 }
0x13cb   :  { %5573 = vmatmul.msk.f32.gmra.mxu0 %vm83_vm0, %v7043_v49 }
0x13d3   :  { %5574 = vmatmul.msk.f32.gmra.mxu0 %vm83_vm0, %v7053_v15 }
0x13d7   :  { %v7289_v17 = vpop.f32.mrf.mxu2 }
0x13df   :  { %v7291_v48 = vpop.f32.mrf.mxu2 }
0x13e7   :  { %v7293_v19 = vpop.f32.mrf.mxu2 }
0x13ef   :  { %v7295_v53 = vpop.f32.mrf.mxu2 }
0x13f7   :  { %v3105_v56 = vpop.f32.mrf.mxu2 }
0x13ff   :  { %v3108_v57 = vpop.f32.mrf.mxu2 }
0x1407   :  { %v3111_v55 = vpop.f32.mrf.mxu2 }
0x140f   :  { %v3114_v58 = vpop.f32.mrf.mxu2 }
0x1410   :  { %3238 = vmatpush.msrb.mxu3 %v3114_v58 }
0x1412   :  { %3239 = vmatpush.msrb.mxu3 %v3111_v55 }
0x1414   :  { %3240 = vmatpush.msrb.mxu3 %v3108_v57 }
0x1416   :  { %3241 = vmatpush.msrb.mxu3 %v3105_v56 }
0x1418   :  { %v3158_v16 = vpop.f32.mrf.mxu0 }
0x1419   :  { %v3159_v6 = vadd.f32 %v3158_v16, %v7112_v5  ;;  %v3371_v16 = vld [vmem:[%s8078_s0 + $0x4d0] sm:$0xff] }
0x141a   :  { %3384 = vmatpush.msra.mxu3 %v3371_v16 }
0x141b   :  { %v3170_v10 = vsel %vm83_vm0, %v3159_v6, -inf }
0x141c   :  { %3171 = vmax.xlane.f32.xlu0 %v3170_v10  ;;  %v3369_v10 = vld [vmem:[%s8078_s0 + $0x4c0] sm:$0xff] }
0x1420   :  { %v3161_v11 = vpop.f32.mrf.mxu0 }
0x1421   :  { %v3162_v24 = vadd.f32 %v3161_v11, %v7119_v46  ;;  %v3368_v11 = vld [vmem:[%s8078_s0 + $0x4b8] sm:$0xff] }
0x1423   :  { %v3173_v13 = vsel %vm83_vm0, %v3162_v24, -inf }
0x1424   :  { %3174 = vmax.xlane.f32.xlu1 %v3173_v13 }
0x1428   :  { %v3164_v20 = vpop.f32.mrf.mxu0 }
0x1429   :  { %v3165_v37 = vadd.f32 %v3164_v20, %v7126_v21 }
0x142b   :  { %v3176_v62 = vsel %vm83_vm0, %v3165_v37, -inf }
0x142c   :  { %3177 = vmax.xlane.f32.xlu2 %v3176_v62 }
0x1430   :  { %v3167_v61 = vpop.f32.mrf.mxu0 }
0x1431   :  { %v3168_v59 = vadd.f32 %v3167_v61, %v7133_v12 }
0x1433   :  { %v3179_v7 = vsel %vm83_vm0, %v3168_v59, -inf }
0x1434   :  { %3180 = vmax.xlane.f32.xlu0 %v3179_v7 }
0x1438   :  { %v3356_v60 = vpop.f32.mrf.mxu0 }
0x1440   :  { %v3359_v2 = vpop.f32.mrf.mxu0 }
0x1448   :  { %v3362_v47 = vpop.f32.mrf.mxu0 }
0x1450   :  { %v3365_v22 = vpop.f32.mrf.mxu0 }
0x1451   :  { %5579 = vmatpush.xpose.msk.msrb.mxu1 %vm642_vm4, %v3365_v22 }
0x1455   :  { %5580 = vmatpush.xpose.msk.msrb.mxu1 %vm642_vm4, %v3362_v47 }
0x1459   :  { %5581 = vmatpush.xpose.msk.msrb.mxu1 %vm642_vm4, %v3359_v2 }
0x145d   :  { %5582 = vmatpush.xpose.msk.msrb.mxu1 %vm642_vm4, %v3356_v60 }
0x148f   :  { %v3172_v23 = vpop.xlane.xlu0 %3171 }
0x1490   :  { %v3182_v27 = vsub.f32 %v3159_v6, %v3172_v23  ;;  %v3370_v6 = vld [vmem:[%s8078_s0 + $0x4c8] sm:$0xff] }
0x1491   :  { %3385 = vmatpush.msra.mxu3 %v3370_v6 }
0x1492   :  { %v3186_v0 = vmul.f32 1.442695, %v3182_v27  ;;  %v3323_v27 = vpop.f32.mrf.mxu2 }
0x1493   :  { %3386 = vmatpush.msra.mxu3 %v3369_v10 }
0x1494   :  { %5872 = vpow2.f32 %v3186_v0 }
0x1495   :  { %3387 = vmatpush.msra.mxu3 %v3368_v11 }
0x1497   :  { %v3175_v29 = vpop.xlane.xlu1 %3174 }
0x1498   :  { %v3183_v31 = vsub.f32 %v3162_v24, %v3175_v29  ;;  %v3305_v29 = vperm.slane %v7076_v51, 3 }
0x149a   :  { %v5873_v32 = vpop.eup %5872  ;;  %v3188_v3 = vmul.f32 1.442695, %v3183_v31  ;;  %v3324_v31 = vadd.f32 %v3323_v27, %v3305_v29 }
0x149b   :  { %v3194_v1 = vsel %vm83_vm0, %v5873_v32, 0.0 }
0x149c   :  { %5874 = vpow2.f32 %v3188_v3  ;;  %3195 = vadd.xlane.f32.xlu1 %v3194_v1 }
0x149f   :  { %v3178_v33 = vpop.xlane.xlu2 %3177 }
0x14a0   :  { %v3184_v39 = vsub.f32 %v3165_v37, %v3178_v33 }
0x14a2   :  { %v5875_v41 = vpop.eup %5874  ;;  %v3190_v35 = vmul.f32 1.442695, %v3184_v39 }
0x14a3   :  { %v3197_v40 = vsel %vm83_vm0, %v5875_v41, 0.0 }
0x14a4   :  { %5876 = vpow2.f32 %v3190_v35  ;;  %3198 = vadd.xlane.f32.xlu2 %v3197_v40 }
0x14a7   :  { %v3181_v42 = vpop.xlane.xlu0 %3180 }
0x14a8   :  { %v3185_v43 = vsub.f32 %v3168_v59, %v3181_v42 }
0x14aa   :  { %v5877_v34 = vpop.eup %5876  ;;  %v3192_v38 = vmul.f32 1.442695, %v3185_v43 }
0x14ab   :  { %v3200_v56 = vsel %vm83_vm0, %v5877_v34, 0.0 }
0x14ac   :  { %5878 = vpow2.f32 %v3192_v38  ;;  %3201 = vadd.xlane.f32.xlu0 %v3200_v56 }
0x14b2   :  { %v5879_v57 = vpop.eup %5878 }
0x14b3   :  { %v3203_v55 = vsel %vm83_vm0, %v5879_v57, 0.0 }
0x14b4   :  { %3204 = vadd.xlane.f32.xlu1 %v3203_v55 }
0x150f   :  { %v3196_v58 = vpop.xlane.xlu1 %3195 }
0x1510   :  { %5880 = vrcp.f32 %v3196_v58 }
0x1516   :  { %v5881_v24 = vpop.eup %5880 }
0x1517   :  { %v3210_v13 = vmul.f32 %v5881_v24, %v5873_v32  ;;  %v3199_v20 = vpop.xlane.xlu2 %3198  ;;  %v3326_v32 = vpop.f32.mrf.mxu2 }
0x1518   :  { %5882 = vrcp.f32 %v3199_v20  ;;  %v3327_v1 = vadd.f32 %v3326_v32, %v3305_v29 }
0x1519   :  { %5559 = vmatmul.msk.f32.vlgmr.msrb.gmra.mxu3 %vm83_vm0, %v3210_v13 }
0x151e   :  { %v5883_v14 = vpop.eup %5882 }
0x151f   :  { %v3202_v37 = vpop.xlane.xlu0 %3201  ;;  %v3211_v62 = vmul.f32 %v5883_v14, %v5875_v41  ;;  %v3329_v39 = vpop.f32.mrf.mxu2 }
0x1520   :  { %5884 = vrcp.f32 %v3202_v37  ;;  %v3330_v41 = vadd.f32 %v3329_v39, %v3305_v29  ;;  %v3674_v39 = vld [vmem:[%s8078_s0 + $0x528] sm:$0xff] }
0x1521   :  { %5560 = vmatmul.msk.f32.gmra.mxu3 %vm83_vm0, %v3211_v62 }
0x1526   :  { %v5885_v61 = vpop.eup %5884 }
0x1527   :  { %v3205_v59 = vpop.xlane.xlu1 %3204  ;;  %v3212_v7 = vmul.f32 %v5885_v61, %v5877_v34  ;;  %v3332_v40 = vpop.f32.mrf.mxu2 }
0x1528   :  { %5886 = vrcp.f32 %v3205_v59  ;;  %v3333_v42 = vadd.f32 %v3332_v40, %v3305_v29  ;;  %v3671_v40 = vld [vmem:[%s8078_s0 + $0x510] sm:$0xff] }
0x1529   :  { %5561 = vmatmul.msk.f32.gmra.mxu3 %vm83_vm0, %v3212_v7 }
0x152e   :  { %v5887_v60 = vpop.eup %5886 }
0x152f   :  { %v3213_v2 = vmul.f32 %v5887_v60, %v5879_v57 }
0x1531   :  { %5562 = vmatmul.msk.f32.gmra.mxu3 %vm83_vm0, %v3213_v2 }
0x1539   :  { %5575 = vmatmul.msk.f32.vlgmr.msra.gmra.mxu3 %vm83_vm0, %v7020_v8 }
0x1541   :  { %5576 = vmatmul.msk.f32.gmra.mxu3 %vm83_vm0, %v7033_v50 }
0x1549   :  { %5577 = vmatmul.msk.f32.gmra.mxu3 %vm83_vm0, %v7043_v49 }
0x1551   :  { %5578 = vmatmul.msk.f32.gmra.mxu3 %vm83_vm0, %v7053_v15 }
0x159c   :  { %v3243_v47 = vpop.f32.mrf.mxu3 }
0x159d   :  { %5563 = vmatmul.msk.f32.vlgmr.msra.gmra.mxu1 %vm642_vm4, %v3243_v47 }
0x15a4   :  { %v3246_v22 = vpop.f32.mrf.mxu3 }
0x15a5   :  { %5564 = vmatmul.msk.f32.gmra.mxu1 %vm642_vm4, %v3246_v22 }
0x15ac   :  { %v3249_v23 = vpop.f32.mrf.mxu3 }
0x15ad   :  { %5565 = vmatmul.msk.f32.gmra.mxu1 %vm642_vm4, %v3249_v23 }
0x15b4   :  { %v3252_v0 = vpop.f32.mrf.mxu3 }
0x15b5   :  { %5566 = vmatmul.msk.f32.gmra.mxu1 %vm642_vm4, %v3252_v0 }
0x15bc   :  { %v3389_v3 = vpop.f32.mrf.mxu3 }
0x15bd   :  { %5583 = vmatmul.msk.f32.vlgmr.msrb.gmra.mxu1 %vm642_vm4, %v3324_v31 }
0x15c4   :  { %v3392_v33 = vpop.f32.mrf.mxu3 }
0x15c5   :  { %5584 = vmatmul.msk.f32.gmra.mxu1 %vm642_vm4, %v3327_v1 }
0x15cc   :  { %v3395_v35 = vpop.f32.mrf.mxu3 }
0x15cd   :  { %5585 = vmatmul.msk.f32.gmra.mxu1 %vm642_vm4, %v3330_v41  ;;  %v3673_v41 = vld [vmem:[%s8078_s0 + $0x520] sm:$0xff] }
0x15d4   :  { %v3398_v43 = vpop.f32.mrf.mxu3 }
0x15d5   :  { %5586 = vmatmul.msk.f32.gmra.mxu1 %vm642_vm4, %v3333_v42  ;;  %3522 = vmatpush.msrb.mxu2 %v3398_v43 }
0x15d7   :  { %3523 = vmatpush.msrb.mxu2 %v3395_v35  ;;  %v3672_v35 = vld [vmem:[%s8078_s0 + $0x518] sm:$0xff] }
0x15d9   :  { %3524 = vmatpush.msrb.mxu2 %v3392_v33 }
0x15db   :  { %3525 = vmatpush.msrb.mxu2 %v3389_v3 }
0x15dd   :  { %3699 = vmatpush.msra.mxu2 %v3674_v39  ;;  %v3626_v39 = vld [vmem:[%s8078_s0 + $0x4f8] sm:$0xff] }
0x15df   :  { %3700 = vmatpush.msra.mxu2 %v3673_v41 }
0x15e1   :  { %3701 = vmatpush.msra.mxu2 %v3672_v35 }
0x15e3   :  { %3702 = vmatpush.msra.mxu2 %v3671_v40 }
0x161a   :  { %v7357_v51 = vpop.f32.mrf.mxu1 }
0x1622   :  { %v7359_v34 = vpop.f32.mrf.mxu1 }
0x162a   :  { %v7361_v38 = vpop.f32.mrf.mxu1 }
0x1632   :  { %v7363_v56 = vpop.f32.mrf.mxu1 }
0x163a   :  { %v3442_v57 = vpop.f32.mrf.mxu1 }
0x163b   :  { %v3443_v55 = vadd.f32 %v3442_v57, %v7112_v5 }
0x163d   :  { %v3454_v58 = vsel %vm83_vm0, %v3443_v55, -inf }
0x163e   :  { %3455 = vmax.xlane.f32.xlu2 %v3454_v58 }
0x1642   :  { %v3445_v16 = vpop.f32.mrf.mxu1 }
0x1643   :  { %v3446_v6 = vadd.f32 %v3445_v16, %v7119_v46 }
0x1645   :  { %v3457_v10 = vsel %vm83_vm0, %v3446_v6, -inf }
0x1646   :  { %3458 = vmax.xlane.f32.xlu0 %v3457_v10 }
0x164a   :  { %v3448_v11 = vpop.f32.mrf.mxu1 }
0x164b   :  { %v3449_v24 = vadd.f32 %v3448_v11, %v7126_v21 }
0x164d   :  { %v3460_v13 = vsel %vm83_vm0, %v3449_v24, -inf }
0x164e   :  { %3461 = vmax.xlane.f32.xlu1 %v3460_v13 }
0x1652   :  { %v3451_v20 = vpop.f32.mrf.mxu1 }
0x1653   :  { %v3452_v14 = vadd.f32 %v3451_v20, %v7133_v12  ;;  %v3539_v20 = vld [vmem:[%s8078_s0 + $0x4d8] sm:$0xff] }
0x1654   :  { %3567 = vmatpush.msra.mxu0 %v3539_v20  ;;  %v3889_v20 = vld [vmem:[%s8078_s0 + $0x560] sm:$0xff] }
0x1655   :  { %v3463_v5 = vsel %vm83_vm0, %v3452_v14, -inf }
0x1656   :  { %3464 = vmax.xlane.f32.xlu2 %v3463_v5  ;;  %v3718_v5 = vld [vmem:[%s8078_s0 + $0x540] sm:$0xff] }
0x16b1   :  { %v3456_v37 = vpop.xlane.xlu2 %3455 }
0x16b2   :  { %v3466_v62 = vsub.f32 %v3443_v55, %v3456_v37  ;;  %v3717_v37 = vld [vmem:[%s8078_s0 + $0x538] sm:$0xff] }
0x16b4   :  { %v3470_v61 = vmul.f32 1.442695, %v3466_v62 }
0x16b6   :  { %5888 = vpow2.f32 %v3470_v61  ;;  %v3716_v61 = vld [vmem:[%s8078_s0 + $0x530] sm:$0xff] }
0x16b9   :  { %v3459_v46 = vpop.xlane.xlu0 %3458 }
0x16ba   :  { %v3467_v59 = vsub.f32 %v3446_v6, %v3459_v46 }
0x16bc   :  { %v5889_v7 = vpop.eup %5888  ;;  %v3472_v60 = vmul.f32 1.442695, %v3467_v59 }
0x16bd   :  { %v3478_v2 = vsel %vm83_vm0, %v5889_v7, 0.0 }
0x16be   :  { %5890 = vpow2.f32 %v3472_v60  ;;  %3479 = vadd.xlane.f32.xlu0 %v3478_v2  ;;  %v3925_v60 = vld [vmem:[%s8078_s0 + $0x590] sm:$0xff]  ;;  %v3924_v2 = vld [vmem:[%s8078_s0 + $0x588] sm:$0xff] }
0x16c1   :  { %v3462_v21 = vpop.xlane.xlu1 %3461 }
0x16c2   :  { %v3468_v47 = vsub.f32 %v3449_v24, %v3462_v21  ;;  %v3923_v21 = vld [vmem:[%s8078_s0 + $0x580] sm:$0xff] }
0x16c4   :  { %v5891_v22 = vpop.eup %5890  ;;  %v3474_v23 = vmul.f32 1.442695, %v3468_v47  ;;  %v3922_v47 = vld [vmem:[%s8078_s0 + $0x578] sm:$0xff] }
0x16c5   :  { %v3481_v12 = vsel %vm83_vm0, %v5891_v22, 0.0 }
0x16c6   :  { %5892 = vpow2.f32 %v3474_v23  ;;  %3482 = vadd.xlane.f32.xlu1 %v3481_v12 }
0x16c9   :  { %v3465_v27 = vpop.xlane.xlu2 %3464 }
0x16ca   :  { %v3469_v0 = vsub.f32 %v3452_v14, %v3465_v27  ;;  %v3719_v14 = vld [vmem:[%s8078_s0 + $0x548] sm:$0xff] }
0x16cb   :  { %3732 = vmatpush.msrb.mxu0 %v3719_v14  ;;  %v5999_v14 = vld [vmem:[%s8078_s0 + $0x18] sm:$0xff] }
0x16cc   :  { %v5893_v29 = vpop.eup %5892  ;;  %v3476_v31 = vmul.f32 1.442695, %v3469_v0  ;;  %v3628_v0 = vld [vmem:[%s8078_s0 + $0x508] sm:$0xff] }
0x16cd   :  { %v3484_v32 = vsel %vm83_vm0, %v5893_v29, 0.0  ;;  %3733 = vmatpush.msrb.mxu0 %v3718_v5  ;;  %3654 = vmatpush.msra.mxu1 %v3628_v0  ;;  %v3888_v5 = vld [vmem:[%s8078_s0 + $0x558] sm:$0xff] }
0x16ce   :  { %5894 = vpow2.f32 %v3476_v31  ;;  %3485 = vadd.xlane.f32.xlu2 %v3484_v32  ;;  %v3012_v31 = vadd.f32 %v7301_v18, %v7293_v19  ;;  %v3627_v32 = vld [vmem:[%s8078_s0 + $0x500] sm:$0xff]  ;;  %v3625_v19 = vld [vmem:[%s8078_s0 + $0x4f0] sm:$0xff]  ;;  %v3006_v18 = vadd.f32 %v7297_v54, %v7289_v17 }
0x16cf   :  { %3734 = vmatpush.msrb.mxu0 %v3717_v37  ;;  %3655 = vmatpush.msra.mxu1 %v3627_v32 }
0x16d1   :  { %3735 = vmatpush.msrb.mxu0 %v3716_v61  ;;  %3656 = vmatpush.msra.mxu1 %v3626_v39 }
0x16d3   :  { %3657 = vmatpush.msra.mxu1 %v3625_v19 }
0x16d4   :  { %v5895_v3 = vpop.eup %5894 }
0x16d5   :  { %v3487_v1 = vsel %vm83_vm0, %v5895_v3, 0.0 }
0x16d6   :  { %3488 = vadd.xlane.f32.xlu0 %v3487_v1  ;;  %v3015_v1 = vadd.f32 %v7303_v4, %v7295_v53  ;;  %v3297_v4 = vadd.f32 %v7357_v51, %v3006_v18  ;;  %v7572_v18 = vld [vmem:[%s8078_s0 + $0x50] sm:$0xff] }
0x1731   :  { %v3480_v33 = vpop.xlane.xlu0 %3479 }
0x1732   :  { %5896 = vrcp.f32 %v3480_v33  ;;  %v3299_v33 = vadd.f32 %v7361_v38, %v3012_v31  ;;  %v5746_v38 = vld [vmem:[%s8078_s0 + $0x4e8] ss:$0 sm:$0xff] }
0x1738   :  { %v5897_v42 = vpop.eup %5896 }
0x1739   :  { %v3494_v43 = vmul.f32 %v5897_v42, %v5889_v7  ;;  %v3483_v57 = vpop.xlane.xlu1 %3482 }
0x173a   :  { %5898 = vrcp.f32 %v3483_v57 }
0x173b   :  { %5587 = vmatmul.msk.f32.vlgmr.msrb.gmra.mxu2 %vm83_vm0, %v3494_v43 }
0x1740   :  { %v5899_v55 = vpop.eup %5898 }
0x1741   :  { %v3486_v58 = vpop.xlane.xlu2 %3485  ;;  %v3495_v16 = vmul.f32 %v5899_v55, %v5891_v22 }
0x1742   :  { %5900 = vrcp.f32 %v3486_v58 }
0x1743   :  { %5588 = vmatmul.msk.f32.gmra.mxu2 %vm83_vm0, %v3495_v16 }
0x1748   :  { %v5901_v6 = vpop.eup %5900 }
0x1749   :  { %v3489_v10 = vpop.xlane.xlu0 %3488  ;;  %v3496_v11 = vmul.f32 %v5901_v6, %v5893_v29 }
0x174a   :  { %5902 = vrcp.f32 %v3489_v10  ;;  %v5996_v10 = vld [vmem:[%s8078_s0] sm:$0xff] }
0x174b   :  { %5589 = vmatmul.msk.f32.gmra.mxu2 %vm83_vm0, %v3496_v11 }
0x1750   :  { %v5903_v24 = vpop.eup %5902 }
0x1751   :  { %v3497_v13 = vmul.f32 %v5903_v24, %v5895_v3  ;;  %v3009_v3 = vadd.f32 %v7299_v52, %v7291_v48  ;;  %v3300_v48 = vadd.f32 %v7363_v56, %v3015_v1  ;;  %v3891_v24 = vld [vmem:[%s8078_s0 + $0x570] sm:$0xff] }
0x1752   :  { %3905 = vmatpush.msrb.mxu2 %v3891_v24 }
0x1753   :  { %5590 = vmatmul.msk.f32.gmra.mxu2 %vm83_vm0, %v3497_v13  ;;  %v3298_v41 = vadd.f32 %v7359_v34, %v3009_v3  ;;  %v3890_v13 = vld [vmem:[%s8078_s0 + $0x568] sm:$0xff] }
0x1754   :  { %3906 = vmatpush.msrb.mxu2 %v3890_v13 }
0x1756   :  { %3907 = vmatpush.msrb.mxu2 %v3889_v20 }
0x1758   :  { %3908 = vmatpush.msrb.mxu2 %v3888_v5 }
0x175b   :  { %5603 = vmatmul.msk.f32.vlgmr.msra.gmra.mxu2 %vm83_vm0, %v6967_v63 }
0x1763   :  { %5604 = vmatmul.msk.f32.gmra.mxu2 %vm83_vm0, %v7005_v45 }
0x176b   :  { %5605 = vmatmul.msk.f32.gmra.mxu2 %vm83_vm0, %v7007_v9 }
0x1773   :  { %5606 = vmatmul.msk.f32.gmra.mxu2 %vm83_vm0, %v7009_v36 }
0x17be   :  { %v3527_v62 = vpop.f32.mrf.mxu2 }
0x17bf   :  { %5591 = vmatmul.msk.f32.vlgmr.msra.gmra.mxu0 %vm642_vm4, %v3527_v62 }
0x17c0   :  { %3938 = vmatpush.msra.mxu0 %v3925_v60 }
0x17c2   :  { %3939 = vmatpush.msra.mxu0 %v3924_v2 }
0x17c4   :  { %3940 = vmatpush.msra.mxu0 %v3923_v21  ;;  %v7542_v21 = vld [vmem:[%s8078_s0 + $0x690] sm:$0xf] }
0x17c6   :  { %v3530_v46 = vpop.f32.mrf.mxu2  ;;  %3941 = vmatpush.msra.mxu0 %v3922_v47  ;;  %v3958_v47 = vld [vmem:[%s8078_s0 + $0x5b0] sm:$0xff] }
0x17c7   :  { %5592 = vmatmul.msk.f32.gmra.mxu0 %vm642_vm4, %v3530_v46 }
0x17ce   :  { %v3533_v59 = vpop.f32.mrf.mxu2 }
0x17cf   :  { %5593 = vmatmul.msk.f32.gmra.mxu0 %vm642_vm4, %v3533_v59 }
0x17d6   :  { %v3536_v7 = vpop.f32.mrf.mxu2 }
0x17d7   :  { %5594 = vmatmul.msk.f32.gmra.mxu0 %vm642_vm4, %v3536_v7 }
0x17de   :  { %v3704_v23 = vpop.f32.mrf.mxu2 }
0x17df   :  { %5607 = vmatmul.msk.f32.vlgmr.msrb.gmra.mxu0 %vm83_vm0, %v6967_v63 }
0x17e6   :  { %v3707_v29 = vpop.f32.mrf.mxu2 }
0x17e7   :  { %5608 = vmatmul.msk.f32.gmra.mxu0 %vm83_vm0, %v7005_v45 }
0x17ee   :  { %v3710_v17 = vpop.f32.mrf.mxu2 }
0x17ef   :  { %5609 = vmatmul.msk.f32.gmra.mxu0 %vm83_vm0, %v7007_v9 }
0x17f6   :  { %v3713_v6 = vpop.f32.mrf.mxu2 }
0x17f7   :  { %5610 = vmatmul.msk.f32.gmra.mxu0 %vm83_vm0, %v7009_v36 }
0x17ff   :  { %5627 = vmatmul.msk.f32.vlgmr.msra.gmra.mxu0 %vm83_vm0, %v6967_v63 }
0x1807   :  { %5628 = vmatmul.msk.f32.gmra.mxu0 %vm83_vm0, %v7005_v45 }
0x180f   :  { %5629 = vmatmul.msk.f32.gmra.mxu0 %vm83_vm0, %v7007_v9 }
0x1817   :  { %5630 = vmatmul.msk.f32.gmra.mxu0 %vm83_vm0, %v7009_v36 }
0x183c   :  { %v3569_v22 = vpop.f32.mrf.mxu0 }
0x183d   :  { %v3581_v42 = vadd.f32 %v3569_v22, %v3297_v4  ;;  %v3629_v22 = vperm.slane %v7542_v21, 0 }
0x183f   :  { %v3587_v56 = vadd.f32 %v5746_v38, %v3581_v42 }
0x1841   :  { %v3591_v16 = vadd.f32 %v3587_v56, %v7020_v8 }
0x1844   :  { %v3572_v12 = vpop.f32.mrf.mxu0 }
0x1845   :  { %v3582_v35 = vadd.f32 %v3572_v12, %v3298_v41  ;;  %v3956_v12 = vld [vmem:[%s8078_s0 + $0x5a0] sm:$0xff] }
0x1847   :  { %v3588_v54 = vadd.f32 %v5746_v38, %v3582_v35 }
0x1849   :  { %v3592_v51 = vadd.f32 %v3588_v54, %v7033_v50  ;;  %v5997_v50 = vld [vmem:[%s8078_s0 + $0x8] sm:$0xff] }
0x184c   :  { %v3575_v27 = vpop.f32.mrf.mxu0 }
0x184d   :  { %v3583_v52 = vadd.f32 %v3575_v27, %v3299_v33 }
0x184f   :  { %v3589_v43 = vadd.f32 %v5746_v38, %v3583_v52 }
0x1851   :  { %v3593_v55 = vadd.f32 %v3589_v43, %v7043_v49  ;;  %v5998_v49 = vld [vmem:[%s8078_s0 + $0x10] sm:$0xff] }
0x1854   :  { %v3578_v53 = vpop.f32.mrf.mxu0 }
0x1855   :  { %v3584_v40 = vadd.f32 %v3578_v53, %v3300_v48  ;;  %v7579_v53 = vld [vmem:[%s8078_s0 + $0x58] sm:$0xff] }
0x1857   :  { %v3590_v57 = vadd.f32 %v5746_v38, %v3584_v40  ;;  %v7586_v40 = vld [vmem:[%s8078_s0 + $0x60] sm:$0xff] }
0x1859   :  { %v3594_v34 = vadd.f32 %v3590_v57, %v7053_v15 }
0x185b   :  { %3607 = vmatpush.msrb.mxu3 %v3594_v34 }
0x185c   :  { %v3737_v58 = vpop.f32.mrf.mxu0 }
0x185d   :  { %3608 = vmatpush.msrb.mxu3 %v3593_v55 }
0x185f   :  { %3609 = vmatpush.msrb.mxu3 %v3592_v51 }
0x1861   :  { %3610 = vmatpush.msrb.mxu3 %v3591_v16 }
0x1862   :  { %5595 = vmatmul.msk.f32.vlgmr.msrb.gmra.mxu3 %vm83_vm0, %v5996_v10 }
0x1863   :  { %5611 = vmatpush.xpose.msk.msra.mxu3 %vm642_vm4, %v3713_v6 }
0x1864   :  { %v3740_v15 = vpop.f32.mrf.mxu0 }
0x1867   :  { %5612 = vmatpush.xpose.msk.msra.mxu3 %vm642_vm4, %v3710_v17  ;;  %v7593_v17 = vld [vmem:[%s8078_s0 + $0x68] sm:$0xff] }
0x186a   :  { %5596 = vmatmul.msk.f32.gmra.mxu3 %vm83_vm0, %v5997_v50 }
0x186b   :  { %5613 = vmatpush.xpose.msk.msra.mxu3 %vm642_vm4, %v3707_v29  ;;  %v3955_v29 = vld [vmem:[%s8078_s0 + $0x598] sm:$0xff] }
0x186c   :  { %v3743_v8 = vpop.f32.mrf.mxu0 }
0x186f   :  { %5614 = vmatpush.xpose.msk.msra.mxu3 %vm642_vm4, %v3704_v23  ;;  %v3957_v23 = vld [vmem:[%s8078_s0 + $0x5a8] sm:$0xff] }
0x1872   :  { %5597 = vmatmul.msk.f32.gmra.mxu3 %vm83_vm0, %v5998_v49 }
0x1873   :  { %3971 = vmatpush.msrb.mxu3 %v3958_v47 }
0x1874   :  { %v3746_v11 = vpop.f32.mrf.mxu0 }
0x1875   :  { %3870 = vmatpush.msrb.mxu1 %v3746_v11  ;;  %3972 = vmatpush.msrb.mxu3 %v3957_v23 }
0x1877   :  { %3871 = vmatpush.msrb.mxu1 %v3743_v8  ;;  %3973 = vmatpush.msrb.mxu3 %v3956_v12 }
0x1879   :  { %3872 = vmatpush.msrb.mxu1 %v3740_v15  ;;  %3974 = vmatpush.msrb.mxu3 %v3955_v29 }
0x187a   :  { %5598 = vmatmul.msk.f32.gmra.mxu3 %vm83_vm0, %v5999_v14 }
0x187b   :  { %3873 = vmatpush.msrb.mxu1 %v3737_v58 }
0x187c   :  { %v3943_v37 = vpop.f32.mrf.mxu0 }
0x1884   :  { %v3946_v62 = vpop.f32.mrf.mxu0 }
0x188c   :  { %v3949_v61 = vpop.f32.mrf.mxu0 }
0x1894   :  { %v3952_v59 = vpop.f32.mrf.mxu0 }
0x18e5   :  { %v7511_v46 = vpop.f32.mrf.mxu3 }
0x18e6   :  { %5599 = vmatmul.msk.f32.vlgmr.msra.gmra.mxu1 %vm83_vm0, %v7511_v46  ;;  %5623 = vmatmul.msk.f32.vlgmr.msrb.gmra.mxu2 %vm83_vm0, %v7511_v46 }
0x18e7   :  { %5635 = vmatpush.xpose.msk.msra.mxu1 %vm642_vm4, %v3952_v59 }
0x18eb   :  { %5636 = vmatpush.xpose.msk.msra.mxu1 %vm642_vm4, %v3949_v61 }
0x18ed   :  { %v7519_v7 = vpop.f32.mrf.mxu3 }
0x18ee   :  { %5600 = vmatmul.msk.f32.gmra.mxu1 %vm83_vm0, %v7519_v7  ;;  %5624 = vmatmul.msk.f32.gmra.mxu2 %vm83_vm0, %v7519_v7 }
0x18ef   :  { %5637 = vmatpush.xpose.msk.msra.mxu1 %vm642_vm4, %v3946_v62 }
0x18f3   :  { %5638 = vmatpush.xpose.msk.msra.mxu1 %vm642_vm4, %v3943_v37 }
0x18f5   :  { %v7527_v60 = vpop.f32.mrf.mxu3 }
0x18f6   :  { %5601 = vmatmul.msk.f32.gmra.mxu1 %vm83_vm0, %v7527_v60  ;;  %5625 = vmatmul.msk.f32.gmra.mxu2 %vm83_vm0, %v7527_v60 }
0x18fd   :  { %v7533_v2 = vpop.f32.mrf.mxu3 }
0x18fe   :  { %5602 = vmatmul.msk.f32.gmra.mxu1 %vm83_vm0, %v7533_v2  ;;  %5626 = vmatmul.msk.f32.gmra.mxu2 %vm83_vm0, %v7533_v2 }
0x1963   :  { %v3659_v27 = vpop.f32.mrf.mxu1 }
0x1964   :  { %v3660_v0 = vadd.f32 %v3659_v27, %v3629_v22 }
0x1966   :  { %5615 = vmatmul.msk.f32.vlgmr.msra.gmra.mxu3 %vm642_vm4, %v3660_v0 }
0x196b   :  { %v3662_v31 = vpop.f32.mrf.mxu1 }
0x196c   :  { %v3663_v32 = vadd.f32 %v3662_v31, %v3629_v22 }
0x196e   :  { %5616 = vmatmul.msk.f32.gmra.mxu3 %vm642_vm4, %v3663_v32 }
0x1973   :  { %v3665_v3 = vpop.f32.mrf.mxu1 }
0x1974   :  { %v3666_v1 = vadd.f32 %v3665_v3, %v3629_v22 }
0x1976   :  { %5617 = vmatmul.msk.f32.gmra.mxu3 %vm642_vm4, %v3666_v1 }
0x197b   :  { %v3668_v33 = vpop.f32.mrf.mxu1 }
0x197c   :  { %v3669_v39 = vadd.f32 %v3668_v33, %v3629_v22 }
0x197e   :  { %5618 = vmatmul.msk.f32.gmra.mxu3 %vm642_vm4, %v3669_v39 }
0x1986   :  { %5631 = vmatmul.msk.f32.vlgmr.msrb.gmra.mxu3 %vm83_vm0, %v6967_v63 }
0x198e   :  { %5632 = vmatmul.msk.f32.gmra.mxu3 %vm83_vm0, %v7005_v45 }
0x1996   :  { %5633 = vmatmul.msk.f32.gmra.mxu3 %vm83_vm0, %v7007_v9 }
0x199e   :  { %5634 = vmatmul.msk.f32.gmra.mxu3 %vm83_vm0, %v7009_v36 }
0x19e9   :  { %v3790_v19 = vpop.f32.mrf.mxu3 }
0x19ea   :  { %v3791_v41 = vadd.f32 %v7572_v18, %v3790_v19 }
0x19ec   :  { %v3802_v48 = vsel %vm83_vm0, %v3791_v41, -inf }
0x19ed   :  { %3803 = vmax.xlane.f32.xlu1 %v3802_v48 }
0x19f1   :  { %v3793_v52 = vpop.f32.mrf.mxu3 }
0x19f2   :  { %v3794_v4 = vadd.f32 %v7579_v53, %v3793_v52  ;;  %v4212_v52 = vld [vmem:[%s8078_s0 + $0x5d8] sm:$0xff] }
0x19f4   :  { %v3805_v38 = vsel %vm83_vm0, %v3794_v4, -inf }
0x19f5   :  { %3806 = vmax.xlane.f32.xlu2 %v3805_v38  ;;  %v3892_v38 = vperm.slane %v7542_v21, 1 }
0x19f9   :  { %v3796_v35 = vpop.f32.mrf.mxu3 }
0x19fa   :  { %v3797_v42 = vadd.f32 %v7586_v40, %v3796_v35  ;;  %v4210_v35 = vld [vmem:[%s8078_s0 + $0x5c8] sm:$0xff] }
0x19fc   :  { %v3808_v43 = vsel %vm83_vm0, %v3797_v42, -inf }
0x19fd   :  { %3809 = vmax.xlane.f32.xlu0 %v3808_v43 }
0x1a01   :  { %v3799_v57 = vpop.f32.mrf.mxu3 }
0x1a02   :  { %v3800_v54 = vadd.f32 %v7593_v17, %v3799_v57 }
0x1a04   :  { %v3811_v34 = vsel %vm83_vm0, %v3800_v54, -inf }
0x1a05   :  { %3812 = vmax.xlane.f32.xlu1 %v3811_v34 }
0x1a09   :  { %v3976_v56 = vpop.f32.mrf.mxu3 }
0x1a11   :  { %v3979_v55 = vpop.f32.mrf.mxu3 }
0x1a19   :  { %v3982_v58 = vpop.f32.mrf.mxu3 }
0x1a21   :  { %v3985_v51 = vpop.f32.mrf.mxu3 }
0x1a22   :  { %4109 = vmatpush.msra.mxu2 %v3985_v51  ;;  %v3887_v51 = vld [vmem:[%s8078_s0 + $0x550] sm:$0xff] }
0x1a23   :  { %4195 = vmatpush.msra.mxu3 %v3887_v51 }
0x1a24   :  { %4110 = vmatpush.msra.mxu2 %v3982_v58 }
0x1a26   :  { %4111 = vmatpush.msra.mxu2 %v3979_v55 }
0x1a28   :  { %4112 = vmatpush.msra.mxu2 %v3976_v56 }
0x1a60   :  { %v3804_v16 = vpop.xlane.xlu1 %3803 }
0x1a61   :  { %v3814_v6 = vsub.f32 %v3791_v41, %v3804_v16  ;;  %v3910_v41 = vpop.f32.mrf.mxu2 }
0x1a62   :  { %v3911_v43 = vadd.f32 %v3910_v41, %v3892_v38 }
0x1a63   :  { %v3818_v10 = vmul.f32 1.442695, %v3814_v6 }
0x1a65   :  { %5904 = vpow2.f32 %v3818_v10 }
0x1a68   :  { %v3807_v15 = vpop.xlane.xlu2 %3806 }
0x1a69   :  { %v3815_v50 = vsub.f32 %v3794_v4, %v3807_v15  ;;  %v4211_v4 = vld [vmem:[%s8078_s0 + $0x5d0] sm:$0xff]  ;;  %v3913_v57 = vpop.f32.mrf.mxu2 }
0x1a6b   :  { %v5905_v8 = vpop.eup %5904  ;;  %v3820_v49 = vmul.f32 1.442695, %v3815_v50 }
0x1a6c   :  { %v3826_v11 = vsel %vm83_vm0, %v5905_v8, 0.0 }
0x1a6d   :  { %5906 = vpow2.f32 %v3820_v49  ;;  %3827 = vadd.xlane.f32.xlu2 %v3826_v11 }
0x1a70   :  { %v3810_v24 = vpop.xlane.xlu0 %3809 }
0x1a71   :  { %v3816_v13 = vsub.f32 %v3797_v42, %v3810_v24  ;;  %v4209_v42 = vld [vmem:[%s8078_s0 + $0x5c0] sm:$0xff]  ;;  %v3916_v34 = vpop.f32.mrf.mxu2 }
0x1a72   :  { %v3917_v56 = vadd.f32 %v3916_v34, %v3892_v38 }
0x1a73   :  { %v5907_v20 = vpop.eup %5906  ;;  %v3822_v14 = vmul.f32 1.442695, %v3816_v13 }
0x1a74   :  { %v3829_v5 = vsel %vm83_vm0, %v5907_v20, 0.0 }
0x1a75   :  { %5908 = vpow2.f32 %v3822_v14  ;;  %3830 = vadd.xlane.f32.xlu0 %v3829_v5 }
0x1a78   :  { %v3813_v37 = vpop.xlane.xlu1 %3812 }
0x1a79   :  { %v3817_v62 = vsub.f32 %v3800_v54, %v3813_v37  ;;  %v3914_v54 = vadd.f32 %v3913_v57, %v3892_v38  ;;  %v3919_v55 = vpop.f32.mrf.mxu2  ;;  %v4244_v57 = vld [vmem:[%s8078_s0 + $0x5e8] sm:$0xff] }
0x1a7a   :  { %v3920_v58 = vadd.f32 %v3919_v55, %v3892_v38 }
0x1a7b   :  { %v5909_v61 = vpop.eup %5908  ;;  %v3824_v59 = vmul.f32 1.442695, %v3817_v62 }
0x1a7c   :  { %v3832_v47 = vsel %vm83_vm0, %v5909_v61, 0.0 }
0x1a7d   :  { %5910 = vpow2.f32 %v3824_v59  ;;  %3833 = vadd.xlane.f32.xlu1 %v3832_v47 }
0x1a83   :  { %v5911_v22 = vpop.eup %5910 }
0x1a84   :  { %v3835_v23 = vsel %vm83_vm0, %v5911_v22, 0.0 }
0x1a85   :  { %3836 = vadd.xlane.f32.xlu2 %v3835_v23 }
0x1ae0   :  { %v3828_v12 = vpop.xlane.xlu2 %3827 }
0x1ae1   :  { %5912 = vrcp.f32 %v3828_v12 }
0x1ae7   :  { %v5913_v27 = vpop.eup %5912 }
0x1ae8   :  { %v3842_v0 = vmul.f32 %v5913_v27, %v5905_v8  ;;  %v3831_v29 = vpop.xlane.xlu0 %3830 }
0x1ae9   :  { %5914 = vrcp.f32 %v3831_v29 }
0x1aea   :  { %5619 = vmatmul.msk.f32.vlgmr.msrb.gmra.mxu1 %vm83_vm0, %v3842_v0 }
0x1aeb   :  { %4226 = vmatpush.msrb.mxu1 %v4212_v52 }
0x1aed   :  { %4227 = vmatpush.msrb.mxu1 %v4211_v4 }
0x1aef   :  { %v5915_v31 = vpop.eup %5914  ;;  %4228 = vmatpush.msrb.mxu1 %v4210_v35 }
0x1af0   :  { %v3834_v32 = vpop.xlane.xlu1 %3833  ;;  %v3843_v3 = vmul.f32 %v5915_v31, %v5907_v20 }
0x1af1   :  { %5916 = vrcp.f32 %v3834_v32  ;;  %4229 = vmatpush.msrb.mxu1 %v4209_v42  ;;  %v4246_v42 = vld [vmem:[%s8078_s0 + $0x5f8] sm:$0xff] }
0x1af2   :  { %5620 = vmatmul.msk.f32.gmra.mxu1 %vm83_vm0, %v3843_v3  ;;  %4259 = vmatpush.msrb.mxu2 %v4246_v42 }
0x1af7   :  { %v5917_v1 = vpop.eup %5916 }
0x1af8   :  { %v3837_v33 = vpop.xlane.xlu2 %3836  ;;  %v3844_v39 = vmul.f32 %v5917_v1, %v5909_v61 }
0x1af9   :  { %5918 = vrcp.f32 %v3837_v33 }
0x1afa   :  { %5621 = vmatmul.msk.f32.gmra.mxu1 %vm83_vm0, %v3844_v39 }
0x1aff   :  { %v5919_v19 = vpop.eup %5918 }
0x1b00   :  { %v3845_v48 = vmul.f32 %v5919_v19, %v5911_v22 }
0x1b02   :  { %5622 = vmatmul.msk.f32.gmra.mxu1 %vm83_vm0, %v3845_v48 }
0x1b0a   :  { %5639 = vmatmul.msk.f32.vlgmr.msra.gmra.mxu1 %vm642_vm4, %v3911_v43  ;;  %v4245_v43 = vld [vmem:[%s8078_s0 + $0x5f0] sm:$0xff] }
0x1b0b   :  { %4260 = vmatpush.msrb.mxu2 %v4245_v43 }
0x1b0d   :  { %4261 = vmatpush.msrb.mxu2 %v4244_v57 }
0x1b12   :  { %5640 = vmatmul.msk.f32.gmra.mxu1 %vm642_vm4, %v3914_v54  ;;  %v4243_v54 = vld [vmem:[%s8078_s0 + $0x5e0] sm:$0xff] }
0x1b13   :  { %4262 = vmatpush.msrb.mxu2 %v4243_v54 }
0x1b1a   :  { %5641 = vmatmul.msk.f32.gmra.mxu1 %vm642_vm4, %v3917_v56 }
0x1b22   :  { %5642 = vmatmul.msk.f32.gmra.mxu1 %vm642_vm4, %v3920_v58 }
0x1b2a   :  { %5655 = vmatmul.msk.f32.vlgmr.msrb.gmra.mxu1 %vm83_vm0, %v7511_v46 }
0x1b32   :  { %5656 = vmatmul.msk.f32.gmra.mxu1 %vm83_vm0, %v7519_v7 }
0x1b3a   :  { %5657 = vmatmul.msk.f32.gmra.mxu1 %vm83_vm0, %v7527_v60 }
0x1b42   :  { %5658 = vmatmul.msk.f32.gmra.mxu1 %vm83_vm0, %v7533_v2 }
0x1b67   :  { %v3875_v16 = vpop.f32.mrf.mxu1 }
0x1b68   :  { %5651 = vmatmul.msk.f32.vlgmr.msra.gmra.mxu3 %vm642_vm4, %v3875_v16 }
0x1b6f   :  { %v3878_v6 = vpop.f32.mrf.mxu1 }
0x1b70   :  { %5652 = vmatmul.msk.f32.gmra.mxu3 %vm642_vm4, %v3878_v6 }
0x1b77   :  { %v3881_v10 = vpop.f32.mrf.mxu1 }
0x1b78   :  { %5653 = vmatmul.msk.f32.gmra.mxu3 %vm642_vm4, %v3881_v10 }
0x1b7f   :  { %v3884_v15 = vpop.f32.mrf.mxu1 }
0x1b80   :  { %5654 = vmatmul.msk.f32.gmra.mxu3 %vm642_vm4, %v3884_v15 }
0x1b87   :  { %v4029_v50 = vpop.f32.mrf.mxu1 }
0x1b88   :  { %v4030_v8 = vadd.f32 %v7572_v18, %v4029_v50 }
0x1b8a   :  { %v4041_v49 = vsel %vm83_vm0, %v4030_v8, -inf }
0x1b8b   :  { %4042 = vmax.xlane.f32.xlu0 %v4041_v49  ;;  %v4126_v49 = vld [vmem:[%s8078_s0 + $0x5b8] sm:$0xff] }
0x1b8c   :  { %4154 = vmatpush.msrb.mxu0 %v4126_v49 }
0x1b8f   :  { %v4032_v11 = vpop.f32.mrf.mxu1 }
0x1b90   :  { %v4033_v24 = vadd.f32 %v7579_v53, %v4032_v11  ;;  %v4279_v11 = vld [vmem:[%s8078_s0 + $0x618] sm:$0xff] }
0x1b91   :  { %4292 = vmatpush.msra.mxu0 %v4279_v11 }
0x1b92   :  { %v4044_v13 = vsel %vm83_vm0, %v4033_v24, -inf }
0x1b93   :  { %4045 = vmax.xlane.f32.xlu1 %v4044_v13  ;;  %v4277_v13 = vld [vmem:[%s8078_s0 + $0x608] sm:$0xff] }
0x1b97   :  { %v4035_v20 = vpop.f32.mrf.mxu1 }
0x1b98   :  { %v4036_v14 = vadd.f32 %v7586_v40, %v4035_v20 }
0x1b9a   :  { %v4047_v5 = vsel %vm83_vm0, %v4036_v14, -inf }
0x1b9b   :  { %4048 = vmax.xlane.f32.xlu2 %v4047_v5 }
0x1b9f   :  { %v4038_v37 = vpop.f32.mrf.mxu1 }
0x1ba0   :  { %v4039_v62 = vadd.f32 %v7593_v17, %v4038_v37 }
0x1ba2   :  { %v4050_v61 = vsel %vm83_vm0, %v4039_v62, -inf }
0x1ba3   :  { %4051 = vmax.xlane.f32.xlu0 %v4050_v61  ;;  %v4496_v61 = vld [vmem:[%s8078_s0 + $0x640] sm:$0xff] }
0x1bfe   :  { %v4043_v59 = vpop.xlane.xlu0 %4042 }
0x1bff   :  { %v4053_v47 = vsub.f32 %v4030_v8, %v4043_v59  ;;  %v4495_v59 = vld [vmem:[%s8078_s0 + $0x638] sm:$0xff] }
0x1c01   :  { %v4057_v22 = vmul.f32 1.442695, %v4053_v47  ;;  %v4494_v47 = vld [vmem:[%s8078_s0 + $0x630] sm:$0xff] }
0x1c03   :  { %5920 = vpow2.f32 %v4057_v22  ;;  %v4493_v22 = vld [vmem:[%s8078_s0 + $0x628] sm:$0xff] }
0x1c06   :  { %v4046_v23 = vpop.xlane.xlu1 %4045 }
0x1c07   :  { %v4054_v12 = vsub.f32 %v4033_v24, %v4046_v23  ;;  %v4278_v24 = vld [vmem:[%s8078_s0 + $0x610] sm:$0xff] }
0x1c08   :  { %4293 = vmatpush.msra.mxu0 %v4278_v24 }
0x1c09   :  { %v5921_v27 = vpop.eup %5920  ;;  %v4059_v0 = vmul.f32 1.442695, %v4054_v12 }
0x1c0a   :  { %v4065_v29 = vsel %vm83_vm0, %v5921_v27, 0.0  ;;  %4294 = vmatpush.msra.mxu0 %v4277_v13 }
0x1c0b   :  { %5922 = vpow2.f32 %v4059_v0  ;;  %4066 = vadd.xlane.f32.xlu1 %v4065_v29  ;;  %v4231_v29 = vpop.f32.mrf.mxu1 }
0x1c0e   :  { %v4049_v31 = vpop.xlane.xlu2 %4048 }
0x1c0f   :  { %v4055_v32 = vsub.f32 %v4036_v14, %v4049_v31  ;;  %v4276_v14 = vld [vmem:[%s8078_s0 + $0x600] sm:$0xff]  ;;  %v4213_v31 = vperm.slane %v7542_v21, 2 }
0x1c10   :  { %4295 = vmatpush.msra.mxu0 %v4276_v14 }
0x1c11   :  { %v5923_v3 = vpop.eup %5922  ;;  %v4061_v1 = vmul.f32 1.442695, %v4055_v32  ;;  %v4530_v32 = vld [vmem:[%s8078_s0 + $0x660] sm:$0xff] }
0x1c12   :  { %v4068_v33 = vsel %vm83_vm0, %v5923_v3, 0.0 }
0x1c13   :  { %5924 = vpow2.f32 %v4061_v1  ;;  %4069 = vadd.xlane.f32.xlu2 %v4068_v33  ;;  %v4529_v1 = vld [vmem:[%s8078_s0 + $0x658] sm:$0xff]  ;;  %v4234_v33 = vpop.f32.mrf.mxu1 }
0x1c16   :  { %v4052_v39 = vpop.xlane.xlu0 %4051 }
0x1c17   :  { %v4056_v19 = vsub.f32 %v4039_v62, %v4052_v39  ;;  %v4528_v39 = vld [vmem:[%s8078_s0 + $0x650] sm:$0xff] }
0x1c19   :  { %v5925_v41 = vpop.eup %5924  ;;  %v4063_v48 = vmul.f32 1.442695, %v4056_v19  ;;  %v4527_v19 = vld [vmem:[%s8078_s0 + $0x648] sm:$0xff] }
0x1c1a   :  { %v4071_v52 = vsel %vm83_vm0, %v5925_v41, 0.0 }
0x1c1b   :  { %5926 = vpow2.f32 %v4063_v48  ;;  %4072 = vadd.xlane.f32.xlu0 %v4071_v52  ;;  %v4237_v48 = vpop.f32.mrf.mxu1 }
0x1c1c   :  { %v4238_v52 = vadd.f32 %v4237_v48, %v4213_v31 }
0x1c21   :  { %v5927_v4 = vpop.eup %5926 }
0x1c22   :  { %v4074_v38 = vsel %vm83_vm0, %v5927_v4, 0.0 }
0x1c23   :  { %4075 = vadd.xlane.f32.xlu1 %v4074_v38 }
0x1c7e   :  { %v4067_v35 = vpop.xlane.xlu1 %4066 }
0x1c7f   :  { %5928 = vrcp.f32 %v4067_v35  ;;  %v7745_v35 = vpop.f32.mrf.mxu3 }
0x1c85   :  { %v5929_v34 = vpop.eup %5928 }
0x1c86   :  { %v4081_v56 = vmul.f32 %v5929_v34, %v5921_v27  ;;  %v4070_v55 = vpop.xlane.xlu2 %4069 }
0x1c87   :  { %5930 = vrcp.f32 %v4070_v55  ;;  %v7753_v43 = vpop.f32.mrf.mxu3 }
0x1c88   :  { %5643 = vmatmul.msk.f32.vlgmr.msra.gmra.mxu2 %vm83_vm0, %v4081_v56 }
0x1c8d   :  { %v5931_v58 = vpop.eup %5930 }
0x1c8e   :  { %v4073_v51 = vpop.xlane.xlu0 %4072  ;;  %v4082_v16 = vmul.f32 %v5931_v58, %v5923_v3  ;;  %v4232_v3 = vadd.f32 %v4231_v29, %v4213_v31 }
0x1c8f   :  { %5932 = vrcp.f32 %v4073_v51  ;;  %v7757_v54 = vpop.f32.mrf.mxu3 }
0x1c90   :  { %5644 = vmatmul.msk.f32.gmra.mxu2 %vm83_vm0, %v4082_v16 }
0x1c95   :  { %v5933_v6 = vpop.eup %5932 }
0x1c96   :  { %v4076_v10 = vpop.xlane.xlu1 %4075  ;;  %v4083_v15 = vmul.f32 %v5933_v6, %v5925_v41  ;;  %v4235_v41 = vadd.f32 %v4234_v33, %v4213_v31 }
0x1c97   :  { %5934 = vrcp.f32 %v4076_v10  ;;  %v4206_v56 = vpop.f32.mrf.mxu3 }
0x1c98   :  { %5645 = vmatmul.msk.f32.gmra.mxu2 %vm83_vm0, %v4083_v15 }
0x1c9d   :  { %v5935_v50 = vpop.eup %5934 }
0x1c9e   :  { %v4084_v8 = vmul.f32 %v5935_v50, %v5927_v4  ;;  %v4240_v4 = vpop.f32.mrf.mxu1 }
0x1c9f   :  { %v4241_v38 = vadd.f32 %v4240_v4, %v4213_v31 }
0x1ca0   :  { %5646 = vmatmul.msk.f32.gmra.mxu2 %vm83_vm0, %v4084_v8 }
0x1ca8   :  { %5659 = vmatmul.msk.f32.vlgmr.msrb.gmra.mxu2 %vm83_vm0, %v6967_v63 }
0x1cb0   :  { %5660 = vmatmul.msk.f32.gmra.mxu2 %vm83_vm0, %v7005_v45 }
0x1cb8   :  { %5661 = vmatmul.msk.f32.gmra.mxu2 %vm83_vm0, %v7007_v9 }
0x1cc0   :  { %5662 = vmatmul.msk.f32.gmra.mxu2 %vm83_vm0, %v7009_v36 }
0x1d0b   :  { %v4114_v20 = vpop.f32.mrf.mxu2 }
0x1d0c   :  { %5647 = vmatmul.msk.f32.vlgmr.msrb.gmra.mxu0 %vm642_vm4, %v4114_v20  ;;  %v4447_v20 = vld [vmem:[%s8078_s0 + $0x620] sm:$0xff] }
0x1d0d   :  { %4510 = vmatpush.msrb.mxu0 %v4496_v61  ;;  %4475 = vmatpush.msra.mxu2 %v4447_v20 }
0x1d0f   :  { %4511 = vmatpush.msrb.mxu0 %v4495_v59 }
0x1d11   :  { %4512 = vmatpush.msrb.mxu0 %v4494_v47 }
0x1d13   :  { %v4117_v5 = vpop.f32.mrf.mxu2  ;;  %4513 = vmatpush.msrb.mxu0 %v4493_v22 }
0x1d14   :  { %5648 = vmatmul.msk.f32.gmra.mxu0 %vm642_vm4, %v4117_v5 }
0x1d1b   :  { %v4120_v37 = vpop.f32.mrf.mxu2 }
0x1d1c   :  { %5649 = vmatmul.msk.f32.gmra.mxu0 %vm642_vm4, %v4120_v37 }
0x1d23   :  { %v4123_v62 = vpop.f32.mrf.mxu2 }
0x1d24   :  { %5650 = vmatmul.msk.f32.gmra.mxu0 %vm642_vm4, %v4123_v62 }
0x1d2b   :  { %v4264_v23 = vpop.f32.mrf.mxu2 }
0x1d2c   :  { %5663 = vmatmul.msk.f32.vlgmr.msra.gmra.mxu0 %vm83_vm0, %v6967_v63 }
0x1d33   :  { %v4267_v12 = vpop.f32.mrf.mxu2 }
0x1d34   :  { %5664 = vmatmul.msk.f32.gmra.mxu0 %vm83_vm0, %v7005_v45 }
0x1d3b   :  { %v4270_v27 = vpop.f32.mrf.mxu2 }
0x1d3c   :  { %5665 = vmatmul.msk.f32.gmra.mxu0 %vm83_vm0, %v7007_v9 }
0x1d43   :  { %v4273_v0 = vpop.f32.mrf.mxu2 }
0x1d44   :  { %5666 = vmatmul.msk.f32.gmra.mxu0 %vm83_vm0, %v7009_v36  ;;  %5667 = vmatpush.xpose.msk.msrb.mxu3 %vm642_vm4, %v4273_v0 }
0x1d48   :  { %5668 = vmatpush.xpose.msk.msrb.mxu3 %vm642_vm4, %v4270_v27 }
0x1d4c   :  { %5669 = vmatpush.xpose.msk.msrb.mxu3 %vm642_vm4, %v4267_v12  ;;  %5683 = vmatmul.msk.f32.vlgmr.msrb.gmra.mxu0 %vm83_vm0, %v7511_v46 }
0x1d50   :  { %5670 = vmatpush.xpose.msk.msrb.mxu3 %vm642_vm4, %v4264_v23 }
0x1d53   :  { %5671 = vmatmul.msk.f32.vlgmr.msrb.gmra.mxu3 %vm642_vm4, %v4232_v3 }
0x1d54   :  { %4543 = vmatpush.msra.mxu3 %v4530_v32  ;;  %5684 = vmatmul.msk.f32.gmra.mxu0 %vm83_vm0, %v7519_v7 }
0x1d56   :  { %4544 = vmatpush.msra.mxu3 %v4529_v1 }
0x1d58   :  { %4545 = vmatpush.msra.mxu3 %v4528_v39 }
0x1d5a   :  { %4546 = vmatpush.msra.mxu3 %v4527_v19 }
0x1d5b   :  { %5672 = vmatmul.msk.f32.gmra.mxu3 %vm642_vm4, %v4235_v41 }
0x1d5c   :  { %5685 = vmatmul.msk.f32.gmra.mxu0 %vm83_vm0, %v7527_v60 }
0x1d63   :  { %5673 = vmatmul.msk.f32.gmra.mxu3 %vm642_vm4, %v4238_v52 }
0x1d64   :  { %5686 = vmatmul.msk.f32.gmra.mxu0 %vm83_vm0, %v7533_v2 }
0x1d6b   :  { %5674 = vmatmul.msk.f32.gmra.mxu3 %vm642_vm4, %v4241_v38 }
0x1d73   :  { %5687 = vmatmul.msk.f32.vlgmr.msra.gmra.mxu3 %vm83_vm0, %v6967_v63 }
0x1d7b   :  { %5688 = vmatmul.msk.f32.gmra.mxu3 %vm83_vm0, %v7005_v45 }
0x1d83   :  { %5689 = vmatmul.msk.f32.gmra.mxu3 %vm83_vm0, %v7007_v9 }
0x1d89   :  { %v7749_v42 = vpop.f32.mrf.mxu0 }
0x1d8b   :  { %5690 = vmatmul.msk.f32.gmra.mxu3 %vm83_vm0, %v7009_v36 }
0x1d91   :  { %v7755_v57 = vpop.f32.mrf.mxu0 }
0x1d99   :  { %v7759_v34 = vpop.f32.mrf.mxu0 }
0x1da1   :  { %v4165_v55 = vpop.f32.mrf.mxu0 }
0x1da2   :  { %v7761_v58 = vadd.f32 %v4206_v56, %v4165_v55 }
0x1da9   :  { %v4297_v51 = vpop.f32.mrf.mxu0 }
0x1db1   :  { %v4300_v16 = vpop.f32.mrf.mxu0 }
0x1db9   :  { %v4303_v6 = vpop.f32.mrf.mxu0 }
0x1dc1   :  { %v4306_v10 = vpop.f32.mrf.mxu0 }
0x1dc2   :  { %4430 = vmatpush.msra.mxu1 %v4306_v10  ;;  %v4563_v10 = vld [vmem:[%s8078_s0 + $0x680] sm:$0xff] }
0x1dc4   :  { %4431 = vmatpush.msra.mxu1 %v4303_v6 }
0x1dc6   :  { %4432 = vmatpush.msra.mxu1 %v4300_v16 }
0x1dc8   :  { %4433 = vmatpush.msra.mxu1 %v4297_v51 }
0x1dca   :  { %4576 = vmatpush.msrb.mxu1 %v4563_v10 }
0x1dd6   :  { %v4350_v15 = vpop.f32.mrf.mxu3 }
0x1dd7   :  { %v4351_v50 = vadd.f32 %v7572_v18, %v4350_v15  ;;  %v4562_v15 = vld [vmem:[%s8078_s0 + $0x678] sm:$0xff] }
0x1dd8   :  { %4577 = vmatpush.msrb.mxu1 %v4562_v15 }
0x1dd9   :  { %v4362_v8 = vsel %vm83_vm0, %v4351_v50, -inf }
0x1dda   :  { %4363 = vmax.xlane.f32.xlu2 %v4362_v8  ;;  %v4560_v8 = vld [vmem:[%s8078_s0 + $0x668] sm:$0xff] }
0x1dde   :  { %v4353_v49 = vpop.f32.mrf.mxu3 }
0x1ddf   :  { %v4354_v11 = vadd.f32 %v7579_v53, %v4353_v49 }
0x1de1   :  { %v4365_v24 = vsel %vm83_vm0, %v4354_v11, -inf }
0x1de2   :  { %4366 = vmax.xlane.f32.xlu0 %v4365_v24 }
0x1de6   :  { %v4356_v13 = vpop.f32.mrf.mxu3 }
0x1de7   :  { %v4357_v14 = vadd.f32 %v7586_v40, %v4356_v13 }
0x1de9   :  { %v4368_v5 = vsel %vm83_vm0, %v4357_v14, -inf }
0x1dea   :  { %4369 = vmax.xlane.f32.xlu1 %v4368_v5 }
0x1dee   :  { %v4359_v37 = vpop.f32.mrf.mxu3 }
0x1def   :  { %v4360_v62 = vadd.f32 %v7593_v17, %v4359_v37 }
0x1df1   :  { %v4371_v61 = vsel %vm83_vm0, %v4360_v62, -inf }
0x1df2   :  { %4372 = vmax.xlane.f32.xlu2 %v4371_v61 }
0x1df6   :  { %v4548_v59 = vpop.f32.mrf.mxu3 }
0x1dfe   :  { %v4551_v47 = vpop.f32.mrf.mxu3 }
0x1e06   :  { %v4554_v22 = vpop.f32.mrf.mxu3 }
0x1e0e   :  { %v4557_v23 = vpop.f32.mrf.mxu3 }
0x1e0f   :  { %5695 = vmatpush.xpose.msk.msrb.mxu2 %vm642_vm4, %v4557_v23 }
0x1e13   :  { %5696 = vmatpush.xpose.msk.msrb.mxu2 %vm642_vm4, %v4554_v22 }
0x1e17   :  { %5697 = vmatpush.xpose.msk.msrb.mxu2 %vm642_vm4, %v4551_v47 }
0x1e1b   :  { %5698 = vmatpush.xpose.msk.msrb.mxu2 %vm642_vm4, %v4548_v59 }
0x1e4d   :  { %v4364_v12 = vpop.xlane.xlu2 %4363 }
0x1e4e   :  { %v4374_v27 = vsub.f32 %v4351_v50, %v4364_v12  ;;  %v4561_v50 = vld [vmem:[%s8078_s0 + $0x670] sm:$0xff]  ;;  %v4515_v12 = vpop.f32.mrf.mxu0 }
0x1e4f   :  { %4578 = vmatpush.msrb.mxu1 %v4561_v50 }
0x1e50   :  { %v4378_v0 = vmul.f32 1.442695, %v4374_v27 }
0x1e51   :  { %4579 = vmatpush.msrb.mxu1 %v4560_v8 }
0x1e52   :  { %5936 = vpow2.f32 %v4378_v0 }
0x1e55   :  { %v4367_v29 = vpop.xlane.xlu0 %4366 }
0x1e56   :  { %v4375_v31 = vsub.f32 %v4354_v11, %v4367_v29 }
0x1e58   :  { %v5937_v32 = vpop.eup %5936  ;;  %v4380_v3 = vmul.f32 1.442695, %v4375_v31 }
0x1e59   :  { %v4386_v1 = vsel %vm83_vm0, %v5937_v32, 0.0 }
0x1e5a   :  { %5938 = vpow2.f32 %v4380_v3  ;;  %4387 = vadd.xlane.f32.xlu0 %v4386_v1 }
0x1e5d   :  { %v4370_v33 = vpop.xlane.xlu1 %4369 }
0x1e5e   :  { %v4376_v39 = vsub.f32 %v4357_v14, %v4370_v33 }
0x1e60   :  { %v5939_v19 = vpop.eup %5938  ;;  %v4382_v41 = vmul.f32 1.442695, %v4376_v39 }
0x1e61   :  { %v4389_v48 = vsel %vm83_vm0, %v5939_v19, 0.0 }
0x1e62   :  { %5940 = vpow2.f32 %v4382_v41  ;;  %4390 = vadd.xlane.f32.xlu1 %v4389_v48  ;;  %v4201_v48 = vadd.f32 %v7753_v43, %v7755_v57 }
0x1e65   :  { %v4373_v52 = vpop.xlane.xlu2 %4372 }
0x1e66   :  { %v4377_v4 = vsub.f32 %v4360_v62, %v4373_v52 }
0x1e68   :  { %v5941_v38 = vpop.eup %5940  ;;  %v4384_v56 = vmul.f32 1.442695, %v4377_v4 }
0x1e69   :  { %v4392_v55 = vsel %vm83_vm0, %v5941_v38, 0.0 }
0x1e6a   :  { %5942 = vpow2.f32 %v4384_v56  ;;  %4393 = vadd.xlane.f32.xlu2 %v4392_v55 }
0x1e70   :  { %v5943_v51 = vpop.eup %5942 }
0x1e71   :  { %v4395_v16 = vsel %vm83_vm0, %v5943_v51, 0.0 }
0x1e72   :  { %4396 = vadd.xlane.f32.xlu0 %v4395_v16 }
0x1ecd   :  { %v4388_v6 = vpop.xlane.xlu0 %4387 }
0x1ece   :  { %5944 = vrcp.f32 %v4388_v6 }
0x1ed4   :  { %v5945_v49 = vpop.eup %5944 }
0x1ed5   :  { %v4402_v11 = vmul.f32 %v5945_v49, %v5937_v32  ;;  %v4391_v24 = vpop.xlane.xlu1 %4390 }
0x1ed6   :  { %5946 = vrcp.f32 %v4391_v24 }
0x1ed7   :  { %5675 = vmatmul.msk.f32.vlgmr.msra.gmra.mxu1 %vm83_vm0, %v4402_v11 }
0x1edc   :  { %v5947_v13 = vpop.eup %5946 }
0x1edd   :  { %v4394_v20 = vpop.xlane.xlu2 %4393  ;;  %v4403_v14 = vmul.f32 %v5947_v13, %v5939_v19 }
0x1ede   :  { %5948 = vrcp.f32 %v4394_v20 }
0x1edf   :  { %5676 = vmatmul.msk.f32.gmra.mxu1 %vm83_vm0, %v4403_v14 }
0x1ee4   :  { %v5949_v5 = vpop.eup %5948 }
0x1ee5   :  { %v4397_v37 = vpop.xlane.xlu0 %4396  ;;  %v4404_v62 = vmul.f32 %v5949_v5, %v5941_v38  ;;  %v4204_v38 = vadd.f32 %v7757_v54, %v7759_v34 }
0x1ee6   :  { %5950 = vrcp.f32 %v4397_v37 }
0x1ee7   :  { %5677 = vmatmul.msk.f32.gmra.mxu1 %vm83_vm0, %v4404_v62 }
0x1eec   :  { %v5951_v61 = vpop.eup %5950 }
0x1eed   :  { %v4405_v59 = vmul.f32 %v5951_v61, %v5943_v51 }
0x1eef   :  { %5678 = vmatmul.msk.f32.gmra.mxu1 %vm83_vm0, %v4405_v59 }
0x1ef7   :  { %5691 = vmatmul.msk.f32.vlgmr.msrb.gmra.mxu1 %vm83_vm0, %v6967_v63 }
0x1eff   :  { %5692 = vmatmul.msk.f32.gmra.mxu1 %vm83_vm0, %v7005_v45  ;;  %v4497_v45 = vperm.slane %v7542_v21, 3  ;;  %v4198_v21 = vadd.f32 %v7745_v35, %v7749_v42 }
0x1f01   :  { %v4516_v27 = vadd.f32 %v4515_v12, %v4497_v45 }
0x1f07   :  { %5693 = vmatmul.msk.f32.gmra.mxu1 %vm83_vm0, %v7007_v9  ;;  %v4518_v9 = vpop.f32.mrf.mxu0 }
0x1f0f   :  { %5694 = vmatmul.msk.f32.gmra.mxu1 %vm83_vm0, %v7009_v36  ;;  %v4519_v36 = vadd.f32 %v4518_v9, %v4497_v45  ;;  %v4521_v31 = vpop.f32.mrf.mxu0 }
0x1f10   :  { %v4522_v32 = vadd.f32 %v4521_v31, %v4497_v45 }
0x1f17   :  { %v4524_v1 = vpop.f32.mrf.mxu0 }
0x1f18   :  { %v4525_v33 = vadd.f32 %v4524_v1, %v4497_v45 }
0x1f54   :  { %v4435_v47 = vpop.f32.mrf.mxu1 }
0x1f55   :  { %5679 = vmatmul.msk.f32.vlgmr.msra.gmra.mxu2 %vm642_vm4, %v4435_v47 }
0x1f5c   :  { %v4438_v22 = vpop.f32.mrf.mxu1 }
0x1f5d   :  { %5680 = vmatmul.msk.f32.gmra.mxu2 %vm642_vm4, %v4438_v22 }
0x1f64   :  { %v4441_v23 = vpop.f32.mrf.mxu1 }
0x1f65   :  { %5681 = vmatmul.msk.f32.gmra.mxu2 %vm642_vm4, %v4441_v23 }
0x1f6c   :  { %v4444_v63 = vpop.f32.mrf.mxu1 }
0x1f6d   :  { %5682 = vmatmul.msk.f32.gmra.mxu2 %vm642_vm4, %v4444_v63 }
0x1f74   :  { %v4581_v0 = vpop.f32.mrf.mxu1 }
0x1f75   :  { %5699 = vmatmul.msk.f32.vlgmr.msrb.gmra.mxu2 %vm642_vm4, %v4516_v27  ;;  %v4731_v27 = vld [vmem:[%s8078_s0 + $0x688] sm:$0xff] }
0x1f76   :  { %4759 = vmatpush.msrb.mxu3 %v4731_v27 }
0x1f7c   :  { %v4584_v29 = vpop.f32.mrf.mxu1 }
0x1f7d   :  { %5700 = vmatmul.msk.f32.gmra.mxu2 %vm642_vm4, %v4519_v36 }
0x1f84   :  { %v4587_v3 = vpop.f32.mrf.mxu1 }
0x1f85   :  { %5701 = vmatmul.msk.f32.gmra.mxu2 %vm642_vm4, %v4522_v32 }
0x1f8c   :  { %v4590_v39 = vpop.f32.mrf.mxu1 }
0x1f8d   :  { %5702 = vmatmul.msk.f32.gmra.mxu2 %vm642_vm4, %v4525_v33  ;;  %4714 = vmatpush.msra.mxu0 %v4590_v39 }
0x1f8f   :  { %4715 = vmatpush.msra.mxu0 %v4587_v3 }
0x1f91   :  { %4716 = vmatpush.msra.mxu0 %v4584_v29 }
0x1f93   :  { %4717 = vmatpush.msra.mxu0 %v4581_v0 }
0x1fd8   :  { %v4477_v19 = vpop.f32.mrf.mxu2 }
0x1fd9   :  { %v7817_v41 = vadd.f32 %v4477_v19, %v4198_v21 }
0x1fe0   :  { %v4480_v52 = vpop.f32.mrf.mxu2 }
0x1fe1   :  { %v7821_v4 = vadd.f32 %v4480_v52, %v4201_v48 }
0x1fe8   :  { %v4483_v56 = vpop.f32.mrf.mxu2 }
0x1fe9   :  { %v7825_v55 = vadd.f32 %v4483_v56, %v4204_v38 }
0x1ff0   :  { %v4486_v51 = vpop.f32.mrf.mxu2 }
0x1ff1   :  { %v7828_v16 = vadd.f32 %v4486_v51, %v7761_v58 }
0x1ff8   :  { %v4634_v35 = vpop.f32.mrf.mxu2 }
0x1ff9   :  { %v4635_v42 = vadd.f32 %v7572_v18, %v4634_v35 }
0x1ffb   :  { %v4646_v6 = vsel %vm83_vm0, %v4635_v42, -inf }
0x1ffc   :  { %4647 = vmax.xlane.f32.xlu1 %v4646_v6 }
0x2000   :  { %v4637_v43 = vpop.f32.mrf.mxu2 }
0x2001   :  { %v4638_v57 = vadd.f32 %v7579_v53, %v4637_v43  ;;  %v5747_v43 = vld [vmem:[%s8078_s0 + $0x698] ss:$0 sm:$0xff] }
0x2003   :  { %v4649_v10 = vsel %vm83_vm0, %v4638_v57, -inf }
0x2004   :  { %4650 = vmax.xlane.f32.xlu2 %v4649_v10 }
0x2008   :  { %v4640_v54 = vpop.f32.mrf.mxu2 }
0x2009   :  { %v4641_v34 = vadd.f32 %v7586_v40, %v4640_v54 }
0x200b   :  { %v4652_v15 = vsel %vm83_vm0, %v4641_v34, -inf }
0x200c   :  { %4653 = vmax.xlane.f32.xlu0 %v4652_v15 }
0x2010   :  { %v4643_v58 = vpop.f32.mrf.mxu2 }
0x2011   :  { %v4644_v50 = vadd.f32 %v7593_v17, %v4643_v58 }
0x2013   :  { %v4655_v18 = vsel %vm83_vm0, %v4644_v50, -inf }
0x2014   :  { %4656 = vmax.xlane.f32.xlu1 %v4655_v18  ;;  %v4818_v18 = vld [vmem:[%s8078_s0 + $0x6f8] sm:$0xff] }
0x206f   :  { %v4648_v8 = vpop.xlane.xlu1 %4647 }
0x2070   :  { %v4658_v49 = vsub.f32 %v4635_v42, %v4648_v8 }
0x2072   :  { %v4662_v11 = vmul.f32 1.442695, %v4658_v49  ;;  %v7876_v49 = vld [vmem:[%s8078_s0] sm:$0xff] }
0x2074   :  { %5952 = vpow2.f32 %v4662_v11  ;;  %v4816_v11 = vld [vmem:[%s8078_s0 + $0x6e8] sm:$0xff] }
0x2077   :  { %v4651_v53 = vpop.xlane.xlu2 %4650 }
0x2078   :  { %v4659_v24 = vsub.f32 %v4638_v57, %v4651_v53 }
0x207a   :  { %v5953_v13 = vpop.eup %5952  ;;  %v4664_v20 = vmul.f32 1.442695, %v4659_v24 }
0x207b   :  { %v4670_v14 = vsel %vm83_vm0, %v5953_v13, 0.0 }
0x207c   :  { %5954 = vpow2.f32 %v4664_v20  ;;  %4671 = vadd.xlane.f32.xlu2 %v4670_v14 }
0x207f   :  { %v4654_v40 = vpop.xlane.xlu0 %4653 }
0x2080   :  { %v4660_v5 = vsub.f32 %v4641_v34, %v4654_v40 }
0x2082   :  { %v5955_v37 = vpop.eup %5954  ;;  %v4666_v62 = vmul.f32 1.442695, %v4660_v5 }
0x2083   :  { %v4673_v17 = vsel %vm83_vm0, %v5955_v37, 0.0 }
0x2084   :  { %5956 = vpow2.f32 %v4666_v62  ;;  %4674 = vadd.xlane.f32.xlu0 %v4673_v17 }
0x2087   :  { %v4657_v61 = vpop.xlane.xlu1 %4656 }
0x2088   :  { %v4661_v59 = vsub.f32 %v4644_v50, %v4657_v61 }
0x208a   :  { %v5957_v47 = vpop.eup %5956  ;;  %v4668_v22 = vmul.f32 1.442695, %v4661_v59 }
0x208b   :  { %v4676_v23 = vsel %vm83_vm0, %v5957_v47, 0.0 }
0x208c   :  { %5958 = vpow2.f32 %v4668_v22  ;;  %4677 = vadd.xlane.f32.xlu1 %v4676_v23 }
0x2092   :  { %v5959_v12 = vpop.eup %5958 }
0x2093   :  { %v4679_v63 = vsel %vm83_vm0, %v5959_v12, 0.0 }
0x2094   :  { %4680 = vadd.xlane.f32.xlu2 %v4679_v63 }
0x20ef   :  { %v4672_v45 = vpop.xlane.xlu2 %4671 }
0x20f0   :  { %5960 = vrcp.f32 %v4672_v45 }
0x20f6   :  { %v5961_v9 = vpop.eup %5960 }
0x20f7   :  { %v4686_v0 = vmul.f32 %v5961_v9, %v5953_v13  ;;  %v4675_v36 = vpop.xlane.xlu0 %4674  ;;  %v5024_v9 = vld [vmem:[%s8078_s0 + $0x720] sm:$0xff] }
0x20f8   :  { %5962 = vrcp.f32 %v4675_v36  ;;  %5049 = vmatpush.msrb.mxu0 %v5024_v9 }
0x20f9   :  { %5703 = vmatmul.msk.f32.vlgmr.msra.gmra.mxu0 %vm83_vm0, %v4686_v0 }
0x20fe   :  { %v5963_v29 = vpop.eup %5962 }
0x20ff   :  { %v4678_v31 = vpop.xlane.xlu1 %4677  ;;  %v4687_v32 = vmul.f32 %v5963_v29, %v5955_v37 }
0x2100   :  { %5964 = vrcp.f32 %v4678_v31 }
0x2101   :  { %5704 = vmatmul.msk.f32.gmra.mxu0 %vm83_vm0, %v4687_v32  ;;  %v5023_v32 = vld [vmem:[%s8078_s0 + $0x718] sm:$0xff] }
0x2102   :  { %5050 = vmatpush.msrb.mxu0 %v5023_v32 }
0x2106   :  { %v5965_v3 = vpop.eup %5964 }
0x2107   :  { %v4681_v1 = vpop.xlane.xlu2 %4680  ;;  %v4688_v33 = vmul.f32 %v5965_v3, %v5957_v47 }
0x2108   :  { %5966 = vrcp.f32 %v4681_v1 }
0x2109   :  { %5705 = vmatmul.msk.f32.gmra.mxu0 %vm83_vm0, %v4688_v33  ;;  %v5022_v33 = vld [vmem:[%s8078_s0 + $0x710] sm:$0xff] }
0x210a   :  { %5051 = vmatpush.msrb.mxu0 %v5022_v33 }
0x210e   :  { %v5967_v39 = vpop.eup %5966 }
0x210f   :  { %v4689_v21 = vmul.f32 %v5967_v39, %v5959_v12 }
0x2111   :  { %5706 = vmatmul.msk.f32.gmra.mxu0 %vm83_vm0, %v4689_v21 }
0x2176   :  { %v4719_v19 = vpop.f32.mrf.mxu0 }
0x2177   :  { %5707 = vmatmul.msk.f32.vlgmr.msrb.gmra.mxu3 %vm642_vm4, %v4719_v19 }
0x217e   :  { %v4722_v48 = vpop.f32.mrf.mxu0 }
0x217f   :  { %5708 = vmatmul.msk.f32.gmra.mxu3 %vm642_vm4, %v4722_v48 }
0x2186   :  { %v4725_v52 = vpop.f32.mrf.mxu0 }
0x2187   :  { %5709 = vmatmul.msk.f32.gmra.mxu3 %vm642_vm4, %v4725_v52 }
0x218e   :  { %v4728_v38 = vpop.f32.mrf.mxu0 }
0x218f   :  { %5710 = vmatmul.msk.f32.gmra.mxu3 %vm642_vm4, %v4728_v38 }
0x21fa   :  { %v4761_v56 = vpop.f32.mrf.mxu3 }
0x21fb   :  { %v4773_v54 = vadd.f32 %v4761_v56, %v7817_v41  ;;  %v4817_v41 = vld [vmem:[%s8078_s0 + $0x6f0] sm:$0xff]  ;;  %v5021_v56 = vld [vmem:[%s8078_s0 + $0x708] sm:$0xff] }
0x21fc   :  { %5052 = vmatpush.msrb.mxu0 %v5021_v56 }
0x21fd   :  { %v4779_v8 = vadd.f32 %v5747_v43, %v4773_v54 }
0x2202   :  { %v4764_v51 = vpop.f32.mrf.mxu3 }
0x2203   :  { %v4774_v57 = vadd.f32 %v4764_v51, %v7821_v4 }
0x2205   :  { %v4780_v58 = vadd.f32 %v5747_v43, %v4774_v57 }
0x220a   :  { %v4767_v35 = vpop.f32.mrf.mxu3 }
0x220b   :  { %v4775_v42 = vadd.f32 %v4767_v35, %v7825_v55  ;;  %v4819_v55 = vld [vmem:[%s8078_s0 + $0x700] sm:$0xff] }
0x220c   :  { %4844 = vmatpush.msra.mxu2 %v4819_v55 }
0x220d   :  { %v4781_v34 = vadd.f32 %v5747_v43, %v4775_v42 }
0x220e   :  { %4845 = vmatpush.msra.mxu2 %v4818_v18 }
0x220f   :  { %v4785_v4 = vadd.f32 %v4781_v34, %v7527_v60  ;;  %v7883_v60 = vld [vmem:[%s8078_s0 + $0x8] sm:$0xff] }
0x2210   :  { %4846 = vmatpush.msra.mxu2 %v4817_v41 }
0x2212   :  { %v4770_v6 = vpop.f32.mrf.mxu3  ;;  %4847 = vmatpush.msra.mxu2 %v4816_v11 }
0x2213   :  { %v4776_v10 = vadd.f32 %v4770_v6, %v7828_v16  ;;  %v4783_v16 = vadd.f32 %v4779_v8, %v7511_v46  ;;  %v7890_v46 = vld [vmem:[%s8078_s0 + $0x10] sm:$0xff] }
0x2215   :  { %v4782_v15 = vadd.f32 %v5747_v43, %v4776_v10 }
0x2217   :  { %v4786_v50 = vadd.f32 %v4782_v15, %v7533_v2  ;;  %v4784_v2 = vadd.f32 %v4780_v58, %v7519_v7  ;;  %v7897_v7 = vld [vmem:[%s8078_s0 + $0x18] sm:$0xff] }
0x2219   :  { %4799 = vmatpush.msra.mxu1 %v4786_v50 }
0x221b   :  { %4800 = vmatpush.msra.mxu1 %v4785_v4 }
0x221d   :  { %4801 = vmatpush.msra.mxu1 %v4784_v2 }
0x221f   :  { %4802 = vmatpush.msra.mxu1 %v4783_v16 }
0x2220   :  { %5711 = vmatmul.msk.f32.vlgmr.msra.gmra.mxu1 %vm83_vm0, %v7876_v49 }
0x2228   :  { %5712 = vmatmul.msk.f32.gmra.mxu1 %vm83_vm0, %v7883_v60 }
0x2230   :  { %5713 = vmatmul.msk.f32.gmra.mxu1 %vm83_vm0, %v7890_v46 }
0x2238   :  { %5714 = vmatmul.msk.f32.gmra.mxu1 %vm83_vm0, %v7897_v7 }
0x229d   :  { %v7904_v53 = vpop.f32.mrf.mxu1 }
0x229e   :  { %5715 = vmatmul.msk.f32.vlgmr.msra.gmra.mxu2 %vm83_vm0, %v7904_v53 }
0x22a5   :  { %v7908_v24 = vpop.f32.mrf.mxu1 }
0x22a6   :  { %5716 = vmatmul.msk.f32.gmra.mxu2 %vm83_vm0, %v7908_v24 }
0x22ad   :  { %v7912_v13 = vpop.f32.mrf.mxu1 }
0x22ae   :  { %5717 = vmatmul.msk.f32.gmra.mxu2 %vm83_vm0, %v7912_v13 }
0x22b5   :  { %v7916_v20 = vpop.f32.mrf.mxu1 }
0x22b6   :  { %5718 = vmatmul.msk.f32.gmra.mxu2 %vm83_vm0, %v7916_v20 }
0x2321   :  { %v7920_v14 = vpop.f32.mrf.mxu2 }
0x2322   :  { %v7923_v40 = vmul.f32 0.70710677, %v7920_v14 }
0x2324   :  { %v4869_v5 = vand.u32 2147483647, %v7923_v40 }
0x2326   :  { %v4873_v37 = vmul.f32 0.3275911, %v4869_v5  ;;  %v4977_v52 = vsub.f32 0.0, %v4869_v5 }
0x2328   :  { %v4877_v62 = vadd.f32 1.0, %v4873_v37  ;;  %v4981_v10 = vmul.f32 %v4977_v52, %v4869_v5 }
0x2329   :  { %v7926_v17 = vpop.f32.mrf.mxu2 }
0x232a   :  { %5968 = vrcp.f32 %v4877_v62  ;;  %v7929_v61 = vmul.f32 0.70710677, %v7926_v17  ;;  %v4892_v0 = vand.u32 2147483648, %v4877_v62  ;;  %v4890_v31 = vand.u32 2147483647, %v4877_v62 }
0x232b   :  { %vm4886_vm4 = vweird.f32 %v4877_v62  ;;  %v4985_v11 = vmul.f32 1.442695, %v4981_v10 }
0x232c   :  { %v7932_v59 = vand.u32 2147483647, %v7929_v61  ;;  %v4893_v39 = vor.u32 1.1754944e-38, %v4892_v0  ;;  %vm4891_vm15 = vcmp.eq.f32.partialorder %v4890_v31, 8.507059e+37 }
0x232e   :  { %v4874_v47 = vmul.f32 0.3275911, %v7932_v59  ;;  %v4978_v8 = vsub.f32 0.0, %v7932_v59 }
0x2330   :  { %v5969_v22 = vpop.eup %5968  ;;  %v4878_v12 = vadd.f32 1.0, %v4874_v47 }
0x2331   :  { %v4882_v23 = vmul.f32 %v5969_v22, %v4877_v62  ;;  %v7935_v63 = vpop.f32.mrf.mxu2  ;;  %vm4887_vm1 = vweird.f32 %v5969_v22 }
0x2332   :  { %v7938_v45 = vmul.f32 0.70710677, %v7935_v63  ;;  %5970 = vrcp.f32 %v4878_v12  ;;  %vm4888_vm14 = vmor %vm4886_vm4, %vm4887_vm1  ;;  %v4907_v54 = vand.u32 2147483648, %v4878_v12  ;;  %v4905_v15 = vand.u32 2147483647, %v4878_v12 }
0x2333   :  { %v4883_v27 = vsub.f32 1.0, %v4882_v23  ;;  %vm4901_vm5 = vweird.f32 %v4878_v12  ;;  %vm5001_vm1 = vcmp.ge.f32.partialorder %v7923_v40, 0.0 }
0x2334   :  { %v7944_v36 = vand.u32 2147483647, %v7938_v45  ;;  %v4908_v2 = vor.u32 1.1754944e-38, %v4907_v54  ;;  %vm4906_vm7 = vcmp.eq.f32.partialorder %v4905_v15, 8.507059e+37 }
0x2335   :  { %v4884_v29 = vmul.f32 %v5969_v22, %v4883_v27  ;;  %v4982_v27 = vmul.f32 %v4978_v8, %v7932_v59 }
0x2336   :  { %v4875_v3 = vmul.f32 0.3275911, %v7944_v36 }
0x2337   :  { %v4885_v1 = vadd.f32 %v5969_v22, %v4884_v29 }
0x2338   :  { %v4879_v21 = vadd.f32 1.0, %v4875_v3  ;;  %v5971_v19 = vpop.eup %5970 }
0x2339   :  { %v4889_v48 = vsel %vm4888_vm14, %v5969_v22, %v4885_v1  ;;  %v7953_v38 = vpop.f32.mrf.mxu2  ;;  %v4897_v35 = vmul.f32 %v5971_v19, %v4878_v12  ;;  %vm4902_vm3 = vweird.f32 %v5971_v19 }
0x233a   :  { %v4894_v51 = vsel %vm4891_vm15, %v4893_v39, %v4889_v48  ;;  %5972 = vrcp.f32 %v4879_v21  ;;  %v7959_v43 = vmul.f32 0.70710677, %v7953_v38  ;;  %vm4903_vm6 = vmor %vm4901_vm5, %vm4902_vm3  ;;  %v4922_v9 = vand.u32 2147483648, %v4879_v21 }
0x233b   :  { %v4941_v42 = vmul.f32 1.0614054, %v4894_v51  ;;  %v4898_v6 = vsub.f32 1.0, %v4897_v35  ;;  %v4920_v29 = vand.u32 2147483647, %v4879_v21  ;;  %vm4916_vm9 = vweird.f32 %v4879_v21 }
0x233c   :  { %v7962_v58 = vand.u32 2147483647, %v7959_v43  ;;  %v4923_v33 = vor.u32 1.1754944e-38, %v4922_v9  ;;  %v4979_v35 = vsub.f32 0.0, %v7944_v36  ;;  %vm5002_vm15 = vcmp.ge.f32.partialorder %v7929_v61, 0.0 }
0x233d   :  { %v5719_v57 = vadd.f32 -1.4531521, %v4941_v42  ;;  %v4899_v34 = vmul.f32 %v5971_v19, %v4898_v6  ;;  %vm4921_vm11 = vcmp.eq.f32.partialorder %v4920_v29, 8.507059e+37  ;;  %vm5003_vm3 = vcmp.ge.f32.partialorder %v7938_v45, 0.0 }
0x233e   :  { %v4876_v4 = vmul.f32 0.3275911, %v7962_v58  ;;  %vm5004_vm5 = vcmp.ge.f32.partialorder %v7959_v43, 0.0 }
0x233f   :  { %v4949_v50 = vmul.f32 %v5719_v57, %v4894_v51  ;;  %v4900_v18 = vadd.f32 %v5971_v19, %v4899_v34 }
0x2340   :  { %v5973_v55 = vpop.eup %5972  ;;  %v4880_v37 = vadd.f32 1.0, %v4876_v4 }
0x2341   :  { %v4953_v41 = vadd.f32 1.4214138, %v4949_v50  ;;  %v4912_v16 = vmul.f32 %v5973_v55, %v4879_v21  ;;  %v4904_v5 = vsel %vm4903_vm6, %v5971_v19, %v4900_v18  ;;  %vm4917_vm8 = vweird.f32 %v5973_v55 }
0x2342   :  { %v4909_v47 = vsel %vm4906_vm7, %v4908_v2, %v4904_v5  ;;  %5974 = vrcp.f32 %v4880_v37  ;;  %vm4918_vm10 = vmor %vm4916_vm9, %vm4917_vm8  ;;  %v4987_v19 = vmul.f32 1.442695, %v4982_v27  ;;  %v4983_v18 = vmul.f32 %v4979_v35, %v7944_v36 }
0x2343   :  { %v4957_v62 = vmul.f32 %v4953_v41, %v4894_v51  ;;  %v4913_v22 = vsub.f32 1.0, %v4912_v16  ;;  %v4942_v23 = vmul.f32 1.0614054, %v4909_v47  ;;  %5976 = vpow2.f32 %v4985_v11 }
0x2344   :  { %5978 = vpow2.f32 %v4987_v19  ;;  %v4935_v8 = vand.u32 2147483647, %v4880_v37  ;;  %v4861_v16 = vmul.f32 0.5, %v7920_v14  ;;  %vm4931_vm13 = vweird.f32 %v4880_v37 }
0x2345   :  { %v5723_v12 = vadd.f32 -0.28449672, %v4957_v62  ;;  %v4914_v0 = vmul.f32 %v5973_v55, %v4913_v22  ;;  %v5720_v31 = vadd.f32 -1.4531521, %v4942_v23  ;;  %v4989_v23 = vmul.f32 1.442695, %v4983_v18 }
0x2346   :  { %vm4936_vm14 = vcmp.eq.f32.partialorder %v4935_v8, 8.507059e+37  ;;  %v4980_v14 = vsub.f32 0.0, %v7962_v58 }
0x2347   :  { %v4965_v32 = vmul.f32 %v5723_v12, %v4894_v51  ;;  %v4915_v3 = vadd.f32 %v5973_v55, %v4914_v0  ;;  %v4950_v1 = vmul.f32 %v5720_v31, %v4909_v47  ;;  %5980 = vpow2.f32 %v4989_v23 }
0x2348   :  { %v5975_v52 = vpop.eup %5974 }
0x2349   :  { %v4969_v39 = vadd.f32 0.2548296, %v4965_v32  ;;  %v4919_v48 = vsel %vm4918_vm10, %v5973_v55, %v4915_v3  ;;  %v4954_v59 = vadd.f32 1.4214138, %v4950_v1  ;;  %v4927_v57 = vmul.f32 %v5975_v52, %v4880_v37  ;;  %v5977_v10 = vpop.eup %5976 }
0x234a   :  { %v4924_v56 = vsel %vm4921_vm11, %v4923_v33, %v4919_v48  ;;  %v4937_v55 = vand.u32 2147483648, %v4880_v37  ;;  %vm4932_vm12 = vweird.f32 %v5975_v52  ;;  %v5979_v36 = vpop.eup %5978  ;;  %v4984_v48 = vmul.f32 %v4980_v14, %v7962_v58 }
0x234b   :  { %v4973_v42 = vmul.f32 %v4969_v39, %v4894_v51  ;;  %v4943_v6 = vmul.f32 1.0614054, %v4924_v56  ;;  %v4958_v54 = vmul.f32 %v4954_v59, %v4909_v47  ;;  %v4928_v15 = vsub.f32 1.0, %v4927_v57  ;;  %vm4933_vm4 = vmor %vm4931_vm13, %vm4932_vm12 }
0x234c   :  { %v4938_v27 = vor.u32 1.1754944e-38, %v4937_v55 }
0x234d   :  { %v4993_v34 = vmul.f32 %v5977_v10, %v4973_v42  ;;  %v5721_v21 = vadd.f32 -1.4531521, %v4943_v6  ;;  %v5724_v50 = vadd.f32 -0.28449672, %v4958_v54  ;;  %v4929_v2 = vmul.f32 %v5975_v52, %v4928_v15  ;;  %v5981_v6 = vpop.eup %5980 }
0x234e   :  { %v4991_v10 = vmul.f32 1.442695, %v4984_v48  ;;  %v4862_v54 = vmul.f32 0.5, %v7926_v17 }
0x234f   :  { %v4997_v4 = vsub.f32 1.0, %v4993_v34  ;;  %v4951_v41 = vmul.f32 %v5721_v21, %v4924_v56  ;;  %v4966_v51 = vmul.f32 %v5724_v50, %v4909_v47  ;;  %v4930_v62 = vadd.f32 %v5975_v52, %v4929_v2 }
0x2350   :  { %5982 = vpow2.f32 %v4991_v10 }
0x2351   :  { %v5005_v11 = vsub.f32 0.0, %v4997_v4  ;;  %v4955_v5 = vadd.f32 1.4214138, %v4951_v41  ;;  %v4970_v22 = vadd.f32 0.2548296, %v4966_v51  ;;  %v4934_v0 = vsel %vm4933_vm4, %v5975_v52, %v4930_v62 }
0x2352   :  { %v4939_v32 = vsel %vm4936_vm14, %v4938_v27, %v4934_v0 }
0x2353   :  { %v5009_v9 = vsel %vm5001_vm1, %v4997_v4, %v5005_v11  ;;  %v4959_v12 = vmul.f32 %v4955_v5, %v4924_v56  ;;  %v4974_v31 = vmul.f32 %v4970_v22, %v4909_v47  ;;  %v4944_v1 = vmul.f32 1.0614054, %v4939_v32 }
0x2354   :  { %v5013_v29 = vadd.f32 1.0, %v5009_v9  ;;  %v4863_v4 = vmul.f32 0.5, %v7935_v63  ;;  %v4864_v22 = vmul.f32 0.5, %v7953_v38 }
0x2355   :  { %v5725_v3 = vadd.f32 -0.28449672, %v4959_v12  ;;  %v4994_v37 = vmul.f32 %v5979_v36, %v4974_v31  ;;  %v5722_v39 = vadd.f32 -1.4531521, %v4944_v1 }
0x2356   :  { %v5017_v33 = vmul.f32 %v5013_v29, %v4861_v16  ;;  %v5983_v17 = vpop.eup %5982 }
0x2357   :  { %v4967_v40 = vmul.f32 %v5725_v3, %v4924_v56  ;;  %v4998_v19 = vsub.f32 1.0, %v4994_v37  ;;  %v4952_v52 = vmul.f32 %v5722_v39, %v4939_v32 }
0x2358   :  { %5727 = vmatmul.msk.f32.vlgmr.msrb.gmra.mxu0 %vm83_vm0, %v5017_v33 }
0x2359   :  { %v4971_v59 = vadd.f32 0.2548296, %v4967_v40  ;;  %v5006_v35 = vsub.f32 0.0, %v4998_v19  ;;  %v4956_v42 = vadd.f32 1.4214138, %v4952_v52 }
0x235b   :  { %v4975_v47 = vmul.f32 %v4971_v59, %v4924_v56  ;;  %v5010_v57 = vsel %vm5002_vm15, %v4998_v19, %v5006_v35  ;;  %v4960_v15 = vmul.f32 %v4956_v42, %v4939_v32 }
0x235c   :  { %v5014_v34 = vadd.f32 1.0, %v5010_v57 }
0x235d   :  { %v4995_v21 = vmul.f32 %v5981_v6, %v4975_v47  ;;  %v5726_v58 = vadd.f32 -0.28449672, %v4960_v15  ;;  %v221_v6 = vld [vmem:[%s8078_s0 + $0x800] sm:$0xff] }
0x235e   :  { %v5018_v50 = vmul.f32 %v5014_v34, %v4862_v54  ;;  %v220_v34 = vld [vmem:[%s8078_s0 + $0x7f8] sm:$0xff] }
0x235f   :  { %v4999_v18 = vsub.f32 1.0, %v4995_v21  ;;  %v4968_v55 = vmul.f32 %v5726_v58, %v4939_v32 }
0x2360   :  { %5728 = vmatmul.msk.f32.gmra.mxu0 %vm83_vm0, %v5018_v50 }
0x2361   :  { %v5007_v8 = vsub.f32 0.0, %v4999_v18  ;;  %v4972_v56 = vadd.f32 0.2548296, %v4968_v55 }
0x2363   :  { %v5011_v61 = vsel %vm5003_vm3, %v4999_v18, %v5007_v8  ;;  %v4976_v2 = vmul.f32 %v4972_v56, %v4939_v32 }
0x2364   :  { %v5015_v41 = vadd.f32 1.0, %v5011_v61 }
0x2365   :  { %v4996_v51 = vmul.f32 %v5983_v17, %v4976_v2 }
0x2366   :  { %v5019_v16 = vmul.f32 %v5015_v41, %v4863_v4 }
0x2367   :  { %v5000_v11 = vsub.f32 1.0, %v4996_v51 }
0x2368   :  { %5729 = vmatmul.msk.f32.gmra.mxu0 %vm83_vm0, %v5019_v16 }
0x2369   :  { %v5008_v5 = vsub.f32 0.0, %v5000_v11 }
0x236b   :  { %v5012_v62 = vsel %vm5004_vm5, %v5000_v11, %v5008_v5 }
0x236c   :  { %v5016_v23 = vadd.f32 1.0, %v5012_v62 }
0x236e   :  { %v5020_v45 = vmul.f32 %v5016_v23, %v4864_v22 }
0x2370   :  { %5730 = vmatmul.msk.f32.gmra.mxu0 %vm83_vm0, %v5020_v45 }
0x23d5   :  { %v5054_v27 = vpop.f32.mrf.mxu0 }
0x23d6   :  { %v5066_v43 = vadd.f32 %v5054_v27, %v7904_v53 }
0x23dd   :  { %v5057_v63 = vpop.f32.mrf.mxu0 }
0x23de   :  { %v5067_v29 = vadd.f32 %v5057_v63, %v7908_v24 }
0x23e5   :  { %v5060_v36 = vpop.f32.mrf.mxu0 }
0x23e6   :  { %v5068_v0 = vadd.f32 %v5060_v36, %v7912_v13  ;;  %v5227_v36 = vld [vmem:[%s8078_s0 + $0x748] sm:$0xff] }
0x23e7   :  { %5248 = vmatpush.msrb.mxu2 %v5227_v36 }
0x23ed   :  { %v5063_v9 = vpop.f32.mrf.mxu0 }
0x23ee   :  { %v5069_v12 = vadd.f32 %v5063_v9, %v7916_v20  ;;  %v5226_v9 = vld [vmem:[%s8078_s0 + $0x740] sm:$0xff] }
0x23ef   :  { %5249 = vmatpush.msrb.mxu2 %v5226_v9 }
0x23f0   :  { %5082 = vmatpush.msra.mxu3 %v5069_v12 }
0x23f2   :  { %5083 = vmatpush.msra.mxu3 %v5068_v0 }
0x23f4   :  { %5084 = vmatpush.msra.mxu3 %v5067_v29 }
0x23f6   :  { %5085 = vmatpush.msra.mxu3 %v5066_v43 }
0x23f7   :  { %5731 = vmatmul.msk.f32.vlgmr.msra.gmra.mxu3 %vm83_vm0, %v7876_v49 }
0x23ff   :  { %5732 = vmatmul.msk.f32.gmra.mxu3 %vm83_vm0, %v7883_v60 }
0x2407   :  { %5733 = vmatmul.msk.f32.gmra.mxu3 %vm83_vm0, %v7890_v46 }
0x240f   :  { %5734 = vmatmul.msk.f32.gmra.mxu3 %vm83_vm0, %v7897_v7 }
0x247a   :  { %v5087_v13 = vpop.f32.mrf.mxu3 }
0x247b   :  { %v5100_v60 = vsel %vm83_vm0, %v5087_v13, 0.0 }
0x2482   :  { %v5090_v20 = vpop.f32.mrf.mxu3 }
0x2483   :  { %v5103_v24 = vsel %vm83_vm0, %v5090_v20, 0.0 }
0x2484   :  { %5104 = vadd.xlane.f32.xlu2 %v5103_v24 }
0x248a   :  { %v5093_v53 = vpop.f32.mrf.mxu3 }
0x248b   :  { %v5106_v38 = vsel %vm83_vm0, %v5093_v53, 0.0 }
0x248c   :  { %5107 = vadd.xlane.f32.xlu1 %v5106_v38 }
0x2492   :  { %v5096_v31 = vpop.f32.mrf.mxu3 }
0x2493   :  { %v5109_v49 = vsel %vm83_vm0, %v5096_v31, 0.0 }
0x2494   :  { %5110 = vadd.xlane.f32.xlu0 %v5109_v49 }
0x249c   :  { %5101 = vadd.xlane.f32.xlu0 %v5100_v60 }
0x24f7   :  { %v5105_v46 = vpop.xlane.xlu2 %5104 }
0x24f8   :  { %v5113_v32 = vmul.f32 %v5105_v46, %v6838_v44 }
0x24fa   :  { %v8000_v7 = vsub.f32 %v5090_v20, %v5113_v32 }
0x24fc   :  { %v5121_v14 = vmul.f32 %v8000_v7, %v8000_v7 }
0x24fe   :  { %v5127_v3 = vsel %vm83_vm0, %v5121_v14, 0.0  ;;  %v5748_v14 = vld [vmem:[%s8078_s0 + $0x728] ss:$0 sm:$0xff] }
0x24ff   :  { %v5108_v1 = vpop.xlane.xlu1 %5107  ;;  %5128 = vadd.xlane.f32.xlu0 %v5127_v3 }
0x2500   :  { %v5114_v33 = vmul.f32 %v5108_v1, %v6838_v44 }
0x2502   :  { %v8006_v37 = vsub.f32 %v5093_v53, %v5114_v33 }
0x2504   :  { %v5122_v40 = vmul.f32 %v8006_v37, %v8006_v37 }
0x2506   :  { %v5130_v39 = vsel %vm83_vm0, %v5122_v40, 0.0 }
0x2507   :  { %5131 = vadd.xlane.f32.xlu2 %v5130_v39  ;;  %v5111_v19 = vpop.xlane.xlu0 %5110 }
0x2508   :  { %v5115_v48 = vmul.f32 %v5111_v19, %v6838_v44 }
0x250a   :  { %v8012_v59 = vsub.f32 %v5096_v31, %v5115_v48 }
0x250c   :  { %v5123_v52 = vmul.f32 %v8012_v59, %v8012_v59 }
0x250e   :  { %v5133_v35 = vsel %vm83_vm0, %v5123_v52, 0.0 }
0x250f   :  { %5134 = vadd.xlane.f32.xlu1 %v5133_v35  ;;  %v5102_v47 = vpop.xlane.xlu0 %5101 }
0x2510   :  { %v5112_v42 = vmul.f32 %v5102_v47, %v6838_v44 }
0x2512   :  { %v8021_v57 = vsub.f32 %v5087_v13, %v5112_v42  ;;  %v5224_v42 = vld [vmem:[%s8078_s0 + $0x730] sm:$0xff] }
0x2513   :  { %229 = vperm.xlu0 %5741, %v221_v6  }
0x2514   :  { %v5120_v10 = vmul.f32 %v8021_v57, %v8021_v57 }
0x2516   :  { %v5124_v54 = vsel %vm83_vm0, %v5120_v10, 0.0  ;;  %v5749_v10 = vld [vmem:[%s8078_s0 + $0x750] ss:$0 sm:$0xff] }
0x2517   :  { %5125 = vadd.xlane.f32.xlu1 %v5124_v54 }
0x251f   :  { %224 = vperm.xlu2 %5743, %v220_v34   ;;  %v215_v34 = vadd.f32 %v6215_v28, %v6211_v25 }
0x2572   :  { %v5129_v21 = vpop.xlane.xlu0 %5128 }
0x2573   :  { %v5137_v15 = vmul.f32 %v5129_v21, %v6838_v44 }
0x2575   :  { %v5141_v50 = vadd.f32 1e-05, %v5137_v15 }
0x2577   :  { %5984 = vrsqrt.f32 %v5141_v50  ;;  %vm5160_vm10 = vweird.f32 %v5141_v50 }
0x257a   :  { %v5132_v18 = vpop.xlane.xlu2 %5131 }
0x257b   :  { %v5138_v58 = vmul.f32 %v5132_v18, %v6838_v44 }
0x257d   :  { %v5142_v8 = vadd.f32 1e-05, %v5138_v58  ;;  %v5985_v55 = vpop.eup %5984 }
0x257e   :  { %v5155_v4 = vmul.f32 %v5985_v55, %v5141_v50  ;;  %vm5161_vm7 = vweird.f32 %v5985_v55 }
0x257f   :  { %5986 = vrsqrt.f32 %v5142_v8  ;;  %vm5170_vm8 = vweird.f32 %v5142_v8  ;;  %vm5162_vm12 = vmor %vm5160_vm10, %vm5161_vm7 }
0x2580   :  { %v5156_v16 = vmul.f32 %v5985_v55, %v5155_v4 }
0x2582   :  { %v5135_v61 = vpop.xlane.xlu1 %5134  ;;  %v5157_v22 = vmul.f32 0.5, %v5156_v16  ;;  %v225_v54 = vpop.permute.xlu2 %224 }
0x2583   :  { %v5139_v56 = vmul.f32 %v5135_v61, %v6838_v44  ;;  %v232_v15 = vadd.f32 %v225_v54, %v215_v34 }
0x2584   :  { %v5158_v12 = vsub.f32 1.5, %v5157_v22 }
0x2585   :  { %v5987_v41 = vpop.eup %5986  ;;  %v5143_v2 = vadd.f32 1e-05, %v5139_v56  ;;  %v230_v58 = vpop.permute.xlu0 %229 }
0x2586   :  { %v5165_v17 = vmul.f32 %v5987_v41, %v5142_v8  ;;  %vm5171_vm6 = vweird.f32 %v5987_v41  ;;  %v5159_v13 = vmul.f32 %v5985_v55, %v5158_v12  ;;  %v218_v8 = vadd.f32 %v6217_v30, %v6213_v26 }
0x2587   :  { %5988 = vrsqrt.f32 %v5143_v2  ;;  %vm5172_vm11 = vmor %vm5170_vm8, %vm5171_vm6  ;;  %vm5180_vm13 = vweird.f32 %v5143_v2 }
0x2588   :  { %v5166_v51 = vmul.f32 %v5987_v41, %v5165_v17  ;;  %v5163_v46 = vsel %vm5162_vm12, %v5985_v55, %v5159_v13  ;;  %v233_v61 = vadd.f32 %v230_v58, %v218_v8 }
0x2589   :  { %v5185_v40 = vmul.f32 %v5163_v46, %v8000_v7  ;;  %v5194_v7 = vld [vmem:[%s8078_s0 + $0x48] sm:$0xff] }
0x258a   :  { %v5167_v11 = vmul.f32 0.5, %v5166_v51  ;;  %v5126_v5 = vpop.xlane.xlu1 %5125 }
0x258b   :  { %v5136_v62 = vmul.f32 %v5126_v5, %v6838_v44  ;;  %v5225_v44 = vld [vmem:[%s8078_s0 + $0x738] sm:$0xff]  ;;  %v5190_v52 = vmul.f32 %v5748_v14, %v5185_v40 }
0x258c   :  { %v5168_v27 = vsub.f32 1.5, %v5167_v11  ;;  %5250 = vmatpush.msrb.mxu2 %v5225_v44 }
0x258d   :  { %v5989_v23 = vpop.eup %5988  ;;  %v5140_v45 = vadd.f32 1e-05, %v5136_v62 }
0x258e   :  { %v5175_v63 = vmul.f32 %v5989_v23, %v5143_v2  ;;  %v5169_v29 = vmul.f32 %v5987_v41, %v5168_v27  ;;  %vm5181_vm9 = vweird.f32 %v5989_v23  ;;  %5251 = vmatpush.msrb.mxu2 %v5224_v42 }
0x258f   :  { %5990 = vrsqrt.f32 %v5140_v45  ;;  %vm5182_vm1 = vmor %vm5180_vm13, %vm5181_vm9  ;;  %vm5150_vm14 = vweird.f32 %v5140_v45 }
0x2590   :  { %v5176_v0 = vmul.f32 %v5989_v23, %v5175_v63  ;;  %v5173_v31 = vsel %vm5172_vm11, %v5987_v41, %v5169_v29 }
0x2591   :  { %v5186_v3 = vmul.f32 %v5173_v31, %v8006_v37  ;;  %v5193_v37 = vld [vmem:[%s8078_s0 + $0x40] sm:$0xff] }
0x2592   :  { %v5177_v43 = vmul.f32 0.5, %v5176_v0 }
0x2593   :  { %v5191_v19 = vmul.f32 %v5748_v14, %v5186_v3 }
0x2594   :  { %v5178_v20 = vsub.f32 1.5, %v5177_v43 }
0x2595   :  { %v5991_v24 = vpop.eup %5990 }
0x2596   :  { %v5179_v53 = vmul.f32 %v5989_v23, %v5178_v20  ;;  %v5145_v38 = vmul.f32 %v5991_v24, %v5140_v45  ;;  %vm5151_vm4 = vweird.f32 %v5991_v24 }
0x2597   :  { %vm5152_vm15 = vmor %vm5150_vm14, %vm5151_vm4 }
0x2598   :  { %v5183_v49 = vsel %vm5182_vm1, %v5989_v23, %v5179_v53  ;;  %v5146_v60 = vmul.f32 %v5991_v24, %v5145_v38 }
0x2599   :  { %v5187_v32 = vmul.f32 %v5183_v49, %v8012_v59 }
0x259a   :  { %v5147_v1 = vmul.f32 0.5, %v5146_v60 }
0x259b   :  { %v5192_v33 = vmul.f32 %v5748_v14, %v5187_v32 }
0x259c   :  { %v5148_v39 = vsub.f32 1.5, %v5147_v1 }
0x259d   :  { %5213 = vmatpush.msrb.mxu1 %v5192_v33 }
0x259e   :  { %v5149_v48 = vmul.f32 %v5991_v24, %v5148_v39 }
0x259f   :  { %5214 = vmatpush.msrb.mxu1 %v5191_v19 }
0x25a0   :  { %v5153_v59 = vsel %vm5152_vm15, %v5991_v24, %v5149_v48 }
0x25a1   :  { %5215 = vmatpush.msrb.mxu1 %v5190_v52  ;;  %v5184_v35 = vmul.f32 %v5153_v59, %v8021_v57 }
0x25a3   :  { %v5189_v47 = vmul.f32 %v5748_v14, %v5184_v35 }
0x25a5   :  { %5216 = vmatpush.msrb.mxu1 %v5189_v47 }
0x25a6   :  { %5735 = vmatmul.msk.f32.vlgmr.msrb.gmra.mxu1 %vm83_vm0, %v5193_v37 }
0x25ae   :  { %5736 = vmatmul.msk.f32.gmra.mxu1 %vm83_vm0, %v5194_v7 }
0x2623   :  { %v5218_v6 = vpop.f32.mrf.mxu1 }
0x2624   :  { %5737 = vmatmul.msk.f32.vlgmr.msrb.gmra.mxu2 %vm83_vm0, %v5218_v6 }
0x262b   :  { %v5221_v57 = vpop.f32.mrf.mxu1 }
0x262c   :  { %5738 = vmatmul.msk.f32.gmra.mxu2 %vm83_vm0, %v5221_v57 }
0x26a7   :  { %v5253_v21 = vpop.f32.mrf.mxu2 }
0x26a8   :  { %v5254_v50 = vadd.f32 %v5749_v10, %v5253_v21 }
0x26aa   :  { %v5259_v18 = vadd.f32 %v5254_v50, %v232_v15 }
0x26ac   :  { %5261 = vst.msk [vmem:[%s8079_s2] sm:$0xff] %vm341_vm2, %v5259_v18 }
0x26af   :  { %v5256_v55 = vpop.f32.mrf.mxu2 }
0x26b0   :  { %v5257_v56 = vadd.f32 %v5749_v10, %v5256_v55 }
0x26b2   :  { %v5260_v4 = vadd.f32 %v5257_v56, %v233_v61 }
0x26b4   :  { %5262 = vst.msk [vmem:[%s8079_s2 + $0x8] sm:$0xff] %vm341_vm2, %v5260_v4 }

</bundles_post_ra>
